<compile_context>
chip_gen: v7x
topology: tpu7x:2x2x1
jax: 0.10.0
libtpu: 0.0.40
codegen_flags: <defaults>
</compile_context>

<pallas_src>
import functools

import jax
import jax.numpy as jnp
from jax.experimental import pallas as pl
from jax.experimental.pallas import tpu as pltpu


def _ntm_kernel(
    # --- inputs (all fully VMEM-resident, no grid) ---
    x_ref,        # (T, B, D)   full time-major input
    mem0_ref,     # (N, M)      initial memory
    wr0_ref,      # (B, N)      initial read weights  (eye)
    ww0_ref,      # (B, N)      initial write weights (eye)
    h0_ref,       # (B, H)      initial hidden
    w_xr_ref,     # (D+M, H)    fused controller weight  [Wx ; Wrc]
    bh_ref,       # (1, H)
    w_ea_ref,     # (H, 2M)     write head [erase | add]
    b_ea_ref,     # (1, 2M)
    w_hall_ref,   # (H, 2(M+2)+O)  fused [W_w_addr | W_r_addr | Wo]
    b_hall_ref,   # (1, 2(M+2)+O)
    bn_g_ref,     # (1, M)      BatchNorm1d gamma
    bn_b_ref,     # (1, M)      BatchNorm1d beta
    # --- outputs ---
    out_ref,      # (T, B, O)
    *, mem_m, num_t, num_out,
):
    M = mem_m
    A = M + 2          # [key | beta | gate] width

    # Hoist parameter loads out of the time loop (resident in vregs/VMEM).
    w_xr = w_xr_ref[...]
    bh = bh_ref[...]
    w_ea = w_ea_ref[...]
    b_ea = b_ea_ref[...]
    w_hall = w_hall_ref[...]
    b_hall = b_hall_ref[...]
    bn_g = bn_g_ref[...]
    bn_b = bn_b_ref[...]

    def step(t, state):
        mem, wr, ww, h = state     # (N,M), (B,N), (B,N), (B,H)

        # ---- write head (get_weights=False): erase / add -> m_t ----------
        ea = jnp.dot(h, w_ea, preferred_element_type=jnp.float32) + b_ea   # (B, 2M)
        e = jax.nn.sigmoid(ea[:, :M])                                      # (B, M)
        a = jnp.tanh(ea[:, M:])                                            # (B, M)
        ea_act = jnp.concatenate([e, a], axis=1)                           # (B, 2M)
        # (N, 2M) = ww^T @ [e | a]  in one dot, contracting ww axis 0 (no .T)
        ea_mem = jax.lax.dot_general(
            ww, ea_act, (((0,), (0,)), ((), ())),
            preferred_element_type=jnp.float32)
        m_t = mem * (1.0 - ea_mem[:, :M]) + ea_mem[:, M:]                  # (N, M)

        # ---- read head (get_weights=False): read vector -------------------
        r_t = jnp.dot(wr, m_t, preferred_element_type=jnp.float32)         # (B, M)

        # ---- controller: single fused matmul over [x_t | r_t] -------------
        x_t = x_ref[t]                                                     # (B, D)
        xr = jnp.concatenate([x_t, r_t], axis=1)                           # (B, D+M)
        h_t = jnp.maximum(
            jnp.dot(xr, w_xr, preferred_element_type=jnp.float32) + bh, 0.0)  # (B, H)

        # ---- fused h_t projections: [write addr | read addr | out logits] -
        z_all = jnp.dot(h_t, w_hall, preferred_element_type=jnp.float32) + b_hall
        z_w = z_all[:, :A]                                                 # (B, M+2)
        z_r = z_all[:, A:2 * A]                                            # (B, M+2)
        out_logits = z_all[:, 2 * A:]                                      # (B, O)

        # ---- normalized memory rows (hoisted, shared by both heads) -------
        mn = m_t * jax.lax.rsqrt(
            jnp.sum(m_t * m_t, axis=-1, keepdims=True) + 1e-8)             # (N, M)

        def address(z, w_prev):
            k = jnp.tanh(z[:, :M])                                         # (B, M)
            beta = jax.nn.softplus(z[:, M:M + 1])                          # (B, 1)
            g = jax.nn.sigmoid(z[:, M + 1:M + 2])                          # (B, 1)
            kn = k * jax.lax.rsqrt(jnp.sum(k * k, axis=-1, keepdims=True) + 1e-8)
            # cosine similarity (B, N): contract last axes, no transpose.
            sim = jax.lax.dot_general(
                kn, mn, (((1,), (1,)), ((), ())),
                preferred_element_type=jnp.float32)
            sc = beta * sim
            sc = sc - jnp.max(sc, axis=-1, keepdims=True)
            p = jnp.exp(sc)
            wc = p / jnp.sum(p, axis=-1, keepdims=True)                    # softmax over N
            return g * wc + (1.0 - g) * w_prev

        ww_t = address(z_w, ww)
        wr_t = address(z_r, wr)

        # ---- mem_bn: BatchNorm1d over memory rows (training-mode stats) ----
        mean = jnp.mean(m_t, axis=0, keepdims=True)                        # (1, M)
        var = jnp.mean((m_t - mean) ** 2, axis=0, keepdims=True)           # biased var
        mem_bn = (m_t - mean) * jax.lax.rsqrt(var + 1e-5) * bn_g + bn_b

        # ---- out = sigmoid(hid_to_out(h_t)) --------------------------------
        out_ref[t] = jax.nn.sigmoid(out_logits)                            # (B, O)

        return (mem_bn, wr_t, ww_t, h_t)

    init = (mem0_ref[...], wr0_ref[...], ww0_ref[...], h0_ref[...])
    jax.lax.fori_loop(0, num_t, step, init, unroll=True)


def ntm_forward(x, params, memory_dims):
    """x: (B, T, 1, D_in) float32. Returns (B, T, num_outputs)."""
    B, T, _, D = x.shape
    N, M = memory_dims
    H = params["Wx"].shape[1]
    O = params["Wo"].shape[1]

    x_tm = jnp.transpose(x.reshape(B, T, D), (1, 0, 2))  # (T, B, D) time-major

    # ---- weight fusion (done once, outside the kernel) ----
    w_xr = jnp.concatenate([params["Wx"], params["Wrc"]], axis=0)            # (D+M, H)
    w_hall = jnp.concatenate(
        [params["W_w_addr"], params["W_r_addr"], params["Wo"]], axis=1)       # (H, 2(M+2)+O)
    b_hall = jnp.concatenate(
        [params["b_w_addr"], params["b_r_addr"], params["bo"]], axis=1)       # (1, 2(M+2)+O)

    inputs = [
        x_tm,
        params["memory0"], params["wr0"], params["ww0"], params["hidden0"],
        w_xr, params["bh"],
        params["W_w_ea"], params["b_w_ea"],
        w_hall, b_hall,
        params["bn_gamma"], params["bn_beta"],
    ]

    kernel = functools.partial(_ntm_kernel, mem_m=M, num_t=T, num_out=O)

    vmem_spec = pl.BlockSpec(memory_space=pltpu.MemorySpace.VMEM)

    outs_tm = pl.pallas_call(
        kernel,
        out_shape=jax.ShapeDtypeStruct((T, B, O), jnp.float32),
        in_specs=[vmem_spec] * len(inputs),
        out_specs=vmem_spec,
    )(*inputs)

    return jnp.transpose(outs_tm, (1, 0, 2))  # (B, T, O)


def make_params(key, *, D, H, M, N, O, B):
    ks = jax.random.split(key, 16)

    def lin(k, fan_in, shape):
        return jax.random.normal(k, shape, jnp.float32) / jnp.sqrt(float(fan_in))

    params = {
        # NTM state initialisation (matches the torch module's __init__/forward)
        "memory0": jax.random.uniform(ks[0], (N, M), jnp.float32),           # torch.rand
        "wr0": jnp.eye(B, N, dtype=jnp.float32),                              # torch.eye
        "ww0": jnp.eye(B, N, dtype=jnp.float32),
        "hidden0": jax.random.normal(ks[1], (B, H), jnp.float32) * (1.0 / H),
        # controller (feed-forward): h = relu(x @ Wx + r @ Wrc + bh)
        "Wx": lin(ks[2], D, (D, H)),
        "Wrc": lin(ks[3], M, (M, H)),
        "bh": jnp.zeros((1, H), jnp.float32),
        # write head: addressing [key|beta|gate] and [erase|add]
        "W_w_addr": lin(ks[4], H, (H, M + 2)),
        "b_w_addr": jnp.zeros((1, M + 2), jnp.float32),
        "W_w_ea": lin(ks[5], H, (H, 2 * M)),
        "b_w_ea": jnp.zeros((1, 2 * M), jnp.float32),
        # read head: addressing [key|beta|gate]
        "W_r_addr": lin(ks[6], H, (H, M + 2)),
        "b_r_addr": jnp.zeros((1, M + 2), jnp.float32),
        # hid_to_out
        "Wo": lin(ks[7], H, (H, O)),
        "bo": jnp.zeros((1, O), jnp.float32),
        # mem_bn (BatchNorm1d over M features), default affine init
        "bn_gamma": jnp.ones((1, M), jnp.float32),
        "bn_beta": jnp.zeros((1, M), jnp.float32),
    }
    return params


if __name__ == "__main__":
    # Small shapes consistent with the module's forward:
    #   x: (batch, seq, 1, num_inputs), memory_dims=(N, M), num_hidden=H
    B, T, D = 2, 8, 16
    N, M = 32, 16
    H, O = 32, 16

    key = jax.random.PRNGKey(0)
    kx, kp = jax.random.split(key)
    x = jax.random.uniform(kx, (B, T, 1, D), jnp.float32)
    params = make_params(kp, D=D, H=H, M=M, N=N, O=O, B=B)

    outs = ntm_forward(x, params, memory_dims=(N, M))
    outs = jax.block_until_ready(outs)

    assert outs.shape == (B, T, O), outs.shape
    assert bool(jnp.all(jnp.isfinite(outs)))
    print("KERNEL_OK")
</pallas_src>

<mosaic_0001>
module attributes {stable_mosaic.version = 11 : i64} {
  func.func @_ntm_kernel(%arg0: memref<8x2x16xf32, #tpu.memory_space<vmem>>, %arg1: memref<32x16xf32, #tpu.memory_space<vmem>>, %arg2: memref<2x32xf32, #tpu.memory_space<vmem>>, %arg3: memref<2x32xf32, #tpu.memory_space<vmem>>, %arg4: memref<2x32xf32, #tpu.memory_space<vmem>>, %arg5: memref<32x32xf32, #tpu.memory_space<vmem>>, %arg6: memref<1x32xf32, #tpu.memory_space<vmem>>, %arg7: memref<32x32xf32, #tpu.memory_space<vmem>>, %arg8: memref<1x32xf32, #tpu.memory_space<vmem>>, %arg9: memref<32x52xf32, #tpu.memory_space<vmem>>, %arg10: memref<1x52xf32, #tpu.memory_space<vmem>>, %arg11: memref<1x16xf32, #tpu.memory_space<vmem>>, %arg12: memref<1x16xf32, #tpu.memory_space<vmem>>, %arg13: memref<8x2x16xf32, #tpu.memory_space<vmem>>) attributes {dimension_semantics = [], scalar_prefetch = 0 : i64, scratch_operands = 0 : i64, tpu.core_type = #tpu.core_type<tc>} {
    %c0 = arith.constant 0 : index
    %c0_0 = arith.constant 0 : index
    %0 = vector.load %arg5[%c0, %c0_0] : memref<32x32xf32, #tpu.memory_space<vmem>>, vector<32x32xf32>
    %c0_1 = arith.constant 0 : index
    %c0_2 = arith.constant 0 : index
    %1 = vector.load %arg6[%c0_1, %c0_2] : memref<1x32xf32, #tpu.memory_space<vmem>>, vector<1x32xf32>
    %c0_3 = arith.constant 0 : index
    %c0_4 = arith.constant 0 : index
    %2 = vector.load %arg7[%c0_3, %c0_4] : memref<32x32xf32, #tpu.memory_space<vmem>>, vector<32x32xf32>
    %c0_5 = arith.constant 0 : index
    %c0_6 = arith.constant 0 : index
    %3 = vector.load %arg8[%c0_5, %c0_6] : memref<1x32xf32, #tpu.memory_space<vmem>>, vector<1x32xf32>
    %c0_7 = arith.constant 0 : index
    %c0_8 = arith.constant 0 : index
    %4 = vector.load %arg9[%c0_7, %c0_8] : memref<32x52xf32, #tpu.memory_space<vmem>>, vector<32x52xf32>
    %c0_9 = arith.constant 0 : index
    %c0_10 = arith.constant 0 : index
    %5 = vector.load %arg10[%c0_9, %c0_10] : memref<1x52xf32, #tpu.memory_space<vmem>>, vector<1x52xf32>
    %c0_11 = arith.constant 0 : index
    %c0_12 = arith.constant 0 : index
    %6 = vector.load %arg11[%c0_11, %c0_12] : memref<1x16xf32, #tpu.memory_space<vmem>>, vector<1x16xf32>
    %c0_13 = arith.constant 0 : index
    %c0_14 = arith.constant 0 : index
    %7 = vector.load %arg12[%c0_13, %c0_14] : memref<1x16xf32, #tpu.memory_space<vmem>>, vector<1x16xf32>
    %c0_15 = arith.constant 0 : index
    %c0_16 = arith.constant 0 : index
    %8 = vector.load %arg1[%c0_15, %c0_16] : memref<32x16xf32, #tpu.memory_space<vmem>>, vector<32x16xf32>
    %c0_17 = arith.constant 0 : index
    %c0_18 = arith.constant 0 : index
    %9 = vector.load %arg2[%c0_17, %c0_18] : memref<2x32xf32, #tpu.memory_space<vmem>>, vector<2x32xf32>
    %c0_19 = arith.constant 0 : index
    %c0_20 = arith.constant 0 : index
    %10 = vector.load %arg3[%c0_19, %c0_20] : memref<2x32xf32, #tpu.memory_space<vmem>>, vector<2x32xf32>
    %c0_21 = arith.constant 0 : index
    %c0_22 = arith.constant 0 : index
    %11 = vector.load %arg4[%c0_21, %c0_22] : memref<2x32xf32, #tpu.memory_space<vmem>>, vector<2x32xf32>
    %c0_i32 = arith.constant 0 : i32
    %cst = arith.constant dense<0.000000e+00> : vector<2x32xf32>
    %12 = tpu.matmul %11, %2, %cst {dimension_numbers = #tpu.dot_dimension_numbers<[1], [0], [0], [1], [0, 0, 1, 1], [], []>} : vector<2x32xf32>, vector<32x32xf32>, vector<2x32xf32> -> vector<2x32xf32>
    %13 = vector.broadcast %3 : vector<1x32xf32> to vector<2x32xf32>
    %14 = arith.addf %12, %13 : vector<2x32xf32>
    %15 = vector.extract_strided_slice %14 {offsets = [0, 0], sizes = [2, 16], strides = [1, 1]} : vector<2x32xf32> to vector<2x16xf32>
    %16 = arith.negf %15 : vector<2x16xf32>
    %17 = math.exp %16 : vector<2x16xf32>
    %cst_23 = arith.constant 1.000000e+00 : f32
    %18 = vector.broadcast %cst_23 : f32 to vector<2x16xf32>
    %19 = arith.addf %18, %17 : vector<2x16xf32>
    %20 = arith.divf %18, %19 : vector<2x16xf32>
    %21 = vector.extract_strided_slice %14 {offsets = [0, 16], sizes = [2, 16], strides = [1, 1]} : vector<2x32xf32> to vector<2x16xf32>
    %22 = math.tanh %21 : vector<2x16xf32>
    %23 = tpu.concatenate %20, %22 in 1 : vector<2x16xf32>, vector<2x16xf32> -> vector<2x32xf32>
    %cst_24 = arith.constant dense<0.000000e+00> : vector<32x32xf32>
    %24 = tpu.matmul %10, %23, %cst_24 {dimension_numbers = #tpu.dot_dimension_numbers<[0], [0], [1], [1], [0, 1, 1, 1], [], []>} : vector<2x32xf32>, vector<2x32xf32>, vector<32x32xf32> -> vector<32x32xf32>
    %25 = vector.extract_strided_slice %24 {offsets = [0, 0], sizes = [32, 16], strides = [1, 1]} : vector<32x32xf32> to vector<32x16xf32>
    %cst_25 = arith.constant 1.000000e+00 : f32
    %26 = vector.broadcast %cst_25 : f32 to vector<32x16xf32>
    %27 = arith.subf %26, %25 : vector<32x16xf32>
    %28 = arith.mulf %8, %27 : vector<32x16xf32>
    %29 = vector.extract_strided_slice %24 {offsets = [0, 16], sizes = [32, 16], strides = [1, 1]} : vector<32x32xf32> to vector<32x16xf32>
    %30 = arith.addf %28, %29 : vector<32x16xf32>
    %cst_26 = arith.constant dense<0.000000e+00> : vector<2x16xf32>
    %31 = tpu.matmul %9, %30, %cst_26 {dimension_numbers = #tpu.dot_dimension_numbers<[1], [0], [0], [1], [0, 0, 1, 1], [], []>} : vector<2x32xf32>, vector<32x16xf32>, vector<2x16xf32> -> vector<2x16xf32>
    %32 = arith.index_cast %c0_i32 : i32 to index
    %c0_27 = arith.constant 0 : index
    %c0_28 = arith.constant 0 : index
    %33 = vector.load %arg0[%32, %c0_27, %c0_28] : memref<8x2x16xf32, #tpu.memory_space<vmem>>, vector<1x2x16xf32>
    %34 = vector.shape_cast %33 : vector<1x2x16xf32> to vector<2x16xf32>
    %35 = tpu.concatenate %34, %31 in 1 : vector<2x16xf32>, vector<2x16xf32> -> vector<2x32xf32>
    %cst_29 = arith.constant dense<0.000000e+00> : vector<2x32xf32>
    %36 = tpu.matmul %35, %0, %cst_29 {dimension_numbers = #tpu.dot_dimension_numbers<[1], [0], [0], [1], [0, 0, 1, 1], [], []>} : vector<2x32xf32>, vector<32x32xf32>, vector<2x32xf32> -> vector<2x32xf32>
    %37 = vector.broadcast %1 : vector<1x32xf32> to vector<2x32xf32>
    %38 = arith.addf %36, %37 : vector<2x32xf32>
    %cst_30 = arith.constant 0.000000e+00 : f32
    %39 = vector.broadcast %cst_30 : f32 to vector<2x32xf32>
    %40 = arith.maximumf %38, %39 : vector<2x32xf32>
    %cst_31 = arith.constant dense<0.000000e+00> : vector<2x52xf32>
    %41 = tpu.matmul %40, %4, %cst_31 {dimension_numbers = #tpu.dot_dimension_numbers<[1], [0], [0], [1], [0, 0, 1, 1], [], []>} : vector<2x32xf32>, vector<32x52xf32>, vector<2x52xf32> -> vector<2x52xf32>
    %42 = vector.broadcast %5 : vector<1x52xf32> to vector<2x52xf32>
    %43 = arith.addf %41, %42 : vector<2x52xf32>
    %44 = vector.extract_strided_slice %43 {offsets = [0, 0], sizes = [2, 18], strides = [1, 1]} : vector<2x52xf32> to vector<2x18xf32>
    %45 = vector.extract_strided_slice %43 {offsets = [0, 18], sizes = [2, 18], strides = [1, 1]} : vector<2x52xf32> to vector<2x18xf32>
    %46 = vector.extract_strided_slice %43 {offsets = [0, 36], sizes = [2, 16], strides = [1, 1]} : vector<2x52xf32> to vector<2x16xf32>
    %47 = arith.mulf %30, %30 : vector<32x16xf32>
    %cst_32 = arith.constant dense<0.000000e+00> : vector<32xf32>
    %48 = vector.multi_reduction <add>, %47, %cst_32 [1] : vector<32x16xf32> to vector<32xf32>
    %49 = vector.shape_cast %48 : vector<32xf32> to vector<32x1xf32>
    %cst_33 = arith.constant 9.99999993E-9 : f32
    %50 = vector.broadcast %cst_33 : f32 to vector<32x1xf32>
    %51 = arith.addf %49, %50 : vector<32x1xf32>
    %52 = math.rsqrt %51 : vector<32x1xf32>
    %53 = vector.broadcast %52 : vector<32x1xf32> to vector<32x16xf32>
    %54 = arith.mulf %30, %53 : vector<32x16xf32>
    %55 = vector.extract_strided_slice %44 {offsets = [0, 0], sizes = [2, 16], strides = [1, 1]} : vector<2x18xf32> to vector<2x16xf32>
    %56 = math.tanh %55 : vector<2x16xf32>
    %57 = vector.extract_strided_slice %44 {offsets = [0, 16], sizes = [2, 1], strides = [1, 1]} : vector<2x18xf32> to vector<2x1xf32>
    %cst_34 = arith.constant 0.000000e+00 : f32
    %58 = vector.broadcast %cst_34 : f32 to vector<2x1xf32>
    %59 = arith.maximumf %57, %58 : vector<2x1xf32>
    %60 = vector.broadcast %cst_34 : f32 to vector<2x1xf32>
    %61 = arith.subf %57, %60 : vector<2x1xf32>
    %62 = arith.cmpf one, %61, %61 : vector<2x1xf32>
    %63 = vector.broadcast %cst_34 : f32 to vector<2x1xf32>
    %64 = arith.addf %57, %63 : vector<2x1xf32>
    %65 = math.absf %61 : vector<2x1xf32>
    %cst_35 = arith.constant 0.000000e+00 : f32
    %66 = vector.broadcast %cst_35 : f32 to vector<2x1xf32>
    %67 = arith.subf %66, %65 : vector<2x1xf32>
    %68 = math.exp %67 : vector<2x1xf32>
    %69 = math.log1p %68 : vector<2x1xf32>
    %70 = arith.addf %59, %69 : vector<2x1xf32>
    %71 = arith.select %62, %64, %70 : vector<2x1xi1>, vector<2x1xf32>
    %72 = vector.extract_strided_slice %44 {offsets = [0, 17], sizes = [2, 1], strides = [1, 1]} : vector<2x18xf32> to vector<2x1xf32>
    %73 = arith.negf %72 : vector<2x1xf32>
    %74 = math.exp %73 : vector<2x1xf32>
    %cst_36 = arith.constant 1.000000e+00 : f32
    %75 = vector.broadcast %cst_36 : f32 to vector<2x1xf32>
    %76 = arith.addf %75, %74 : vector<2x1xf32>
    %77 = arith.divf %75, %76 : vector<2x1xf32>
    %78 = arith.mulf %56, %56 : vector<2x16xf32>
    %cst_37 = arith.constant dense<0.000000e+00> : vector<2xf32>
    %79 = vector.multi_reduction <add>, %78, %cst_37 [1] : vector<2x16xf32> to vector<2xf32>
    %80 = vector.shape_cast %79 : vector<2xf32> to vector<2x1xf32>
    %cst_38 = arith.constant 9.99999993E-9 : f32
    %81 = vector.broadcast %cst_38 : f32 to vector<2x1xf32>
    %82 = arith.addf %80, %81 : vector<2x1xf32>
    %83 = math.rsqrt %82 : vector<2x1xf32>
    %84 = vector.broadcast %83 : vector<2x1xf32> to vector<2x16xf32>
    %85 = arith.mulf %56, %84 : vector<2x16xf32>
    %cst_39 = arith.constant dense<0.000000e+00> : vector<2x32xf32>
    %86 = tpu.matmul %85, %54, %cst_39 {dimension_numbers = #tpu.dot_dimension_numbers<[1], [1], [0], [0], [0, 0, 1, 0], [], []>} : vector<2x16xf32>, vector<32x16xf32>, vector<2x32xf32> -> vector<2x32xf32>
    %87 = vector.broadcast %71 : vector<2x1xf32> to vector<2x32xf32>
    %88 = arith.mulf %87, %86 : vector<2x32xf32>
    %cst_40 = arith.constant dense<0xFF800000> : vector<2xf32>
    %89 = vector.multi_reduction <maximumf>, %88, %cst_40 [1] : vector<2x32xf32> to vector<2xf32>
    %90 = vector.shape_cast %89 : vector<2xf32> to vector<2x1xf32>
    %91 = vector.broadcast %90 : vector<2x1xf32> to vector<2x32xf32>
    %92 = arith.subf %88, %91 : vector<2x32xf32>
    %93 = math.exp %92 : vector<2x32xf32>
    %cst_41 = arith.constant dense<0.000000e+00> : vector<2xf32>
    %94 = vector.multi_reduction <add>, %93, %cst_41 [1] : vector<2x32xf32> to vector<2xf32>
    %95 = vector.shape_cast %94 : vector<2xf32> to vector<2x1xf32>
    %96 = vector.broadcast %95 : vector<2x1xf32> to vector<2x32xf32>
    %97 = arith.divf %93, %96 : vector<2x32xf32>
    %98 = vector.broadcast %77 : vector<2x1xf32> to vector<2x32xf32>
    %99 = arith.mulf %98, %97 : vector<2x32xf32>
    %cst_42 = arith.constant 1.000000e+00 : f32
    %100 = vector.broadcast %cst_42 : f32 to vector<2x1xf32>
    %101 = arith.subf %100, %77 : vector<2x1xf32>
    %102 = vector.broadcast %101 : vector<2x1xf32> to vector<2x32xf32>
    %103 = arith.mulf %102, %10 : vector<2x32xf32>
    %104 = arith.addf %99, %103 : vector<2x32xf32>
    %105 = vector.extract_strided_slice %45 {offsets = [0, 0], sizes = [2, 16], strides = [1, 1]} : vector<2x18xf32> to vector<2x16xf32>
    %106 = math.tanh %105 : vector<2x16xf32>
    %107 = vector.extract_strided_slice %45 {offsets = [0, 16], sizes = [2, 1], strides = [1, 1]} : vector<2x18xf32> to vector<2x1xf32>
    %cst_43 = arith.constant 0.000000e+00 : f32
    %108 = vector.broadcast %cst_43 : f32 to vector<2x1xf32>
    %109 = arith.maximumf %107, %108 : vector<2x1xf32>
    %110 = vector.broadcast %cst_43 : f32 to vector<2x1xf32>
    %111 = arith.subf %107, %110 : vector<2x1xf32>
    %112 = arith.cmpf one, %111, %111 : vector<2x1xf32>
    %113 = vector.broadcast %cst_43 : f32 to vector<2x1xf32>
    %114 = arith.addf %107, %113 : vector<2x1xf32>
    %115 = math.absf %111 : vector<2x1xf32>
    %cst_44 = arith.constant 0.000000e+00 : f32
    %116 = vector.broadcast %cst_44 : f32 to vector<2x1xf32>
    %117 = arith.subf %116, %115 : vector<2x1xf32>
    %118 = math.exp %117 : vector<2x1xf32>
    %119 = math.log1p %118 : vector<2x1xf32>
    %120 = arith.addf %109, %119 : vector<2x1xf32>
    %121 = arith.select %112, %114, %120 : vector<2x1xi1>, vector<2x1xf32>
    %122 = vector.extract_strided_slice %45 {offsets = [0, 17], sizes = [2, 1], strides = [1, 1]} : vector<2x18xf32> to vector<2x1xf32>
    %123 = arith.negf %122 : vector<2x1xf32>
    %124 = math.exp %123 : vector<2x1xf32>
    %cst_45 = arith.constant 1.000000e+00 : f32
    %125 = vector.broadcast %cst_45 : f32 to vector<2x1xf32>
    %126 = arith.addf %125, %124 : vector<2x1xf32>
    %127 = arith.divf %125, %126 : vector<2x1xf32>
    %128 = arith.mulf %106, %106 : vector<2x16xf32>
    %cst_46 = arith.constant dense<0.000000e+00> : vector<2xf32>
    %129 = vector.multi_reduction <add>, %128, %cst_46 [1] : vector<2x16xf32> to vector<2xf32>
    %130 = vector.shape_cast %129 : vector<2xf32> to vector<2x1xf32>
    %cst_47 = arith.constant 9.99999993E-9 : f32
    %131 = vector.broadcast %cst_47 : f32 to vector<2x1xf32>
    %132 = arith.addf %130, %131 : vector<2x1xf32>
    %133 = math.rsqrt %132 : vector<2x1xf32>
    %134 = vector.broadcast %133 : vector<2x1xf32> to vector<2x16xf32>
    %135 = arith.mulf %106, %134 : vector<2x16xf32>
    %cst_48 = arith.constant dense<0.000000e+00> : vector<2x32xf32>
    %136 = tpu.matmul %135, %54, %cst_48 {dimension_numbers = #tpu.dot_dimension_numbers<[1], [1], [0], [0], [0, 0, 1, 0], [], []>} : vector<2x16xf32>, vector<32x16xf32>, vector<2x32xf32> -> vector<2x32xf32>
    %137 = vector.broadcast %121 : vector<2x1xf32> to vector<2x32xf32>
    %138 = arith.mulf %137, %136 : vector<2x32xf32>
    %cst_49 = arith.constant dense<0xFF800000> : vector<2xf32>
    %139 = vector.multi_reduction <maximumf>, %138, %cst_49 [1] : vector<2x32xf32> to vector<2xf32>
    %140 = vector.shape_cast %139 : vector<2xf32> to vector<2x1xf32>
    %141 = vector.broadcast %140 : vector<2x1xf32> to vector<2x32xf32>
    %142 = arith.subf %138, %141 : vector<2x32xf32>
    %143 = math.exp %142 : vector<2x32xf32>
    %cst_50 = arith.constant dense<0.000000e+00> : vector<2xf32>
    %144 = vector.multi_reduction <add>, %143, %cst_50 [1] : vector<2x32xf32> to vector<2xf32>
    %145 = vector.shape_cast %144 : vector<2xf32> to vector<2x1xf32>
    %146 = vector.broadcast %145 : vector<2x1xf32> to vector<2x32xf32>
    %147 = arith.divf %143, %146 : vector<2x32xf32>
    %148 = vector.broadcast %127 : vector<2x1xf32> to vector<2x32xf32>
    %149 = arith.mulf %148, %147 : vector<2x32xf32>
    %cst_51 = arith.constant 1.000000e+00 : f32
    %150 = vector.broadcast %cst_51 : f32 to vector<2x1xf32>
    %151 = arith.subf %150, %127 : vector<2x1xf32>
    %152 = vector.broadcast %151 : vector<2x1xf32> to vector<2x32xf32>
    %153 = arith.mulf %152, %9 : vector<2x32xf32>
    %154 = arith.addf %149, %153 : vector<2x32xf32>
    %cst_52 = arith.constant dense<0.000000e+00> : vector<16xf32>
    %155 = vector.multi_reduction <add>, %30, %cst_52 [0] : vector<32x16xf32> to vector<16xf32>
    %156 = vector.shape_cast %155 : vector<16xf32> to vector<1x16xf32>
    %cst_53 = arith.constant 3.200000e+01 : f32
    %157 = vector.broadcast %cst_53 : f32 to vector<1x16xf32>
    %158 = arith.divf %156, %157 : vector<1x16xf32>
    %159 = vector.broadcast %158 : vector<1x16xf32> to vector<32x16xf32>
    %160 = arith.subf %30, %159 : vector<32x16xf32>
    %161 = arith.mulf %160, %160 : vector<32x16xf32>
    %cst_54 = arith.constant dense<0.000000e+00> : vector<16xf32>
    %162 = vector.multi_reduction <add>, %161, %cst_54 [0] : vector<32x16xf32> to vector<16xf32>
    %163 = vector.shape_cast %162 : vector<16xf32> to vector<1x16xf32>
    %cst_55 = arith.constant 3.200000e+01 : f32
    %164 = vector.broadcast %cst_55 : f32 to vector<1x16xf32>
    %165 = arith.divf %163, %164 : vector<1x16xf32>
    %166 = vector.broadcast %158 : vector<1x16xf32> to vector<32x16xf32>
    %167 = arith.subf %30, %166 : vector<32x16xf32>
    %cst_56 = arith.constant 9.99999974E-6 : f32
    %168 = vector.broadcast %cst_56 : f32 to vector<1x16xf32>
    %169 = arith.addf %165, %168 : vector<1x16xf32>
    %170 = math.rsqrt %169 : vector<1x16xf32>
    %171 = vector.broadcast %170 : vector<1x16xf32> to vector<32x16xf32>
    %172 = arith.mulf %167, %171 : vector<32x16xf32>
    %173 = vector.broadcast %6 : vector<1x16xf32> to vector<32x16xf32>
    %174 = arith.mulf %172, %173 : vector<32x16xf32>
    %175 = vector.broadcast %7 : vector<1x16xf32> to vector<32x16xf32>
    %176 = arith.addf %174, %175 : vector<32x16xf32>
    %177 = arith.negf %46 : vector<2x16xf32>
    %178 = math.exp %177 : vector<2x16xf32>
    %cst_57 = arith.constant 1.000000e+00 : f32
    %179 = vector.broadcast %cst_57 : f32 to vector<2x16xf32>
    %180 = arith.addf %179, %178 : vector<2x16xf32>
    %181 = arith.divf %179, %180 : vector<2x16xf32>
    %182 = arith.index_cast %c0_i32 : i32 to index
    %c0_58 = arith.constant 0 : index
    %c0_59 = arith.constant 0 : index
    %183 = vector.load %arg13[%182, %c0_58, %c0_59] : memref<8x2x16xf32, #tpu.memory_space<vmem>>, vector<1x2x16xf32>
    %184 = vector.shape_cast %183 : vector<1x2x16xf32> to vector<2x16xf32>
    %185 = vector.shape_cast %181 : vector<2x16xf32> to vector<1x2x16xf32>
    tpu.vector_store %arg13[%182, %c0_58, %c0_59], %185 {strides = array<i32>} : memref<8x2x16xf32, #tpu.memory_space<vmem>>, vector<1x2x16xf32>,
    %c1_i32 = arith.constant 1 : i32
    %cst_60 = arith.constant dense<0.000000e+00> : vector<2x32xf32>
    %186 = tpu.matmul %40, %2, %cst_60 {dimension_numbers = #tpu.dot_dimension_numbers<[1], [0], [0], [1], [0, 0, 1, 1], [], []>} : vector<2x32xf32>, vector<32x32xf32>, vector<2x32xf32> -> vector<2x32xf32>
    %187 = vector.broadcast %3 : vector<1x32xf32> to vector<2x32xf32>
    %188 = arith.addf %186, %187 : vector<2x32xf32>
    %189 = vector.extract_strided_slice %188 {offsets = [0, 0], sizes = [2, 16], strides = [1, 1]} : vector<2x32xf32> to vector<2x16xf32>
    %190 = arith.negf %189 : vector<2x16xf32>
    %191 = math.exp %190 : vector<2x16xf32>
    %cst_61 = arith.constant 1.000000e+00 : f32
    %192 = vector.broadcast %cst_61 : f32 to vector<2x16xf32>
    %193 = arith.addf %192, %191 : vector<2x16xf32>
    %194 = arith.divf %192, %193 : vector<2x16xf32>
    %195 = vector.extract_strided_slice %188 {offsets = [0, 16], sizes = [2, 16], strides = [1, 1]} : vector<2x32xf32> to vector<2x16xf32>
    %196 = math.tanh %195 : vector<2x16xf32>
    %197 = tpu.concatenate %194, %196 in 1 : vector<2x16xf32>, vector<2x16xf32> -> vector<2x32xf32>
    %cst_62 = arith.constant dense<0.000000e+00> : vector<32x32xf32>
    %198 = tpu.matmul %104, %197, %cst_62 {dimension_numbers = #tpu.dot_dimension_numbers<[0], [0], [1], [1], [0, 1, 1, 1], [], []>} : vector<2x32xf32>, vector<2x32xf32>, vector<32x32xf32> -> vector<32x32xf32>
    %199 = vector.extract_strided_slice %198 {offsets = [0, 0], sizes = [32, 16], strides = [1, 1]} : vector<32x32xf32> to vector<32x16xf32>
    %cst_63 = arith.constant 1.000000e+00 : f32
    %200 = vector.broadcast %cst_63 : f32 to vector<32x16xf32>
    %201 = arith.subf %200, %199 : vector<32x16xf32>
    %202 = arith.mulf %176, %201 : vector<32x16xf32>
    %203 = vector.extract_strided_slice %198 {offsets = [0, 16], sizes = [32, 16], strides = [1, 1]} : vector<32x32xf32> to vector<32x16xf32>
    %204 = arith.addf %202, %203 : vector<32x16xf32>
    %cst_64 = arith.constant dense<0.000000e+00> : vector<2x16xf32>
    %205 = tpu.matmul %154, %204, %cst_64 {dimension_numbers = #tpu.dot_dimension_numbers<[1], [0], [0], [1], [0, 0, 1, 1], [], []>} : vector<2x32xf32>, vector<32x16xf32>, vector<2x16xf32> -> vector<2x16xf32>
    %206 = arith.index_cast %c1_i32 : i32 to index
    %c0_65 = arith.constant 0 : index
    %c0_66 = arith.constant 0 : index
    %207 = vector.load %arg0[%206, %c0_65, %c0_66] : memref<8x2x16xf32, #tpu.memory_space<vmem>>, vector<1x2x16xf32>
    %208 = vector.shape_cast %207 : vector<1x2x16xf32> to vector<2x16xf32>
    %209 = tpu.concatenate %208, %205 in 1 : vector<2x16xf32>, vector<2x16xf32> -> vector<2x32xf32>
    %cst_67 = arith.constant dense<0.000000e+00> : vector<2x32xf32>
    %210 = tpu.matmul %209, %0, %cst_67 {dimension_numbers = #tpu.dot_dimension_numbers<[1], [0], [0], [1], [0, 0, 1, 1], [], []>} : vector<2x32xf32>, vector<32x32xf32>, vector<2x32xf32> -> vector<2x32xf32>
    %211 = vector.broadcast %1 : vector<1x32xf32> to vector<2x32xf32>
    %212 = arith.addf %210, %211 : vector<2x32xf32>
    %cst_68 = arith.constant 0.000000e+00 : f32
    %213 = vector.broadcast %cst_68 : f32 to vector<2x32xf32>
    %214 = arith.maximumf %212, %213 : vector<2x32xf32>
    %cst_69 = arith.constant dense<0.000000e+00> : vector<2x52xf32>
    %215 = tpu.matmul %214, %4, %cst_69 {dimension_numbers = #tpu.dot_dimension_numbers<[1], [0], [0], [1], [0, 0, 1, 1], [], []>} : vector<2x32xf32>, vector<32x52xf32>, vector<2x52xf32> -> vector<2x52xf32>
    %216 = vector.broadcast %5 : vector<1x52xf32> to vector<2x52xf32>
    %217 = arith.addf %215, %216 : vector<2x52xf32>
    %218 = vector.extract_strided_slice %217 {offsets = [0, 0], sizes = [2, 18], strides = [1, 1]} : vector<2x52xf32> to vector<2x18xf32>
    %219 = vector.extract_strided_slice %217 {offsets = [0, 18], sizes = [2, 18], strides = [1, 1]} : vector<2x52xf32> to vector<2x18xf32>
    %220 = vector.extract_strided_slice %217 {offsets = [0, 36], sizes = [2, 16], strides = [1, 1]} : vector<2x52xf32> to vector<2x16xf32>
    %221 = arith.mulf %204, %204 : vector<32x16xf32>
    %cst_70 = arith.constant dense<0.000000e+00> : vector<32xf32>
    %222 = vector.multi_reduction <add>, %221, %cst_70 [1] : vector<32x16xf32> to vector<32xf32>
    %223 = vector.shape_cast %222 : vector<32xf32> to vector<32x1xf32>
    %cst_71 = arith.constant 9.99999993E-9 : f32
    %224 = vector.broadcast %cst_71 : f32 to vector<32x1xf32>
    %225 = arith.addf %223, %224 : vector<32x1xf32>
    %226 = math.rsqrt %225 : vector<32x1xf32>
    %227 = vector.broadcast %226 : vector<32x1xf32> to vector<32x16xf32>
    %228 = arith.mulf %204, %227 : vector<32x16xf32>
    %229 = vector.extract_strided_slice %218 {offsets = [0, 0], sizes = [2, 16], strides = [1, 1]} : vector<2x18xf32> to vector<2x16xf32>
    %230 = math.tanh %229 : vector<2x16xf32>
    %231 = vector.extract_strided_slice %218 {offsets = [0, 16], sizes = [2, 1], strides = [1, 1]} : vector<2x18xf32> to vector<2x1xf32>
    %cst_72 = arith.constant 0.000000e+00 : f32
    %232 = vector.broadcast %cst_72 : f32 to vector<2x1xf32>
    %233 = arith.maximumf %231, %232 : vector<2x1xf32>
    %234 = vector.broadcast %cst_72 : f32 to vector<2x1xf32>
    %235 = arith.subf %231, %234 : vector<2x1xf32>
    %236 = arith.cmpf one, %235, %235 : vector<2x1xf32>
    %237 = vector.broadcast %cst_72 : f32 to vector<2x1xf32>
    %238 = arith.addf %231, %237 : vector<2x1xf32>
    %239 = math.absf %235 : vector<2x1xf32>
    %cst_73 = arith.constant 0.000000e+00 : f32
    %240 = vector.broadcast %cst_73 : f32 to vector<2x1xf32>
    %241 = arith.subf %240, %239 : vector<2x1xf32>
    %242 = math.exp %241 : vector<2x1xf32>
    %243 = math.log1p %242 : vector<2x1xf32>
    %244 = arith.addf %233, %243 : vector<2x1xf32>
    %245 = arith.select %236, %238, %244 : vector<2x1xi1>, vector<2x1xf32>
    %246 = vector.extract_strided_slice %218 {offsets = [0, 17], sizes = [2, 1], strides = [1, 1]} : vector<2x18xf32> to vector<2x1xf32>
    %247 = arith.negf %246 : vector<2x1xf32>
    %248 = math.exp %247 : vector<2x1xf32>
    %cst_74 = arith.constant 1.000000e+00 : f32
    %249 = vector.broadcast %cst_74 : f32 to vector<2x1xf32>
    %250 = arith.addf %249, %248 : vector<2x1xf32>
    %251 = arith.divf %249, %250 : vector<2x1xf32>
    %252 = arith.mulf %230, %230 : vector<2x16xf32>
    %cst_75 = arith.constant dense<0.000000e+00> : vector<2xf32>
    %253 = vector.multi_reduction <add>, %252, %cst_75 [1] : vector<2x16xf32> to vector<2xf32>
    %254 = vector.shape_cast %253 : vector<2xf32> to vector<2x1xf32>
    %cst_76 = arith.constant 9.99999993E-9 : f32
    %255 = vector.broadcast %cst_76 : f32 to vector<2x1xf32>
    %256 = arith.addf %254, %255 : vector<2x1xf32>
    %257 = math.rsqrt %256 : vector<2x1xf32>
    %258 = vector.broadcast %257 : vector<2x1xf32> to vector<2x16xf32>
    %259 = arith.mulf %230, %258 : vector<2x16xf32>
    %cst_77 = arith.constant dense<0.000000e+00> : vector<2x32xf32>
    %260 = tpu.matmul %259, %228, %cst_77 {dimension_numbers = #tpu.dot_dimension_numbers<[1], [1], [0], [0], [0, 0, 1, 0], [], []>} : vector<2x16xf32>, vector<32x16xf32>, vector<2x32xf32> -> vector<2x32xf32>
    %261 = vector.broadcast %245 : vector<2x1xf32> to vector<2x32xf32>
    %262 = arith.mulf %261, %260 : vector<2x32xf32>
    %cst_78 = arith.constant dense<0xFF800000> : vector<2xf32>
    %263 = vector.multi_reduction <maximumf>, %262, %cst_78 [1] : vector<2x32xf32> to vector<2xf32>
    %264 = vector.shape_cast %263 : vector<2xf32> to vector<2x1xf32>
    %265 = vector.broadcast %264 : vector<2x1xf32> to vector<2x32xf32>
    %266 = arith.subf %262, %265 : vector<2x32xf32>
    %267 = math.exp %266 : vector<2x32xf32>
    %cst_79 = arith.constant dense<0.000000e+00> : vector<2xf32>
    %268 = vector.multi_reduction <add>, %267, %cst_79 [1] : vector<2x32xf32> to vector<2xf32>
    %269 = vector.shape_cast %268 : vector<2xf32> to vector<2x1xf32>
    %270 = vector.broadcast %269 : vector<2x1xf32> to vector<2x32xf32>
    %271 = arith.divf %267, %270 : vector<2x32xf32>
    %272 = vector.broadcast %251 : vector<2x1xf32> to vector<2x32xf32>
    %273 = arith.mulf %272, %271 : vector<2x32xf32>
    %cst_80 = arith.constant 1.000000e+00 : f32
    %274 = vector.broadcast %cst_80 : f32 to vector<2x1xf32>
    %275 = arith.subf %274, %251 : vector<2x1xf32>
    %276 = vector.broadcast %275 : vector<2x1xf32> to vector<2x32xf32>
    %277 = arith.mulf %276, %104 : vector<2x32xf32>
    %278 = arith.addf %273, %277 : vector<2x32xf32>
    %279 = vector.extract_strided_slice %219 {offsets = [0, 0], sizes = [2, 16], strides = [1, 1]} : vector<2x18xf32> to vector<2x16xf32>
    %280 = math.tanh %279 : vector<2x16xf32>
    %281 = vector.extract_strided_slice %219 {offsets = [0, 16], sizes = [2, 1], strides = [1, 1]} : vector<2x18xf32> to vector<2x1xf32>
    %cst_81 = arith.constant 0.000000e+00 : f32
    %282 = vector.broadcast %cst_81 : f32 to vector<2x1xf32>
    %283 = arith.maximumf %281, %282 : vector<2x1xf32>
    %284 = vector.broadcast %cst_81 : f32 to vector<2x1xf32>
    %285 = arith.subf %281, %284 : vector<2x1xf32>
    %286 = arith.cmpf one, %285, %285 : vector<2x1xf32>
    %287 = vector.broadcast %cst_81 : f32 to vector<2x1xf32>
    %288 = arith.addf %281, %287 : vector<2x1xf32>
    %289 = math.absf %285 : vector<2x1xf32>
    %cst_82 = arith.constant 0.000000e+00 : f32
    %290 = vector.broadcast %cst_82 : f32 to vector<2x1xf32>
    %291 = arith.subf %290, %289 : vector<2x1xf32>
    %292 = math.exp %291 : vector<2x1xf32>
    %293 = math.log1p %292 : vector<2x1xf32>
    %294 = arith.addf %283, %293 : vector<2x1xf32>
    %295 = arith.select %286, %288, %294 : vector<2x1xi1>, vector<2x1xf32>
    %296 = vector.extract_strided_slice %219 {offsets = [0, 17], sizes = [2, 1], strides = [1, 1]} : vector<2x18xf32> to vector<2x1xf32>
    %297 = arith.negf %296 : vector<2x1xf32>
    %298 = math.exp %297 : vector<2x1xf32>
    %cst_83 = arith.constant 1.000000e+00 : f32
    %299 = vector.broadcast %cst_83 : f32 to vector<2x1xf32>
    %300 = arith.addf %299, %298 : vector<2x1xf32>
    %301 = arith.divf %299, %300 : vector<2x1xf32>
    %302 = arith.mulf %280, %280 : vector<2x16xf32>
    %cst_84 = arith.constant dense<0.000000e+00> : vector<2xf32>
    %303 = vector.multi_reduction <add>, %302, %cst_84 [1] : vector<2x16xf32> to vector<2xf32>
    %304 = vector.shape_cast %303 : vector<2xf32> to vector<2x1xf32>
    %cst_85 = arith.constant 9.99999993E-9 : f32
    %305 = vector.broadcast %cst_85 : f32 to vector<2x1xf32>
    %306 = arith.addf %304, %305 : vector<2x1xf32>
    %307 = math.rsqrt %306 : vector<2x1xf32>
    %308 = vector.broadcast %307 : vector<2x1xf32> to vector<2x16xf32>
    %309 = arith.mulf %280, %308 : vector<2x16xf32>
    %cst_86 = arith.constant dense<0.000000e+00> : vector<2x32xf32>
    %310 = tpu.matmul %309, %228, %cst_86 {dimension_numbers = #tpu.dot_dimension_numbers<[1], [1], [0], [0], [0, 0, 1, 0], [], []>} : vector<2x16xf32>, vector<32x16xf32>, vector<2x32xf32> -> vector<2x32xf32>
    %311 = vector.broadcast %295 : vector<2x1xf32> to vector<2x32xf32>
    %312 = arith.mulf %311, %310 : vector<2x32xf32>
    %cst_87 = arith.constant dense<0xFF800000> : vector<2xf32>
    %313 = vector.multi_reduction <maximumf>, %312, %cst_87 [1] : vector<2x32xf32> to vector<2xf32>
    %314 = vector.shape_cast %313 : vector<2xf32> to vector<2x1xf32>
    %315 = vector.broadcast %314 : vector<2x1xf32> to vector<2x32xf32>
    %316 = arith.subf %312, %315 : vector<2x32xf32>
    %317 = math.exp %316 : vector<2x32xf32>
    %cst_88 = arith.constant dense<0.000000e+00> : vector<2xf32>
    %318 = vector.multi_reduction <add>, %317, %cst_88 [1] : vector<2x32xf32> to vector<2xf32>
    %319 = vector.shape_cast %318 : vector<2xf32> to vector<2x1xf32>
    %320 = vector.broadcast %319 : vector<2x1xf32> to vector<2x32xf32>
    %321 = arith.divf %317, %320 : vector<2x32xf32>
    %322 = vector.broadcast %301 : vector<2x1xf32> to vector<2x32xf32>
    %323 = arith.mulf %322, %321 : vector<2x32xf32>
    %cst_89 = arith.constant 1.000000e+00 : f32
    %324 = vector.broadcast %cst_89 : f32 to vector<2x1xf32>
    %325 = arith.subf %324, %301 : vector<2x1xf32>
    %326 = vector.broadcast %325 : vector<2x1xf32> to vector<2x32xf32>
    %327 = arith.mulf %326, %154 : vector<2x32xf32>
    %328 = arith.addf %323, %327 : vector<2x32xf32>
    %cst_90 = arith.constant dense<0.000000e+00> : vector<16xf32>
    %329 = vector.multi_reduction <add>, %204, %cst_90 [0] : vector<32x16xf32> to vector<16xf32>
    %330 = vector.shape_cast %329 : vector<16xf32> to vector<1x16xf32>
    %cst_91 = arith.constant 3.200000e+01 : f32
    %331 = vector.broadcast %cst_91 : f32 to vector<1x16xf32>
    %332 = arith.divf %330, %331 : vector<1x16xf32>
    %333 = vector.broadcast %332 : vector<1x16xf32> to vector<32x16xf32>
    %334 = arith.subf %204, %333 : vector<32x16xf32>
    %335 = arith.mulf %334, %334 : vector<32x16xf32>
    %cst_92 = arith.constant dense<0.000000e+00> : vector<16xf32>
    %336 = vector.multi_reduction <add>, %335, %cst_92 [0] : vector<32x16xf32> to vector<16xf32>
    %337 = vector.shape_cast %336 : vector<16xf32> to vector<1x16xf32>
    %cst_93 = arith.constant 3.200000e+01 : f32
    %338 = vector.broadcast %cst_93 : f32 to vector<1x16xf32>
    %339 = arith.divf %337, %338 : vector<1x16xf32>
    %340 = vector.broadcast %332 : vector<1x16xf32> to vector<32x16xf32>
    %341 = arith.subf %204, %340 : vector<32x16xf32>
    %cst_94 = arith.constant 9.99999974E-6 : f32
    %342 = vector.broadcast %cst_94 : f32 to vector<1x16xf32>
    %343 = arith.addf %339, %342 : vector<1x16xf32>
    %344 = math.rsqrt %343 : vector<1x16xf32>
    %345 = vector.broadcast %344 : vector<1x16xf32> to vector<32x16xf32>
    %346 = arith.mulf %341, %345 : vector<32x16xf32>
    %347 = vector.broadcast %6 : vector<1x16xf32> to vector<32x16xf32>
    %348 = arith.mulf %346, %347 : vector<32x16xf32>
    %349 = vector.broadcast %7 : vector<1x16xf32> to vector<32x16xf32>
    %350 = arith.addf %348, %349 : vector<32x16xf32>
    %351 = arith.negf %220 : vector<2x16xf32>
    %352 = math.exp %351 : vector<2x16xf32>
    %cst_95 = arith.constant 1.000000e+00 : f32
    %353 = vector.broadcast %cst_95 : f32 to vector<2x16xf32>
    %354 = arith.addf %353, %352 : vector<2x16xf32>
    %355 = arith.divf %353, %354 : vector<2x16xf32>
    %356 = arith.index_cast %c1_i32 : i32 to index
    %c0_96 = arith.constant 0 : index
    %c0_97 = arith.constant 0 : index
    %357 = vector.load %arg13[%356, %c0_96, %c0_97] : memref<8x2x16xf32, #tpu.memory_space<vmem>>, vector<1x2x16xf32>
    %358 = vector.shape_cast %357 : vector<1x2x16xf32> to vector<2x16xf32>
    %359 = vector.shape_cast %355 : vector<2x16xf32> to vector<1x2x16xf32>
    tpu.vector_store %arg13[%356, %c0_96, %c0_97], %359 {strides = array<i32>} : memref<8x2x16xf32, #tpu.memory_space<vmem>>, vector<1x2x16xf32>,
    %c2_i32 = arith.constant 2 : i32
    %cst_98 = arith.constant dense<0.000000e+00> : vector<2x32xf32>
    %360 = tpu.matmul %214, %2, %cst_98 {dimension_numbers = #tpu.dot_dimension_numbers<[1], [0], [0], [1], [0, 0, 1, 1], [], []>} : vector<2x32xf32>, vector<32x32xf32>, vector<2x32xf32> -> vector<2x32xf32>
    %361 = vector.broadcast %3 : vector<1x32xf32> to vector<2x32xf32>
    %362 = arith.addf %360, %361 : vector<2x32xf32>
    %363 = vector.extract_strided_slice %362 {offsets = [0, 0], sizes = [2, 16], strides = [1, 1]} : vector<2x32xf32> to vector<2x16xf32>
    %364 = arith.negf %363 : vector<2x16xf32>
    %365 = math.exp %364 : vector<2x16xf32>
    %cst_99 = arith.constant 1.000000e+00 : f32
    %366 = vector.broadcast %cst_99 : f32 to vector<2x16xf32>
    %367 = arith.addf %366, %365 : vector<2x16xf32>
    %368 = arith.divf %366, %367 : vector<2x16xf32>
    %369 = vector.extract_strided_slice %362 {offsets = [0, 16], sizes = [2, 16], strides = [1, 1]} : vector<2x32xf32> to vector<2x16xf32>
    %370 = math.tanh %369 : vector<2x16xf32>
    %371 = tpu.concatenate %368, %370 in 1 : vector<2x16xf32>, vector<2x16xf32> -> vector<2x32xf32>
    %cst_100 = arith.constant dense<0.000000e+00> : vector<32x32xf32>
    %372 = tpu.matmul %278, %371, %cst_100 {dimension_numbers = #tpu.dot_dimension_numbers<[0], [0], [1], [1], [0, 1, 1, 1], [], []>} : vector<2x32xf32>, vector<2x32xf32>, vector<32x32xf32> -> vector<32x32xf32>
    %373 = vector.extract_strided_slice %372 {offsets = [0, 0], sizes = [32, 16], strides = [1, 1]} : vector<32x32xf32> to vector<32x16xf32>
    %cst_101 = arith.constant 1.000000e+00 : f32
    %374 = vector.broadcast %cst_101 : f32 to vector<32x16xf32>
    %375 = arith.subf %374, %373 : vector<32x16xf32>
    %376 = arith.mulf %350, %375 : vector<32x16xf32>
    %377 = vector.extract_strided_slice %372 {offsets = [0, 16], sizes = [32, 16], strides = [1, 1]} : vector<32x32xf32> to vector<32x16xf32>
    %378 = arith.addf %376, %377 : vector<32x16xf32>
    %cst_102 = arith.constant dense<0.000000e+00> : vector<2x16xf32>
    %379 = tpu.matmul %328, %378, %cst_102 {dimension_numbers = #tpu.dot_dimension_numbers<[1], [0], [0], [1], [0, 0, 1, 1], [], []>} : vector<2x32xf32>, vector<32x16xf32>, vector<2x16xf32> -> vector<2x16xf32>
    %380 = arith.index_cast %c2_i32 : i32 to index
    %c0_103 = arith.constant 0 : index
    %c0_104 = arith.constant 0 : index
    %381 = vector.load %arg0[%380, %c0_103, %c0_104] : memref<8x2x16xf32, #tpu.memory_space<vmem>>, vector<1x2x16xf32>
    %382 = vector.shape_cast %381 : vector<1x2x16xf32> to vector<2x16xf32>
    %383 = tpu.concatenate %382, %379 in 1 : vector<2x16xf32>, vector<2x16xf32> -> vector<2x32xf32>
    %cst_105 = arith.constant dense<0.000000e+00> : vector<2x32xf32>
    %384 = tpu.matmul %383, %0, %cst_105 {dimension_numbers = #tpu.dot_dimension_numbers<[1], [0], [0], [1], [0, 0, 1, 1], [], []>} : vector<2x32xf32>, vector<32x32xf32>, vector<2x32xf32> -> vector<2x32xf32>
    %385 = vector.broadcast %1 : vector<1x32xf32> to vector<2x32xf32>
    %386 = arith.addf %384, %385 : vector<2x32xf32>
    %cst_106 = arith.constant 0.000000e+00 : f32
    %387 = vector.broadcast %cst_106 : f32 to vector<2x32xf32>
    %388 = arith.maximumf %386, %387 : vector<2x32xf32>
    %cst_107 = arith.constant dense<0.000000e+00> : vector<2x52xf32>
    %389 = tpu.matmul %388, %4, %cst_107 {dimension_numbers = #tpu.dot_dimension_numbers<[1], [0], [0], [1], [0, 0, 1, 1], [], []>} : vector<2x32xf32>, vector<32x52xf32>, vector<2x52xf32> -> vector<2x52xf32>
    %390 = vector.broadcast %5 : vector<1x52xf32> to vector<2x52xf32>
    %391 = arith.addf %389, %390 : vector<2x52xf32>
    %392 = vector.extract_strided_slice %391 {offsets = [0, 0], sizes = [2, 18], strides = [1, 1]} : vector<2x52xf32> to vector<2x18xf32>
    %393 = vector.extract_strided_slice %391 {offsets = [0, 18], sizes = [2, 18], strides = [1, 1]} : vector<2x52xf32> to vector<2x18xf32>
    %394 = vector.extract_strided_slice %391 {offsets = [0, 36], sizes = [2, 16], strides = [1, 1]} : vector<2x52xf32> to vector<2x16xf32>
    %395 = arith.mulf %378, %378 : vector<32x16xf32>
    %cst_108 = arith.constant dense<0.000000e+00> : vector<32xf32>
    %396 = vector.multi_reduction <add>, %395, %cst_108 [1] : vector<32x16xf32> to vector<32xf32>
    %397 = vector.shape_cast %396 : vector<32xf32> to vector<32x1xf32>
    %cst_109 = arith.constant 9.99999993E-9 : f32
    %398 = vector.broadcast %cst_109 : f32 to vector<32x1xf32>
    %399 = arith.addf %397, %398 : vector<32x1xf32>
    %400 = math.rsqrt %399 : vector<32x1xf32>
    %401 = vector.broadcast %400 : vector<32x1xf32> to vector<32x16xf32>
    %402 = arith.mulf %378, %401 : vector<32x16xf32>
    %403 = vector.extract_strided_slice %392 {offsets = [0, 0], sizes = [2, 16], strides = [1, 1]} : vector<2x18xf32> to vector<2x16xf32>
    %404 = math.tanh %403 : vector<2x16xf32>
    %405 = vector.extract_strided_slice %392 {offsets = [0, 16], sizes = [2, 1], strides = [1, 1]} : vector<2x18xf32> to vector<2x1xf32>
    %cst_110 = arith.constant 0.000000e+00 : f32
    %406 = vector.broadcast %cst_110 : f32 to vector<2x1xf32>
    %407 = arith.maximumf %405, %406 : vector<2x1xf32>
    %408 = vector.broadcast %cst_110 : f32 to vector<2x1xf32>
    %409 = arith.subf %405, %408 : vector<2x1xf32>
    %410 = arith.cmpf one, %409, %409 : vector<2x1xf32>
    %411 = vector.broadcast %cst_110 : f32 to vector<2x1xf32>
    %412 = arith.addf %405, %411 : vector<2x1xf32>
    %413 = math.absf %409 : vector<2x1xf32>
    %cst_111 = arith.constant 0.000000e+00 : f32
    %414 = vector.broadcast %cst_111 : f32 to vector<2x1xf32>
    %415 = arith.subf %414, %413 : vector<2x1xf32>
    %416 = math.exp %415 : vector<2x1xf32>
    %417 = math.log1p %416 : vector<2x1xf32>
    %418 = arith.addf %407, %417 : vector<2x1xf32>
    %419 = arith.select %410, %412, %418 : vector<2x1xi1>, vector<2x1xf32>
    %420 = vector.extract_strided_slice %392 {offsets = [0, 17], sizes = [2, 1], strides = [1, 1]} : vector<2x18xf32> to vector<2x1xf32>
    %421 = arith.negf %420 : vector<2x1xf32>
    %422 = math.exp %421 : vector<2x1xf32>
    %cst_112 = arith.constant 1.000000e+00 : f32
    %423 = vector.broadcast %cst_112 : f32 to vector<2x1xf32>
    %424 = arith.addf %423, %422 : vector<2x1xf32>
    %425 = arith.divf %423, %424 : vector<2x1xf32>
    %426 = arith.mulf %404, %404 : vector<2x16xf32>
    %cst_113 = arith.constant dense<0.000000e+00> : vector<2xf32>
    %427 = vector.multi_reduction <add>, %426, %cst_113 [1] : vector<2x16xf32> to vector<2xf32>
    %428 = vector.shape_cast %427 : vector<2xf32> to vector<2x1xf32>
    %cst_114 = arith.constant 9.99999993E-9 : f32
    %429 = vector.broadcast %cst_114 : f32 to vector<2x1xf32>
    %430 = arith.addf %428, %429 : vector<2x1xf32>
    %431 = math.rsqrt %430 : vector<2x1xf32>
    %432 = vector.broadcast %431 : vector<2x1xf32> to vector<2x16xf32>
    %433 = arith.mulf %404, %432 : vector<2x16xf32>
    %cst_115 = arith.constant dense<0.000000e+00> : vector<2x32xf32>
    %434 = tpu.matmul %433, %402, %cst_115 {dimension_numbers = #tpu.dot_dimension_numbers<[1], [1], [0], [0], [0, 0, 1, 0], [], []>} : vector<2x16xf32>, vector<32x16xf32>, vector<2x32xf32> -> vector<2x32xf32>
    %435 = vector.broadcast %419 : vector<2x1xf32> to vector<2x32xf32>
    %436 = arith.mulf %435, %434 : vector<2x32xf32>
    %cst_116 = arith.constant dense<0xFF800000> : vector<2xf32>
    %437 = vector.multi_reduction <maximumf>, %436, %cst_116 [1] : vector<2x32xf32> to vector<2xf32>
    %438 = vector.shape_cast %437 : vector<2xf32> to vector<2x1xf32>
    %439 = vector.broadcast %438 : vector<2x1xf32> to vector<2x32xf32>
    %440 = arith.subf %436, %439 : vector<2x32xf32>
    %441 = math.exp %440 : vector<2x32xf32>
    %cst_117 = arith.constant dense<0.000000e+00> : vector<2xf32>
    %442 = vector.multi_reduction <add>, %441, %cst_117 [1] : vector<2x32xf32> to vector<2xf32>
    %443 = vector.shape_cast %442 : vector<2xf32> to vector<2x1xf32>
    %444 = vector.broadcast %443 : vector<2x1xf32> to vector<2x32xf32>
    %445 = arith.divf %441, %444 : vector<2x32xf32>
    %446 = vector.broadcast %425 : vector<2x1xf32> to vector<2x32xf32>
    %447 = arith.mulf %446, %445 : vector<2x32xf32>
    %cst_118 = arith.constant 1.000000e+00 : f32
    %448 = vector.broadcast %cst_118 : f32 to vector<2x1xf32>
    %449 = arith.subf %448, %425 : vector<2x1xf32>
    %450 = vector.broadcast %449 : vector<2x1xf32> to vector<2x32xf32>
    %451 = arith.mulf %450, %278 : vector<2x32xf32>
    %452 = arith.addf %447, %451 : vector<2x32xf32>
    %453 = vector.extract_strided_slice %393 {offsets = [0, 0], sizes = [2, 16], strides = [1, 1]} : vector<2x18xf32> to vector<2x16xf32>
    %454 = math.tanh %453 : vector<2x16xf32>
    %455 = vector.extract_strided_slice %393 {offsets = [0, 16], sizes = [2, 1], strides = [1, 1]} : vector<2x18xf32> to vector<2x1xf32>
    %cst_119 = arith.constant 0.000000e+00 : f32
    %456 = vector.broadcast %cst_119 : f32 to vector<2x1xf32>
    %457 = arith.maximumf %455, %456 : vector<2x1xf32>
    %458 = vector.broadcast %cst_119 : f32 to vector<2x1xf32>
    %459 = arith.subf %455, %458 : vector<2x1xf32>
    %460 = arith.cmpf one, %459, %459 : vector<2x1xf32>
    %461 = vector.broadcast %cst_119 : f32 to vector<2x1xf32>
    %462 = arith.addf %455, %461 : vector<2x1xf32>
    %463 = math.absf %459 : vector<2x1xf32>
    %cst_120 = arith.constant 0.000000e+00 : f32
    %464 = vector.broadcast %cst_120 : f32 to vector<2x1xf32>
    %465 = arith.subf %464, %463 : vector<2x1xf32>
    %466 = math.exp %465 : vector<2x1xf32>
    %467 = math.log1p %466 : vector<2x1xf32>
    %468 = arith.addf %457, %467 : vector<2x1xf32>
    %469 = arith.select %460, %462, %468 : vector<2x1xi1>, vector<2x1xf32>
    %470 = vector.extract_strided_slice %393 {offsets = [0, 17], sizes = [2, 1], strides = [1, 1]} : vector<2x18xf32> to vector<2x1xf32>
    %471 = arith.negf %470 : vector<2x1xf32>
    %472 = math.exp %471 : vector<2x1xf32>
    %cst_121 = arith.constant 1.000000e+00 : f32
    %473 = vector.broadcast %cst_121 : f32 to vector<2x1xf32>
    %474 = arith.addf %473, %472 : vector<2x1xf32>
    %475 = arith.divf %473, %474 : vector<2x1xf32>
    %476 = arith.mulf %454, %454 : vector<2x16xf32>
    %cst_122 = arith.constant dense<0.000000e+00> : vector<2xf32>
    %477 = vector.multi_reduction <add>, %476, %cst_122 [1] : vector<2x16xf32> to vector<2xf32>
    %478 = vector.shape_cast %477 : vector<2xf32> to vector<2x1xf32>
    %cst_123 = arith.constant 9.99999993E-9 : f32
    %479 = vector.broadcast %cst_123 : f32 to vector<2x1xf32>
    %480 = arith.addf %478, %479 : vector<2x1xf32>
    %481 = math.rsqrt %480 : vector<2x1xf32>
    %482 = vector.broadcast %481 : vector<2x1xf32> to vector<2x16xf32>
    %483 = arith.mulf %454, %482 : vector<2x16xf32>
    %cst_124 = arith.constant dense<0.000000e+00> : vector<2x32xf32>
    %484 = tpu.matmul %483, %402, %cst_124 {dimension_numbers = #tpu.dot_dimension_numbers<[1], [1], [0], [0], [0, 0, 1, 0], [], []>} : vector<2x16xf32>, vector<32x16xf32>, vector<2x32xf32> -> vector<2x32xf32>
    %485 = vector.broadcast %469 : vector<2x1xf32> to vector<2x32xf32>
    %486 = arith.mulf %485, %484 : vector<2x32xf32>
    %cst_125 = arith.constant dense<0xFF800000> : vector<2xf32>
    %487 = vector.multi_reduction <maximumf>, %486, %cst_125 [1] : vector<2x32xf32> to vector<2xf32>
    %488 = vector.shape_cast %487 : vector<2xf32> to vector<2x1xf32>
    %489 = vector.broadcast %488 : vector<2x1xf32> to vector<2x32xf32>
    %490 = arith.subf %486, %489 : vector<2x32xf32>
    %491 = math.exp %490 : vector<2x32xf32>
    %cst_126 = arith.constant dense<0.000000e+00> : vector<2xf32>
    %492 = vector.multi_reduction <add>, %491, %cst_126 [1] : vector<2x32xf32> to vector<2xf32>
    %493 = vector.shape_cast %492 : vector<2xf32> to vector<2x1xf32>
    %494 = vector.broadcast %493 : vector<2x1xf32> to vector<2x32xf32>
    %495 = arith.divf %491, %494 : vector<2x32xf32>
    %496 = vector.broadcast %475 : vector<2x1xf32> to vector<2x32xf32>
    %497 = arith.mulf %496, %495 : vector<2x32xf32>
    %cst_127 = arith.constant 1.000000e+00 : f32
    %498 = vector.broadcast %cst_127 : f32 to vector<2x1xf32>
    %499 = arith.subf %498, %475 : vector<2x1xf32>
    %500 = vector.broadcast %499 : vector<2x1xf32> to vector<2x32xf32>
    %501 = arith.mulf %500, %328 : vector<2x32xf32>
    %502 = arith.addf %497, %501 : vector<2x32xf32>
    %cst_128 = arith.constant dense<0.000000e+00> : vector<16xf32>
    %503 = vector.multi_reduction <add>, %378, %cst_128 [0] : vector<32x16xf32> to vector<16xf32>
    %504 = vector.shape_cast %503 : vector<16xf32> to vector<1x16xf32>
    %cst_129 = arith.constant 3.200000e+01 : f32
    %505 = vector.broadcast %cst_129 : f32 to vector<1x16xf32>
    %506 = arith.divf %504, %505 : vector<1x16xf32>
    %507 = vector.broadcast %506 : vector<1x16xf32> to vector<32x16xf32>
    %508 = arith.subf %378, %507 : vector<32x16xf32>
    %509 = arith.mulf %508, %508 : vector<32x16xf32>
    %cst_130 = arith.constant dense<0.000000e+00> : vector<16xf32>
    %510 = vector.multi_reduction <add>, %509, %cst_130 [0] : vector<32x16xf32> to vector<16xf32>
    %511 = vector.shape_cast %510 : vector<16xf32> to vector<1x16xf32>
    %cst_131 = arith.constant 3.200000e+01 : f32
    %512 = vector.broadcast %cst_131 : f32 to vector<1x16xf32>
    %513 = arith.divf %511, %512 : vector<1x16xf32>
    %514 = vector.broadcast %506 : vector<1x16xf32> to vector<32x16xf32>
    %515 = arith.subf %378, %514 : vector<32x16xf32>
    %cst_132 = arith.constant 9.99999974E-6 : f32
    %516 = vector.broadcast %cst_132 : f32 to vector<1x16xf32>
    %517 = arith.addf %513, %516 : vector<1x16xf32>
    %518 = math.rsqrt %517 : vector<1x16xf32>
    %519 = vector.broadcast %518 : vector<1x16xf32> to vector<32x16xf32>
    %520 = arith.mulf %515, %519 : vector<32x16xf32>
    %521 = vector.broadcast %6 : vector<1x16xf32> to vector<32x16xf32>
    %522 = arith.mulf %520, %521 : vector<32x16xf32>
    %523 = vector.broadcast %7 : vector<1x16xf32> to vector<32x16xf32>
    %524 = arith.addf %522, %523 : vector<32x16xf32>
    %525 = arith.negf %394 : vector<2x16xf32>
    %526 = math.exp %525 : vector<2x16xf32>
    %cst_133 = arith.constant 1.000000e+00 : f32
    %527 = vector.broadcast %cst_133 : f32 to vector<2x16xf32>
    %528 = arith.addf %527, %526 : vector<2x16xf32>
    %529 = arith.divf %527, %528 : vector<2x16xf32>
    %530 = arith.index_cast %c2_i32 : i32 to index
    %c0_134 = arith.constant 0 : index
    %c0_135 = arith.constant 0 : index
    %531 = vector.load %arg13[%530, %c0_134, %c0_135] : memref<8x2x16xf32, #tpu.memory_space<vmem>>, vector<1x2x16xf32>
    %532 = vector.shape_cast %531 : vector<1x2x16xf32> to vector<2x16xf32>
    %533 = vector.shape_cast %529 : vector<2x16xf32> to vector<1x2x16xf32>
    tpu.vector_store %arg13[%530, %c0_134, %c0_135], %533 {strides = array<i32>} : memref<8x2x16xf32, #tpu.memory_space<vmem>>, vector<1x2x16xf32>,
    %c3_i32 = arith.constant 3 : i32
    %cst_136 = arith.constant dense<0.000000e+00> : vector<2x32xf32>
    %534 = tpu.matmul %388, %2, %cst_136 {dimension_numbers = #tpu.dot_dimension_numbers<[1], [0], [0], [1], [0, 0, 1, 1], [], []>} : vector<2x32xf32>, vector<32x32xf32>, vector<2x32xf32> -> vector<2x32xf32>
    %535 = vector.broadcast %3 : vector<1x32xf32> to vector<2x32xf32>
    %536 = arith.addf %534, %535 : vector<2x32xf32>
    %537 = vector.extract_strided_slice %536 {offsets = [0, 0], sizes = [2, 16], strides = [1, 1]} : vector<2x32xf32> to vector<2x16xf32>
    %538 = arith.negf %537 : vector<2x16xf32>
    %539 = math.exp %538 : vector<2x16xf32>
    %cst_137 = arith.constant 1.000000e+00 : f32
    %540 = vector.broadcast %cst_137 : f32 to vector<2x16xf32>
    %541 = arith.addf %540, %539 : vector<2x16xf32>
    %542 = arith.divf %540, %541 : vector<2x16xf32>
    %543 = vector.extract_strided_slice %536 {offsets = [0, 16], sizes = [2, 16], strides = [1, 1]} : vector<2x32xf32> to vector<2x16xf32>
    %544 = math.tanh %543 : vector<2x16xf32>
    %545 = tpu.concatenate %542, %544 in 1 : vector<2x16xf32>, vector<2x16xf32> -> vector<2x32xf32>
    %cst_138 = arith.constant dense<0.000000e+00> : vector<32x32xf32>
    %546 = tpu.matmul %452, %545, %cst_138 {dimension_numbers = #tpu.dot_dimension_numbers<[0], [0], [1], [1], [0, 1, 1, 1], [], []>} : vector<2x32xf32>, vector<2x32xf32>, vector<32x32xf32> -> vector<32x32xf32>
    %547 = vector.extract_strided_slice %546 {offsets = [0, 0], sizes = [32, 16], strides = [1, 1]} : vector<32x32xf32> to vector<32x16xf32>
    %cst_139 = arith.constant 1.000000e+00 : f32
    %548 = vector.broadcast %cst_139 : f32 to vector<32x16xf32>
    %549 = arith.subf %548, %547 : vector<32x16xf32>
    %550 = arith.mulf %524, %549 : vector<32x16xf32>
    %551 = vector.extract_strided_slice %546 {offsets = [0, 16], sizes = [32, 16], strides = [1, 1]} : vector<32x32xf32> to vector<32x16xf32>
    %552 = arith.addf %550, %551 : vector<32x16xf32>
    %cst_140 = arith.constant dense<0.000000e+00> : vector<2x16xf32>
    %553 = tpu.matmul %502, %552, %cst_140 {dimension_numbers = #tpu.dot_dimension_numbers<[1], [0], [0], [1], [0, 0, 1, 1], [], []>} : vector<2x32xf32>, vector<32x16xf32>, vector<2x16xf32> -> vector<2x16xf32>
    %554 = arith.index_cast %c3_i32 : i32 to index
    %c0_141 = arith.constant 0 : index
    %c0_142 = arith.constant 0 : index
    %555 = vector.load %arg0[%554, %c0_141, %c0_142] : memref<8x2x16xf32, #tpu.memory_space<vmem>>, vector<1x2x16xf32>
    %556 = vector.shape_cast %555 : vector<1x2x16xf32> to vector<2x16xf32>
    %557 = tpu.concatenate %556, %553 in 1 : vector<2x16xf32>, vector<2x16xf32> -> vector<2x32xf32>
    %cst_143 = arith.constant dense<0.000000e+00> : vector<2x32xf32>
    %558 = tpu.matmul %557, %0, %cst_143 {dimension_numbers = #tpu.dot_dimension_numbers<[1], [0], [0], [1], [0, 0, 1, 1], [], []>} : vector<2x32xf32>, vector<32x32xf32>, vector<2x32xf32> -> vector<2x32xf32>
    %559 = vector.broadcast %1 : vector<1x32xf32> to vector<2x32xf32>
    %560 = arith.addf %558, %559 : vector<2x32xf32>
    %cst_144 = arith.constant 0.000000e+00 : f32
    %561 = vector.broadcast %cst_144 : f32 to vector<2x32xf32>
    %562 = arith.maximumf %560, %561 : vector<2x32xf32>
    %cst_145 = arith.constant dense<0.000000e+00> : vector<2x52xf32>
    %563 = tpu.matmul %562, %4, %cst_145 {dimension_numbers = #tpu.dot_dimension_numbers<[1], [0], [0], [1], [0, 0, 1, 1], [], []>} : vector<2x32xf32>, vector<32x52xf32>, vector<2x52xf32> -> vector<2x52xf32>
    %564 = vector.broadcast %5 : vector<1x52xf32> to vector<2x52xf32>
    %565 = arith.addf %563, %564 : vector<2x52xf32>
    %566 = vector.extract_strided_slice %565 {offsets = [0, 0], sizes = [2, 18], strides = [1, 1]} : vector<2x52xf32> to vector<2x18xf32>
    %567 = vector.extract_strided_slice %565 {offsets = [0, 18], sizes = [2, 18], strides = [1, 1]} : vector<2x52xf32> to vector<2x18xf32>
    %568 = vector.extract_strided_slice %565 {offsets = [0, 36], sizes = [2, 16], strides = [1, 1]} : vector<2x52xf32> to vector<2x16xf32>
    %569 = arith.mulf %552, %552 : vector<32x16xf32>
    %cst_146 = arith.constant dense<0.000000e+00> : vector<32xf32>
    %570 = vector.multi_reduction <add>, %569, %cst_146 [1] : vector<32x16xf32> to vector<32xf32>
    %571 = vector.shape_cast %570 : vector<32xf32> to vector<32x1xf32>
    %cst_147 = arith.constant 9.99999993E-9 : f32
    %572 = vector.broadcast %cst_147 : f32 to vector<32x1xf32>
    %573 = arith.addf %571, %572 : vector<32x1xf32>
    %574 = math.rsqrt %573 : vector<32x1xf32>
    %575 = vector.broadcast %574 : vector<32x1xf32> to vector<32x16xf32>
    %576 = arith.mulf %552, %575 : vector<32x16xf32>
    %577 = vector.extract_strided_slice %566 {offsets = [0, 0], sizes = [2, 16], strides = [1, 1]} : vector<2x18xf32> to vector<2x16xf32>
    %578 = math.tanh %577 : vector<2x16xf32>
    %579 = vector.extract_strided_slice %566 {offsets = [0, 16], sizes = [2, 1], strides = [1, 1]} : vector<2x18xf32> to vector<2x1xf32>
    %cst_148 = arith.constant 0.000000e+00 : f32
    %580 = vector.broadcast %cst_148 : f32 to vector<2x1xf32>
    %581 = arith.maximumf %579, %580 : vector<2x1xf32>
    %582 = vector.broadcast %cst_148 : f32 to vector<2x1xf32>
    %583 = arith.subf %579, %582 : vector<2x1xf32>
    %584 = arith.cmpf one, %583, %583 : vector<2x1xf32>
    %585 = vector.broadcast %cst_148 : f32 to vector<2x1xf32>
    %586 = arith.addf %579, %585 : vector<2x1xf32>
    %587 = math.absf %583 : vector<2x1xf32>
    %cst_149 = arith.constant 0.000000e+00 : f32
    %588 = vector.broadcast %cst_149 : f32 to vector<2x1xf32>
    %589 = arith.subf %588, %587 : vector<2x1xf32>
    %590 = math.exp %589 : vector<2x1xf32>
    %591 = math.log1p %590 : vector<2x1xf32>
    %592 = arith.addf %581, %591 : vector<2x1xf32>
    %593 = arith.select %584, %586, %592 : vector<2x1xi1>, vector<2x1xf32>
    %594 = vector.extract_strided_slice %566 {offsets = [0, 17], sizes = [2, 1], strides = [1, 1]} : vector<2x18xf32> to vector<2x1xf32>
    %595 = arith.negf %594 : vector<2x1xf32>
    %596 = math.exp %595 : vector<2x1xf32>
    %cst_150 = arith.constant 1.000000e+00 : f32
    %597 = vector.broadcast %cst_150 : f32 to vector<2x1xf32>
    %598 = arith.addf %597, %596 : vector<2x1xf32>
    %599 = arith.divf %597, %598 : vector<2x1xf32>
    %600 = arith.mulf %578, %578 : vector<2x16xf32>
    %cst_151 = arith.constant dense<0.000000e+00> : vector<2xf32>
    %601 = vector.multi_reduction <add>, %600, %cst_151 [1] : vector<2x16xf32> to vector<2xf32>
    %602 = vector.shape_cast %601 : vector<2xf32> to vector<2x1xf32>
    %cst_152 = arith.constant 9.99999993E-9 : f32
    %603 = vector.broadcast %cst_152 : f32 to vector<2x1xf32>
    %604 = arith.addf %602, %603 : vector<2x1xf32>
    %605 = math.rsqrt %604 : vector<2x1xf32>
    %606 = vector.broadcast %605 : vector<2x1xf32> to vector<2x16xf32>
    %607 = arith.mulf %578, %606 : vector<2x16xf32>
    %cst_153 = arith.constant dense<0.000000e+00> : vector<2x32xf32>
    %608 = tpu.matmul %607, %576, %cst_153 {dimension_numbers = #tpu.dot_dimension_numbers<[1], [1], [0], [0], [0, 0, 1, 0], [], []>} : vector<2x16xf32>, vector<32x16xf32>, vector<2x32xf32> -> vector<2x32xf32>
    %609 = vector.broadcast %593 : vector<2x1xf32> to vector<2x32xf32>
    %610 = arith.mulf %609, %608 : vector<2x32xf32>
    %cst_154 = arith.constant dense<0xFF800000> : vector<2xf32>
    %611 = vector.multi_reduction <maximumf>, %610, %cst_154 [1] : vector<2x32xf32> to vector<2xf32>
    %612 = vector.shape_cast %611 : vector<2xf32> to vector<2x1xf32>
    %613 = vector.broadcast %612 : vector<2x1xf32> to vector<2x32xf32>
    %614 = arith.subf %610, %613 : vector<2x32xf32>
    %615 = math.exp %614 : vector<2x32xf32>
    %cst_155 = arith.constant dense<0.000000e+00> : vector<2xf32>
    %616 = vector.multi_reduction <add>, %615, %cst_155 [1] : vector<2x32xf32> to vector<2xf32>
    %617 = vector.shape_cast %616 : vector<2xf32> to vector<2x1xf32>
    %618 = vector.broadcast %617 : vector<2x1xf32> to vector<2x32xf32>
    %619 = arith.divf %615, %618 : vector<2x32xf32>
    %620 = vector.broadcast %599 : vector<2x1xf32> to vector<2x32xf32>
    %621 = arith.mulf %620, %619 : vector<2x32xf32>
    %cst_156 = arith.constant 1.000000e+00 : f32
    %622 = vector.broadcast %cst_156 : f32 to vector<2x1xf32>
    %623 = arith.subf %622, %599 : vector<2x1xf32>
    %624 = vector.broadcast %623 : vector<2x1xf32> to vector<2x32xf32>
    %625 = arith.mulf %624, %452 : vector<2x32xf32>
    %626 = arith.addf %621, %625 : vector<2x32xf32>
    %627 = vector.extract_strided_slice %567 {offsets = [0, 0], sizes = [2, 16], strides = [1, 1]} : vector<2x18xf32> to vector<2x16xf32>
    %628 = math.tanh %627 : vector<2x16xf32>
    %629 = vector.extract_strided_slice %567 {offsets = [0, 16], sizes = [2, 1], strides = [1, 1]} : vector<2x18xf32> to vector<2x1xf32>
    %cst_157 = arith.constant 0.000000e+00 : f32
    %630 = vector.broadcast %cst_157 : f32 to vector<2x1xf32>
    %631 = arith.maximumf %629, %630 : vector<2x1xf32>
    %632 = vector.broadcast %cst_157 : f32 to vector<2x1xf32>
    %633 = arith.subf %629, %632 : vector<2x1xf32>
    %634 = arith.cmpf one, %633, %633 : vector<2x1xf32>
    %635 = vector.broadcast %cst_157 : f32 to vector<2x1xf32>
    %636 = arith.addf %629, %635 : vector<2x1xf32>
    %637 = math.absf %633 : vector<2x1xf32>
    %cst_158 = arith.constant 0.000000e+00 : f32
    %638 = vector.broadcast %cst_158 : f32 to vector<2x1xf32>
    %639 = arith.subf %638, %637 : vector<2x1xf32>
    %640 = math.exp %639 : vector<2x1xf32>
    %641 = math.log1p %640 : vector<2x1xf32>
    %642 = arith.addf %631, %641 : vector<2x1xf32>
    %643 = arith.select %634, %636, %642 : vector<2x1xi1>, vector<2x1xf32>
    %644 = vector.extract_strided_slice %567 {offsets = [0, 17], sizes = [2, 1], strides = [1, 1]} : vector<2x18xf32> to vector<2x1xf32>
    %645 = arith.negf %644 : vector<2x1xf32>
    %646 = math.exp %645 : vector<2x1xf32>
    %cst_159 = arith.constant 1.000000e+00 : f32
    %647 = vector.broadcast %cst_159 : f32 to vector<2x1xf32>
    %648 = arith.addf %647, %646 : vector<2x1xf32>
    %649 = arith.divf %647, %648 : vector<2x1xf32>
    %650 = arith.mulf %628, %628 : vector<2x16xf32>
    %cst_160 = arith.constant dense<0.000000e+00> : vector<2xf32>
    %651 = vector.multi_reduction <add>, %650, %cst_160 [1] : vector<2x16xf32> to vector<2xf32>
    %652 = vector.shape_cast %651 : vector<2xf32> to vector<2x1xf32>
    %cst_161 = arith.constant 9.99999993E-9 : f32
    %653 = vector.broadcast %cst_161 : f32 to vector<2x1xf32>
    %654 = arith.addf %652, %653 : vector<2x1xf32>
    %655 = math.rsqrt %654 : vector<2x1xf32>
    %656 = vector.broadcast %655 : vector<2x1xf32> to vector<2x16xf32>
    %657 = arith.mulf %628, %656 : vector<2x16xf32>
    %cst_162 = arith.constant dense<0.000000e+00> : vector<2x32xf32>
    %658 = tpu.matmul %657, %576, %cst_162 {dimension_numbers = #tpu.dot_dimension_numbers<[1], [1], [0], [0], [0, 0, 1, 0], [], []>} : vector<2x16xf32>, vector<32x16xf32>, vector<2x32xf32> -> vector<2x32xf32>
    %659 = vector.broadcast %643 : vector<2x1xf32> to vector<2x32xf32>
    %660 = arith.mulf %659, %658 : vector<2x32xf32>
    %cst_163 = arith.constant dense<0xFF800000> : vector<2xf32>
    %661 = vector.multi_reduction <maximumf>, %660, %cst_163 [1] : vector<2x32xf32> to vector<2xf32>
    %662 = vector.shape_cast %661 : vector<2xf32> to vector<2x1xf32>
    %663 = vector.broadcast %662 : vector<2x1xf32> to vector<2x32xf32>
    %664 = arith.subf %660, %663 : vector<2x32xf32>
    %665 = math.exp %664 : vector<2x32xf32>
    %cst_164 = arith.constant dense<0.000000e+00> : vector<2xf32>
    %666 = vector.multi_reduction <add>, %665, %cst_164 [1] : vector<2x32xf32> to vector<2xf32>
    %667 = vector.shape_cast %666 : vector<2xf32> to vector<2x1xf32>
    %668 = vector.broadcast %667 : vector<2x1xf32> to vector<2x32xf32>
    %669 = arith.divf %665, %668 : vector<2x32xf32>
    %670 = vector.broadcast %649 : vector<2x1xf32> to vector<2x32xf32>
    %671 = arith.mulf %670, %669 : vector<2x32xf32>
    %cst_165 = arith.constant 1.000000e+00 : f32
    %672 = vector.broadcast %cst_165 : f32 to vector<2x1xf32>
    %673 = arith.subf %672, %649 : vector<2x1xf32>
    %674 = vector.broadcast %673 : vector<2x1xf32> to vector<2x32xf32>
    %675 = arith.mulf %674, %502 : vector<2x32xf32>
    %676 = arith.addf %671, %675 : vector<2x32xf32>
    %cst_166 = arith.constant dense<0.000000e+00> : vector<16xf32>
    %677 = vector.multi_reduction <add>, %552, %cst_166 [0] : vector<32x16xf32> to vector<16xf32>
    %678 = vector.shape_cast %677 : vector<16xf32> to vector<1x16xf32>
    %cst_167 = arith.constant 3.200000e+01 : f32
    %679 = vector.broadcast %cst_167 : f32 to vector<1x16xf32>
    %680 = arith.divf %678, %679 : vector<1x16xf32>
    %681 = vector.broadcast %680 : vector<1x16xf32> to vector<32x16xf32>
    %682 = arith.subf %552, %681 : vector<32x16xf32>
    %683 = arith.mulf %682, %682 : vector<32x16xf32>
    %cst_168 = arith.constant dense<0.000000e+00> : vector<16xf32>
    %684 = vector.multi_reduction <add>, %683, %cst_168 [0] : vector<32x16xf32> to vector<16xf32>
    %685 = vector.shape_cast %684 : vector<16xf32> to vector<1x16xf32>
    %cst_169 = arith.constant 3.200000e+01 : f32
    %686 = vector.broadcast %cst_169 : f32 to vector<1x16xf32>
    %687 = arith.divf %685, %686 : vector<1x16xf32>
    %688 = vector.broadcast %680 : vector<1x16xf32> to vector<32x16xf32>
    %689 = arith.subf %552, %688 : vector<32x16xf32>
    %cst_170 = arith.constant 9.99999974E-6 : f32
    %690 = vector.broadcast %cst_170 : f32 to vector<1x16xf32>
    %691 = arith.addf %687, %690 : vector<1x16xf32>
    %692 = math.rsqrt %691 : vector<1x16xf32>
    %693 = vector.broadcast %692 : vector<1x16xf32> to vector<32x16xf32>
    %694 = arith.mulf %689, %693 : vector<32x16xf32>
    %695 = vector.broadcast %6 : vector<1x16xf32> to vector<32x16xf32>
    %696 = arith.mulf %694, %695 : vector<32x16xf32>
    %697 = vector.broadcast %7 : vector<1x16xf32> to vector<32x16xf32>
    %698 = arith.addf %696, %697 : vector<32x16xf32>
    %699 = arith.negf %568 : vector<2x16xf32>
    %700 = math.exp %699 : vector<2x16xf32>
    %cst_171 = arith.constant 1.000000e+00 : f32
    %701 = vector.broadcast %cst_171 : f32 to vector<2x16xf32>
    %702 = arith.addf %701, %700 : vector<2x16xf32>
    %703 = arith.divf %701, %702 : vector<2x16xf32>
    %704 = arith.index_cast %c3_i32 : i32 to index
    %c0_172 = arith.constant 0 : index
    %c0_173 = arith.constant 0 : index
    %705 = vector.load %arg13[%704, %c0_172, %c0_173] : memref<8x2x16xf32, #tpu.memory_space<vmem>>, vector<1x2x16xf32>
    %706 = vector.shape_cast %705 : vector<1x2x16xf32> to vector<2x16xf32>
    %707 = vector.shape_cast %703 : vector<2x16xf32> to vector<1x2x16xf32>
    tpu.vector_store %arg13[%704, %c0_172, %c0_173], %707 {strides = array<i32>} : memref<8x2x16xf32, #tpu.memory_space<vmem>>, vector<1x2x16xf32>,
    %c4_i32 = arith.constant 4 : i32
    %cst_174 = arith.constant dense<0.000000e+00> : vector<2x32xf32>
    %708 = tpu.matmul %562, %2, %cst_174 {dimension_numbers = #tpu.dot_dimension_numbers<[1], [0], [0], [1], [0, 0, 1, 1], [], []>} : vector<2x32xf32>, vector<32x32xf32>, vector<2x32xf32> -> vector<2x32xf32>
    %709 = vector.broadcast %3 : vector<1x32xf32> to vector<2x32xf32>
    %710 = arith.addf %708, %709 : vector<2x32xf32>
    %711 = vector.extract_strided_slice %710 {offsets = [0, 0], sizes = [2, 16], strides = [1, 1]} : vector<2x32xf32> to vector<2x16xf32>
    %712 = arith.negf %711 : vector<2x16xf32>
    %713 = math.exp %712 : vector<2x16xf32>
    %cst_175 = arith.constant 1.000000e+00 : f32
    %714 = vector.broadcast %cst_175 : f32 to vector<2x16xf32>
    %715 = arith.addf %714, %713 : vector<2x16xf32>
    %716 = arith.divf %714, %715 : vector<2x16xf32>
    %717 = vector.extract_strided_slice %710 {offsets = [0, 16], sizes = [2, 16], strides = [1, 1]} : vector<2x32xf32> to vector<2x16xf32>
    %718 = math.tanh %717 : vector<2x16xf32>
    %719 = tpu.concatenate %716, %718 in 1 : vector<2x16xf32>, vector<2x16xf32> -> vector<2x32xf32>
    %cst_176 = arith.constant dense<0.000000e+00> : vector<32x32xf32>
    %720 = tpu.matmul %626, %719, %cst_176 {dimension_numbers = #tpu.dot_dimension_numbers<[0], [0], [1], [1], [0, 1, 1, 1], [], []>} : vector<2x32xf32>, vector<2x32xf32>, vector<32x32xf32> -> vector<32x32xf32>
    %721 = vector.extract_strided_slice %720 {offsets = [0, 0], sizes = [32, 16], strides = [1, 1]} : vector<32x32xf32> to vector<32x16xf32>
    %cst_177 = arith.constant 1.000000e+00 : f32
    %722 = vector.broadcast %cst_177 : f32 to vector<32x16xf32>
    %723 = arith.subf %722, %721 : vector<32x16xf32>
    %724 = arith.mulf %698, %723 : vector<32x16xf32>
    %725 = vector.extract_strided_slice %720 {offsets = [0, 16], sizes = [32, 16], strides = [1, 1]} : vector<32x32xf32> to vector<32x16xf32>
    %726 = arith.addf %724, %725 : vector<32x16xf32>
    %cst_178 = arith.constant dense<0.000000e+00> : vector<2x16xf32>
    %727 = tpu.matmul %676, %726, %cst_178 {dimension_numbers = #tpu.dot_dimension_numbers<[1], [0], [0], [1], [0, 0, 1, 1], [], []>} : vector<2x32xf32>, vector<32x16xf32>, vector<2x16xf32> -> vector<2x16xf32>
    %728 = arith.index_cast %c4_i32 : i32 to index
    %c0_179 = arith.constant 0 : index
    %c0_180 = arith.constant 0 : index
    %729 = vector.load %arg0[%728, %c0_179, %c0_180] : memref<8x2x16xf32, #tpu.memory_space<vmem>>, vector<1x2x16xf32>
    %730 = vector.shape_cast %729 : vector<1x2x16xf32> to vector<2x16xf32>
    %731 = tpu.concatenate %730, %727 in 1 : vector<2x16xf32>, vector<2x16xf32> -> vector<2x32xf32>
    %cst_181 = arith.constant dense<0.000000e+00> : vector<2x32xf32>
    %732 = tpu.matmul %731, %0, %cst_181 {dimension_numbers = #tpu.dot_dimension_numbers<[1], [0], [0], [1], [0, 0, 1, 1], [], []>} : vector<2x32xf32>, vector<32x32xf32>, vector<2x32xf32> -> vector<2x32xf32>
    %733 = vector.broadcast %1 : vector<1x32xf32> to vector<2x32xf32>
    %734 = arith.addf %732, %733 : vector<2x32xf32>
    %cst_182 = arith.constant 0.000000e+00 : f32
    %735 = vector.broadcast %cst_182 : f32 to vector<2x32xf32>
    %736 = arith.maximumf %734, %735 : vector<2x32xf32>
    %cst_183 = arith.constant dense<0.000000e+00> : vector<2x52xf32>
    %737 = tpu.matmul %736, %4, %cst_183 {dimension_numbers = #tpu.dot_dimension_numbers<[1], [0], [0], [1], [0, 0, 1, 1], [], []>} : vector<2x32xf32>, vector<32x52xf32>, vector<2x52xf32> -> vector<2x52xf32>
    %738 = vector.broadcast %5 : vector<1x52xf32> to vector<2x52xf32>
    %739 = arith.addf %737, %738 : vector<2x52xf32>
    %740 = vector.extract_strided_slice %739 {offsets = [0, 0], sizes = [2, 18], strides = [1, 1]} : vector<2x52xf32> to vector<2x18xf32>
    %741 = vector.extract_strided_slice %739 {offsets = [0, 18], sizes = [2, 18], strides = [1, 1]} : vector<2x52xf32> to vector<2x18xf32>
    %742 = vector.extract_strided_slice %739 {offsets = [0, 36], sizes = [2, 16], strides = [1, 1]} : vector<2x52xf32> to vector<2x16xf32>
    %743 = arith.mulf %726, %726 : vector<32x16xf32>
    %cst_184 = arith.constant dense<0.000000e+00> : vector<32xf32>
    %744 = vector.multi_reduction <add>, %743, %cst_184 [1] : vector<32x16xf32> to vector<32xf32>
    %745 = vector.shape_cast %744 : vector<32xf32> to vector<32x1xf32>
    %cst_185 = arith.constant 9.99999993E-9 : f32
    %746 = vector.broadcast %cst_185 : f32 to vector<32x1xf32>
    %747 = arith.addf %745, %746 : vector<32x1xf32>
    %748 = math.rsqrt %747 : vector<32x1xf32>
    %749 = vector.broadcast %748 : vector<32x1xf32> to vector<32x16xf32>
    %750 = arith.mulf %726, %749 : vector<32x16xf32>
    %751 = vector.extract_strided_slice %740 {offsets = [0, 0], sizes = [2, 16], strides = [1, 1]} : vector<2x18xf32> to vector<2x16xf32>
    %752 = math.tanh %751 : vector<2x16xf32>
    %753 = vector.extract_strided_slice %740 {offsets = [0, 16], sizes = [2, 1], strides = [1, 1]} : vector<2x18xf32> to vector<2x1xf32>
    %cst_186 = arith.constant 0.000000e+00 : f32
    %754 = vector.broadcast %cst_186 : f32 to vector<2x1xf32>
    %755 = arith.maximumf %753, %754 : vector<2x1xf32>
    %756 = vector.broadcast %cst_186 : f32 to vector<2x1xf32>
    %757 = arith.subf %753, %756 : vector<2x1xf32>
    %758 = arith.cmpf one, %757, %757 : vector<2x1xf32>
    %759 = vector.broadcast %cst_186 : f32 to vector<2x1xf32>
    %760 = arith.addf %753, %759 : vector<2x1xf32>
    %761 = math.absf %757 : vector<2x1xf32>
    %cst_187 = arith.constant 0.000000e+00 : f32
    %762 = vector.broadcast %cst_187 : f32 to vector<2x1xf32>
    %763 = arith.subf %762, %761 : vector<2x1xf32>
    %764 = math.exp %763 : vector<2x1xf32>
    %765 = math.log1p %764 : vector<2x1xf32>
    %766 = arith.addf %755, %765 : vector<2x1xf32>
    %767 = arith.select %758, %760, %766 : vector<2x1xi1>, vector<2x1xf32>
    %768 = vector.extract_strided_slice %740 {offsets = [0, 17], sizes = [2, 1], strides = [1, 1]} : vector<2x18xf32> to vector<2x1xf32>
    %769 = arith.negf %768 : vector<2x1xf32>
    %770 = math.exp %769 : vector<2x1xf32>
    %cst_188 = arith.constant 1.000000e+00 : f32
    %771 = vector.broadcast %cst_188 : f32 to vector<2x1xf32>
    %772 = arith.addf %771, %770 : vector<2x1xf32>
    %773 = arith.divf %771, %772 : vector<2x1xf32>
    %774 = arith.mulf %752, %752 : vector<2x16xf32>
    %cst_189 = arith.constant dense<0.000000e+00> : vector<2xf32>
    %775 = vector.multi_reduction <add>, %774, %cst_189 [1] : vector<2x16xf32> to vector<2xf32>
    %776 = vector.shape_cast %775 : vector<2xf32> to vector<2x1xf32>
    %cst_190 = arith.constant 9.99999993E-9 : f32
    %777 = vector.broadcast %cst_190 : f32 to vector<2x1xf32>
    %778 = arith.addf %776, %777 : vector<2x1xf32>
    %779 = math.rsqrt %778 : vector<2x1xf32>
    %780 = vector.broadcast %779 : vector<2x1xf32> to vector<2x16xf32>
    %781 = arith.mulf %752, %780 : vector<2x16xf32>
    %cst_191 = arith.constant dense<0.000000e+00> : vector<2x32xf32>
    %782 = tpu.matmul %781, %750, %cst_191 {dimension_numbers = #tpu.dot_dimension_numbers<[1], [1], [0], [0], [0, 0, 1, 0], [], []>} : vector<2x16xf32>, vector<32x16xf32>, vector<2x32xf32> -> vector<2x32xf32>
    %783 = vector.broadcast %767 : vector<2x1xf32> to vector<2x32xf32>
    %784 = arith.mulf %783, %782 : vector<2x32xf32>
    %cst_192 = arith.constant dense<0xFF800000> : vector<2xf32>
    %785 = vector.multi_reduction <maximumf>, %784, %cst_192 [1] : vector<2x32xf32> to vector<2xf32>
    %786 = vector.shape_cast %785 : vector<2xf32> to vector<2x1xf32>
    %787 = vector.broadcast %786 : vector<2x1xf32> to vector<2x32xf32>
    %788 = arith.subf %784, %787 : vector<2x32xf32>
    %789 = math.exp %788 : vector<2x32xf32>
    %cst_193 = arith.constant dense<0.000000e+00> : vector<2xf32>
    %790 = vector.multi_reduction <add>, %789, %cst_193 [1] : vector<2x32xf32> to vector<2xf32>
    %791 = vector.shape_cast %790 : vector<2xf32> to vector<2x1xf32>
    %792 = vector.broadcast %791 : vector<2x1xf32> to vector<2x32xf32>
    %793 = arith.divf %789, %792 : vector<2x32xf32>
    %794 = vector.broadcast %773 : vector<2x1xf32> to vector<2x32xf32>
    %795 = arith.mulf %794, %793 : vector<2x32xf32>
    %cst_194 = arith.constant 1.000000e+00 : f32
    %796 = vector.broadcast %cst_194 : f32 to vector<2x1xf32>
    %797 = arith.subf %796, %773 : vector<2x1xf32>
    %798 = vector.broadcast %797 : vector<2x1xf32> to vector<2x32xf32>
    %799 = arith.mulf %798, %626 : vector<2x32xf32>
    %800 = arith.addf %795, %799 : vector<2x32xf32>
    %801 = vector.extract_strided_slice %741 {offsets = [0, 0], sizes = [2, 16], strides = [1, 1]} : vector<2x18xf32> to vector<2x16xf32>
    %802 = math.tanh %801 : vector<2x16xf32>
    %803 = vector.extract_strided_slice %741 {offsets = [0, 16], sizes = [2, 1], strides = [1, 1]} : vector<2x18xf32> to vector<2x1xf32>
    %cst_195 = arith.constant 0.000000e+00 : f32
    %804 = vector.broadcast %cst_195 : f32 to vector<2x1xf32>
    %805 = arith.maximumf %803, %804 : vector<2x1xf32>
    %806 = vector.broadcast %cst_195 : f32 to vector<2x1xf32>
    %807 = arith.subf %803, %806 : vector<2x1xf32>
    %808 = arith.cmpf one, %807, %807 : vector<2x1xf32>
    %809 = vector.broadcast %cst_195 : f32 to vector<2x1xf32>
    %810 = arith.addf %803, %809 : vector<2x1xf32>
    %811 = math.absf %807 : vector<2x1xf32>
    %cst_196 = arith.constant 0.000000e+00 : f32
    %812 = vector.broadcast %cst_196 : f32 to vector<2x1xf32>
    %813 = arith.subf %812, %811 : vector<2x1xf32>
    %814 = math.exp %813 : vector<2x1xf32>
    %815 = math.log1p %814 : vector<2x1xf32>
    %816 = arith.addf %805, %815 : vector<2x1xf32>
    %817 = arith.select %808, %810, %816 : vector<2x1xi1>, vector<2x1xf32>
    %818 = vector.extract_strided_slice %741 {offsets = [0, 17], sizes = [2, 1], strides = [1, 1]} : vector<2x18xf32> to vector<2x1xf32>
    %819 = arith.negf %818 : vector<2x1xf32>
    %820 = math.exp %819 : vector<2x1xf32>
    %cst_197 = arith.constant 1.000000e+00 : f32
    %821 = vector.broadcast %cst_197 : f32 to vector<2x1xf32>
    %822 = arith.addf %821, %820 : vector<2x1xf32>
    %823 = arith.divf %821, %822 : vector<2x1xf32>
    %824 = arith.mulf %802, %802 : vector<2x16xf32>
    %cst_198 = arith.constant dense<0.000000e+00> : vector<2xf32>
    %825 = vector.multi_reduction <add>, %824, %cst_198 [1] : vector<2x16xf32> to vector<2xf32>
    %826 = vector.shape_cast %825 : vector<2xf32> to vector<2x1xf32>
    %cst_199 = arith.constant 9.99999993E-9 : f32
    %827 = vector.broadcast %cst_199 : f32 to vector<2x1xf32>
    %828 = arith.addf %826, %827 : vector<2x1xf32>
    %829 = math.rsqrt %828 : vector<2x1xf32>
    %830 = vector.broadcast %829 : vector<2x1xf32> to vector<2x16xf32>
    %831 = arith.mulf %802, %830 : vector<2x16xf32>
    %cst_200 = arith.constant dense<0.000000e+00> : vector<2x32xf32>
    %832 = tpu.matmul %831, %750, %cst_200 {dimension_numbers = #tpu.dot_dimension_numbers<[1], [1], [0], [0], [0, 0, 1, 0], [], []>} : vector<2x16xf32>, vector<32x16xf32>, vector<2x32xf32> -> vector<2x32xf32>
    %833 = vector.broadcast %817 : vector<2x1xf32> to vector<2x32xf32>
    %834 = arith.mulf %833, %832 : vector<2x32xf32>
    %cst_201 = arith.constant dense<0xFF800000> : vector<2xf32>
    %835 = vector.multi_reduction <maximumf>, %834, %cst_201 [1] : vector<2x32xf32> to vector<2xf32>
    %836 = vector.shape_cast %835 : vector<2xf32> to vector<2x1xf32>
    %837 = vector.broadcast %836 : vector<2x1xf32> to vector<2x32xf32>
    %838 = arith.subf %834, %837 : vector<2x32xf32>
    %839 = math.exp %838 : vector<2x32xf32>
    %cst_202 = arith.constant dense<0.000000e+00> : vector<2xf32>
    %840 = vector.multi_reduction <add>, %839, %cst_202 [1] : vector<2x32xf32> to vector<2xf32>
    %841 = vector.shape_cast %840 : vector<2xf32> to vector<2x1xf32>
    %842 = vector.broadcast %841 : vector<2x1xf32> to vector<2x32xf32>
    %843 = arith.divf %839, %842 : vector<2x32xf32>
    %844 = vector.broadcast %823 : vector<2x1xf32> to vector<2x32xf32>
    %845 = arith.mulf %844, %843 : vector<2x32xf32>
    %cst_203 = arith.constant 1.000000e+00 : f32
    %846 = vector.broadcast %cst_203 : f32 to vector<2x1xf32>
    %847 = arith.subf %846, %823 : vector<2x1xf32>
    %848 = vector.broadcast %847 : vector<2x1xf32> to vector<2x32xf32>
    %849 = arith.mulf %848, %676 : vector<2x32xf32>
    %850 = arith.addf %845, %849 : vector<2x32xf32>
    %cst_204 = arith.constant dense<0.000000e+00> : vector<16xf32>
    %851 = vector.multi_reduction <add>, %726, %cst_204 [0] : vector<32x16xf32> to vector<16xf32>
    %852 = vector.shape_cast %851 : vector<16xf32> to vector<1x16xf32>
    %cst_205 = arith.constant 3.200000e+01 : f32
    %853 = vector.broadcast %cst_205 : f32 to vector<1x16xf32>
    %854 = arith.divf %852, %853 : vector<1x16xf32>
    %855 = vector.broadcast %854 : vector<1x16xf32> to vector<32x16xf32>
    %856 = arith.subf %726, %855 : vector<32x16xf32>
    %857 = arith.mulf %856, %856 : vector<32x16xf32>
    %cst_206 = arith.constant dense<0.000000e+00> : vector<16xf32>
    %858 = vector.multi_reduction <add>, %857, %cst_206 [0] : vector<32x16xf32> to vector<16xf32>
    %859 = vector.shape_cast %858 : vector<16xf32> to vector<1x16xf32>
    %cst_207 = arith.constant 3.200000e+01 : f32
    %860 = vector.broadcast %cst_207 : f32 to vector<1x16xf32>
    %861 = arith.divf %859, %860 : vector<1x16xf32>
    %862 = vector.broadcast %854 : vector<1x16xf32> to vector<32x16xf32>
    %863 = arith.subf %726, %862 : vector<32x16xf32>
    %cst_208 = arith.constant 9.99999974E-6 : f32
    %864 = vector.broadcast %cst_208 : f32 to vector<1x16xf32>
    %865 = arith.addf %861, %864 : vector<1x16xf32>
    %866 = math.rsqrt %865 : vector<1x16xf32>
    %867 = vector.broadcast %866 : vector<1x16xf32> to vector<32x16xf32>
    %868 = arith.mulf %863, %867 : vector<32x16xf32>
    %869 = vector.broadcast %6 : vector<1x16xf32> to vector<32x16xf32>
    %870 = arith.mulf %868, %869 : vector<32x16xf32>
    %871 = vector.broadcast %7 : vector<1x16xf32> to vector<32x16xf32>
    %872 = arith.addf %870, %871 : vector<32x16xf32>
    %873 = arith.negf %742 : vector<2x16xf32>
    %874 = math.exp %873 : vector<2x16xf32>
    %cst_209 = arith.constant 1.000000e+00 : f32
    %875 = vector.broadcast %cst_209 : f32 to vector<2x16xf32>
    %876 = arith.addf %875, %874 : vector<2x16xf32>
    %877 = arith.divf %875, %876 : vector<2x16xf32>
    %878 = arith.index_cast %c4_i32 : i32 to index
    %c0_210 = arith.constant 0 : index
    %c0_211 = arith.constant 0 : index
    %879 = vector.load %arg13[%878, %c0_210, %c0_211] : memref<8x2x16xf32, #tpu.memory_space<vmem>>, vector<1x2x16xf32>
    %880 = vector.shape_cast %879 : vector<1x2x16xf32> to vector<2x16xf32>
    %881 = vector.shape_cast %877 : vector<2x16xf32> to vector<1x2x16xf32>
    tpu.vector_store %arg13[%878, %c0_210, %c0_211], %881 {strides = array<i32>} : memref<8x2x16xf32, #tpu.memory_space<vmem>>, vector<1x2x16xf32>,
    %c5_i32 = arith.constant 5 : i32
    %cst_212 = arith.constant dense<0.000000e+00> : vector<2x32xf32>
    %882 = tpu.matmul %736, %2, %cst_212 {dimension_numbers = #tpu.dot_dimension_numbers<[1], [0], [0], [1], [0, 0, 1, 1], [], []>} : vector<2x32xf32>, vector<32x32xf32>, vector<2x32xf32> -> vector<2x32xf32>
    %883 = vector.broadcast %3 : vector<1x32xf32> to vector<2x32xf32>
    %884 = arith.addf %882, %883 : vector<2x32xf32>
    %885 = vector.extract_strided_slice %884 {offsets = [0, 0], sizes = [2, 16], strides = [1, 1]} : vector<2x32xf32> to vector<2x16xf32>
    %886 = arith.negf %885 : vector<2x16xf32>
    %887 = math.exp %886 : vector<2x16xf32>
    %cst_213 = arith.constant 1.000000e+00 : f32
    %888 = vector.broadcast %cst_213 : f32 to vector<2x16xf32>
    %889 = arith.addf %888, %887 : vector<2x16xf32>
    %890 = arith.divf %888, %889 : vector<2x16xf32>
    %891 = vector.extract_strided_slice %884 {offsets = [0, 16], sizes = [2, 16], strides = [1, 1]} : vector<2x32xf32> to vector<2x16xf32>
    %892 = math.tanh %891 : vector<2x16xf32>
    %893 = tpu.concatenate %890, %892 in 1 : vector<2x16xf32>, vector<2x16xf32> -> vector<2x32xf32>
    %cst_214 = arith.constant dense<0.000000e+00> : vector<32x32xf32>
    %894 = tpu.matmul %800, %893, %cst_214 {dimension_numbers = #tpu.dot_dimension_numbers<[0], [0], [1], [1], [0, 1, 1, 1], [], []>} : vector<2x32xf32>, vector<2x32xf32>, vector<32x32xf32> -> vector<32x32xf32>
    %895 = vector.extract_strided_slice %894 {offsets = [0, 0], sizes = [32, 16], strides = [1, 1]} : vector<32x32xf32> to vector<32x16xf32>
    %cst_215 = arith.constant 1.000000e+00 : f32
    %896 = vector.broadcast %cst_215 : f32 to vector<32x16xf32>
    %897 = arith.subf %896, %895 : vector<32x16xf32>
    %898 = arith.mulf %872, %897 : vector<32x16xf32>
    %899 = vector.extract_strided_slice %894 {offsets = [0, 16], sizes = [32, 16], strides = [1, 1]} : vector<32x32xf32> to vector<32x16xf32>
    %900 = arith.addf %898, %899 : vector<32x16xf32>
    %cst_216 = arith.constant dense<0.000000e+00> : vector<2x16xf32>
    %901 = tpu.matmul %850, %900, %cst_216 {dimension_numbers = #tpu.dot_dimension_numbers<[1], [0], [0], [1], [0, 0, 1, 1], [], []>} : vector<2x32xf32>, vector<32x16xf32>, vector<2x16xf32> -> vector<2x16xf32>
    %902 = arith.index_cast %c5_i32 : i32 to index
    %c0_217 = arith.constant 0 : index
    %c0_218 = arith.constant 0 : index
    %903 = vector.load %arg0[%902, %c0_217, %c0_218] : memref<8x2x16xf32, #tpu.memory_space<vmem>>, vector<1x2x16xf32>
    %904 = vector.shape_cast %903 : vector<1x2x16xf32> to vector<2x16xf32>
    %905 = tpu.concatenate %904, %901 in 1 : vector<2x16xf32>, vector<2x16xf32> -> vector<2x32xf32>
    %cst_219 = arith.constant dense<0.000000e+00> : vector<2x32xf32>
    %906 = tpu.matmul %905, %0, %cst_219 {dimension_numbers = #tpu.dot_dimension_numbers<[1], [0], [0], [1], [0, 0, 1, 1], [], []>} : vector<2x32xf32>, vector<32x32xf32>, vector<2x32xf32> -> vector<2x32xf32>
    %907 = vector.broadcast %1 : vector<1x32xf32> to vector<2x32xf32>
    %908 = arith.addf %906, %907 : vector<2x32xf32>
    %cst_220 = arith.constant 0.000000e+00 : f32
    %909 = vector.broadcast %cst_220 : f32 to vector<2x32xf32>
    %910 = arith.maximumf %908, %909 : vector<2x32xf32>
    %cst_221 = arith.constant dense<0.000000e+00> : vector<2x52xf32>
    %911 = tpu.matmul %910, %4, %cst_221 {dimension_numbers = #tpu.dot_dimension_numbers<[1], [0], [0], [1], [0, 0, 1, 1], [], []>} : vector<2x32xf32>, vector<32x52xf32>, vector<2x52xf32> -> vector<2x52xf32>
    %912 = vector.broadcast %5 : vector<1x52xf32> to vector<2x52xf32>
    %913 = arith.addf %911, %912 : vector<2x52xf32>
    %914 = vector.extract_strided_slice %913 {offsets = [0, 0], sizes = [2, 18], strides = [1, 1]} : vector<2x52xf32> to vector<2x18xf32>
    %915 = vector.extract_strided_slice %913 {offsets = [0, 18], sizes = [2, 18], strides = [1, 1]} : vector<2x52xf32> to vector<2x18xf32>
    %916 = vector.extract_strided_slice %913 {offsets = [0, 36], sizes = [2, 16], strides = [1, 1]} : vector<2x52xf32> to vector<2x16xf32>
    %917 = arith.mulf %900, %900 : vector<32x16xf32>
    %cst_222 = arith.constant dense<0.000000e+00> : vector<32xf32>
    %918 = vector.multi_reduction <add>, %917, %cst_222 [1] : vector<32x16xf32> to vector<32xf32>
    %919 = vector.shape_cast %918 : vector<32xf32> to vector<32x1xf32>
    %cst_223 = arith.constant 9.99999993E-9 : f32
    %920 = vector.broadcast %cst_223 : f32 to vector<32x1xf32>
    %921 = arith.addf %919, %920 : vector<32x1xf32>
    %922 = math.rsqrt %921 : vector<32x1xf32>
    %923 = vector.broadcast %922 : vector<32x1xf32> to vector<32x16xf32>
    %924 = arith.mulf %900, %923 : vector<32x16xf32>
    %925 = vector.extract_strided_slice %914 {offsets = [0, 0], sizes = [2, 16], strides = [1, 1]} : vector<2x18xf32> to vector<2x16xf32>
    %926 = math.tanh %925 : vector<2x16xf32>
    %927 = vector.extract_strided_slice %914 {offsets = [0, 16], sizes = [2, 1], strides = [1, 1]} : vector<2x18xf32> to vector<2x1xf32>
    %cst_224 = arith.constant 0.000000e+00 : f32
    %928 = vector.broadcast %cst_224 : f32 to vector<2x1xf32>
    %929 = arith.maximumf %927, %928 : vector<2x1xf32>
    %930 = vector.broadcast %cst_224 : f32 to vector<2x1xf32>
    %931 = arith.subf %927, %930 : vector<2x1xf32>
    %932 = arith.cmpf one, %931, %931 : vector<2x1xf32>
    %933 = vector.broadcast %cst_224 : f32 to vector<2x1xf32>
    %934 = arith.addf %927, %933 : vector<2x1xf32>
    %935 = math.absf %931 : vector<2x1xf32>
    %cst_225 = arith.constant 0.000000e+00 : f32
    %936 = vector.broadcast %cst_225 : f32 to vector<2x1xf32>
    %937 = arith.subf %936, %935 : vector<2x1xf32>
    %938 = math.exp %937 : vector<2x1xf32>
    %939 = math.log1p %938 : vector<2x1xf32>
    %940 = arith.addf %929, %939 : vector<2x1xf32>
    %941 = arith.select %932, %934, %940 : vector<2x1xi1>, vector<2x1xf32>
    %942 = vector.extract_strided_slice %914 {offsets = [0, 17], sizes = [2, 1], strides = [1, 1]} : vector<2x18xf32> to vector<2x1xf32>
    %943 = arith.negf %942 : vector<2x1xf32>
    %944 = math.exp %943 : vector<2x1xf32>
    %cst_226 = arith.constant 1.000000e+00 : f32
    %945 = vector.broadcast %cst_226 : f32 to vector<2x1xf32>
    %946 = arith.addf %945, %944 : vector<2x1xf32>
    %947 = arith.divf %945, %946 : vector<2x1xf32>
    %948 = arith.mulf %926, %926 : vector<2x16xf32>
    %cst_227 = arith.constant dense<0.000000e+00> : vector<2xf32>
    %949 = vector.multi_reduction <add>, %948, %cst_227 [1] : vector<2x16xf32> to vector<2xf32>
    %950 = vector.shape_cast %949 : vector<2xf32> to vector<2x1xf32>
    %cst_228 = arith.constant 9.99999993E-9 : f32
    %951 = vector.broadcast %cst_228 : f32 to vector<2x1xf32>
    %952 = arith.addf %950, %951 : vector<2x1xf32>
    %953 = math.rsqrt %952 : vector<2x1xf32>
    %954 = vector.broadcast %953 : vector<2x1xf32> to vector<2x16xf32>
    %955 = arith.mulf %926, %954 : vector<2x16xf32>
    %cst_229 = arith.constant dense<0.000000e+00> : vector<2x32xf32>
    %956 = tpu.matmul %955, %924, %cst_229 {dimension_numbers = #tpu.dot_dimension_numbers<[1], [1], [0], [0], [0, 0, 1, 0], [], []>} : vector<2x16xf32>, vector<32x16xf32>, vector<2x32xf32> -> vector<2x32xf32>
    %957 = vector.broadcast %941 : vector<2x1xf32> to vector<2x32xf32>
    %958 = arith.mulf %957, %956 : vector<2x32xf32>
    %cst_230 = arith.constant dense<0xFF800000> : vector<2xf32>
    %959 = vector.multi_reduction <maximumf>, %958, %cst_230 [1] : vector<2x32xf32> to vector<2xf32>
    %960 = vector.shape_cast %959 : vector<2xf32> to vector<2x1xf32>
    %961 = vector.broadcast %960 : vector<2x1xf32> to vector<2x32xf32>
    %962 = arith.subf %958, %961 : vector<2x32xf32>
    %963 = math.exp %962 : vector<2x32xf32>
    %cst_231 = arith.constant dense<0.000000e+00> : vector<2xf32>
    %964 = vector.multi_reduction <add>, %963, %cst_231 [1] : vector<2x32xf32> to vector<2xf32>
    %965 = vector.shape_cast %964 : vector<2xf32> to vector<2x1xf32>
    %966 = vector.broadcast %965 : vector<2x1xf32> to vector<2x32xf32>
    %967 = arith.divf %963, %966 : vector<2x32xf32>
    %968 = vector.broadcast %947 : vector<2x1xf32> to vector<2x32xf32>
    %969 = arith.mulf %968, %967 : vector<2x32xf32>
    %cst_232 = arith.constant 1.000000e+00 : f32
    %970 = vector.broadcast %cst_232 : f32 to vector<2x1xf32>
    %971 = arith.subf %970, %947 : vector<2x1xf32>
    %972 = vector.broadcast %971 : vector<2x1xf32> to vector<2x32xf32>
    %973 = arith.mulf %972, %800 : vector<2x32xf32>
    %974 = arith.addf %969, %973 : vector<2x32xf32>
    %975 = vector.extract_strided_slice %915 {offsets = [0, 0], sizes = [2, 16], strides = [1, 1]} : vector<2x18xf32> to vector<2x16xf32>
    %976 = math.tanh %975 : vector<2x16xf32>
    %977 = vector.extract_strided_slice %915 {offsets = [0, 16], sizes = [2, 1], strides = [1, 1]} : vector<2x18xf32> to vector<2x1xf32>
    %cst_233 = arith.constant 0.000000e+00 : f32
    %978 = vector.broadcast %cst_233 : f32 to vector<2x1xf32>
    %979 = arith.maximumf %977, %978 : vector<2x1xf32>
    %980 = vector.broadcast %cst_233 : f32 to vector<2x1xf32>
    %981 = arith.subf %977, %980 : vector<2x1xf32>
    %982 = arith.cmpf one, %981, %981 : vector<2x1xf32>
    %983 = vector.broadcast %cst_233 : f32 to vector<2x1xf32>
    %984 = arith.addf %977, %983 : vector<2x1xf32>
    %985 = math.absf %981 : vector<2x1xf32>
    %cst_234 = arith.constant 0.000000e+00 : f32
    %986 = vector.broadcast %cst_234 : f32 to vector<2x1xf32>
    %987 = arith.subf %986, %985 : vector<2x1xf32>
    %988 = math.exp %987 : vector<2x1xf32>
    %989 = math.log1p %988 : vector<2x1xf32>
    %990 = arith.addf %979, %989 : vector<2x1xf32>
    %991 = arith.select %982, %984, %990 : vector<2x1xi1>, vector<2x1xf32>
    %992 = vector.extract_strided_slice %915 {offsets = [0, 17], sizes = [2, 1], strides = [1, 1]} : vector<2x18xf32> to vector<2x1xf32>
    %993 = arith.negf %992 : vector<2x1xf32>
    %994 = math.exp %993 : vector<2x1xf32>
    %cst_235 = arith.constant 1.000000e+00 : f32
    %995 = vector.broadcast %cst_235 : f32 to vector<2x1xf32>
    %996 = arith.addf %995, %994 : vector<2x1xf32>
    %997 = arith.divf %995, %996 : vector<2x1xf32>
    %998 = arith.mulf %976, %976 : vector<2x16xf32>
    %cst_236 = arith.constant dense<0.000000e+00> : vector<2xf32>
    %999 = vector.multi_reduction <add>, %998, %cst_236 [1] : vector<2x16xf32> to vector<2xf32>
    %1000 = vector.shape_cast %999 : vector<2xf32> to vector<2x1xf32>
    %cst_237 = arith.constant 9.99999993E-9 : f32
    %1001 = vector.broadcast %cst_237 : f32 to vector<2x1xf32>
    %1002 = arith.addf %1000, %1001 : vector<2x1xf32>
    %1003 = math.rsqrt %1002 : vector<2x1xf32>
    %1004 = vector.broadcast %1003 : vector<2x1xf32> to vector<2x16xf32>
    %1005 = arith.mulf %976, %1004 : vector<2x16xf32>
    %cst_238 = arith.constant dense<0.000000e+00> : vector<2x32xf32>
    %1006 = tpu.matmul %1005, %924, %cst_238 {dimension_numbers = #tpu.dot_dimension_numbers<[1], [1], [0], [0], [0, 0, 1, 0], [], []>} : vector<2x16xf32>, vector<32x16xf32>, vector<2x32xf32> -> vector<2x32xf32>
    %1007 = vector.broadcast %991 : vector<2x1xf32> to vector<2x32xf32>
    %1008 = arith.mulf %1007, %1006 : vector<2x32xf32>
    %cst_239 = arith.constant dense<0xFF800000> : vector<2xf32>
    %1009 = vector.multi_reduction <maximumf>, %1008, %cst_239 [1] : vector<2x32xf32> to vector<2xf32>
    %1010 = vector.shape_cast %1009 : vector<2xf32> to vector<2x1xf32>
    %1011 = vector.broadcast %1010 : vector<2x1xf32> to vector<2x32xf32>
    %1012 = arith.subf %1008, %1011 : vector<2x32xf32>
    %1013 = math.exp %1012 : vector<2x32xf32>
    %cst_240 = arith.constant dense<0.000000e+00> : vector<2xf32>
    %1014 = vector.multi_reduction <add>, %1013, %cst_240 [1] : vector<2x32xf32> to vector<2xf32>
    %1015 = vector.shape_cast %1014 : vector<2xf32> to vector<2x1xf32>
    %1016 = vector.broadcast %1015 : vector<2x1xf32> to vector<2x32xf32>
    %1017 = arith.divf %1013, %1016 : vector<2x32xf32>
    %1018 = vector.broadcast %997 : vector<2x1xf32> to vector<2x32xf32>
    %1019 = arith.mulf %1018, %1017 : vector<2x32xf32>
    %cst_241 = arith.constant 1.000000e+00 : f32
    %1020 = vector.broadcast %cst_241 : f32 to vector<2x1xf32>
    %1021 = arith.subf %1020, %997 : vector<2x1xf32>
    %1022 = vector.broadcast %1021 : vector<2x1xf32> to vector<2x32xf32>
    %1023 = arith.mulf %1022, %850 : vector<2x32xf32>
    %1024 = arith.addf %1019, %1023 : vector<2x32xf32>
    %cst_242 = arith.constant dense<0.000000e+00> : vector<16xf32>
    %1025 = vector.multi_reduction <add>, %900, %cst_242 [0] : vector<32x16xf32> to vector<16xf32>
    %1026 = vector.shape_cast %1025 : vector<16xf32> to vector<1x16xf32>
    %cst_243 = arith.constant 3.200000e+01 : f32
    %1027 = vector.broadcast %cst_243 : f32 to vector<1x16xf32>
    %1028 = arith.divf %1026, %1027 : vector<1x16xf32>
    %1029 = vector.broadcast %1028 : vector<1x16xf32> to vector<32x16xf32>
    %1030 = arith.subf %900, %1029 : vector<32x16xf32>
    %1031 = arith.mulf %1030, %1030 : vector<32x16xf32>
    %cst_244 = arith.constant dense<0.000000e+00> : vector<16xf32>
    %1032 = vector.multi_reduction <add>, %1031, %cst_244 [0] : vector<32x16xf32> to vector<16xf32>
    %1033 = vector.shape_cast %1032 : vector<16xf32> to vector<1x16xf32>
    %cst_245 = arith.constant 3.200000e+01 : f32
    %1034 = vector.broadcast %cst_245 : f32 to vector<1x16xf32>
    %1035 = arith.divf %1033, %1034 : vector<1x16xf32>
    %1036 = vector.broadcast %1028 : vector<1x16xf32> to vector<32x16xf32>
    %1037 = arith.subf %900, %1036 : vector<32x16xf32>
    %cst_246 = arith.constant 9.99999974E-6 : f32
    %1038 = vector.broadcast %cst_246 : f32 to vector<1x16xf32>
    %1039 = arith.addf %1035, %1038 : vector<1x16xf32>
    %1040 = math.rsqrt %1039 : vector<1x16xf32>
    %1041 = vector.broadcast %1040 : vector<1x16xf32> to vector<32x16xf32>
    %1042 = arith.mulf %1037, %1041 : vector<32x16xf32>
    %1043 = vector.broadcast %6 : vector<1x16xf32> to vector<32x16xf32>
    %1044 = arith.mulf %1042, %1043 : vector<32x16xf32>
    %1045 = vector.broadcast %7 : vector<1x16xf32> to vector<32x16xf32>
    %1046 = arith.addf %1044, %1045 : vector<32x16xf32>
    %1047 = arith.negf %916 : vector<2x16xf32>
    %1048 = math.exp %1047 : vector<2x16xf32>
    %cst_247 = arith.constant 1.000000e+00 : f32
    %1049 = vector.broadcast %cst_247 : f32 to vector<2x16xf32>
    %1050 = arith.addf %1049, %1048 : vector<2x16xf32>
    %1051 = arith.divf %1049, %1050 : vector<2x16xf32>
    %1052 = arith.index_cast %c5_i32 : i32 to index
    %c0_248 = arith.constant 0 : index
    %c0_249 = arith.constant 0 : index
    %1053 = vector.load %arg13[%1052, %c0_248, %c0_249] : memref<8x2x16xf32, #tpu.memory_space<vmem>>, vector<1x2x16xf32>
    %1054 = vector.shape_cast %1053 : vector<1x2x16xf32> to vector<2x16xf32>
    %1055 = vector.shape_cast %1051 : vector<2x16xf32> to vector<1x2x16xf32>
    tpu.vector_store %arg13[%1052, %c0_248, %c0_249], %1055 {strides = array<i32>} : memref<8x2x16xf32, #tpu.memory_space<vmem>>, vector<1x2x16xf32>,
    %c6_i32 = arith.constant 6 : i32
    %cst_250 = arith.constant dense<0.000000e+00> : vector<2x32xf32>
    %1056 = tpu.matmul %910, %2, %cst_250 {dimension_numbers = #tpu.dot_dimension_numbers<[1], [0], [0], [1], [0, 0, 1, 1], [], []>} : vector<2x32xf32>, vector<32x32xf32>, vector<2x32xf32> -> vector<2x32xf32>
    %1057 = vector.broadcast %3 : vector<1x32xf32> to vector<2x32xf32>
    %1058 = arith.addf %1056, %1057 : vector<2x32xf32>
    %1059 = vector.extract_strided_slice %1058 {offsets = [0, 0], sizes = [2, 16], strides = [1, 1]} : vector<2x32xf32> to vector<2x16xf32>
    %1060 = arith.negf %1059 : vector<2x16xf32>
    %1061 = math.exp %1060 : vector<2x16xf32>
    %cst_251 = arith.constant 1.000000e+00 : f32
    %1062 = vector.broadcast %cst_251 : f32 to vector<2x16xf32>
    %1063 = arith.addf %1062, %1061 : vector<2x16xf32>
    %1064 = arith.divf %1062, %1063 : vector<2x16xf32>
    %1065 = vector.extract_strided_slice %1058 {offsets = [0, 16], sizes = [2, 16], strides = [1, 1]} : vector<2x32xf32> to vector<2x16xf32>
    %1066 = math.tanh %1065 : vector<2x16xf32>
    %1067 = tpu.concatenate %1064, %1066 in 1 : vector<2x16xf32>, vector<2x16xf32> -> vector<2x32xf32>
    %cst_252 = arith.constant dense<0.000000e+00> : vector<32x32xf32>
    %1068 = tpu.matmul %974, %1067, %cst_252 {dimension_numbers = #tpu.dot_dimension_numbers<[0], [0], [1], [1], [0, 1, 1, 1], [], []>} : vector<2x32xf32>, vector<2x32xf32>, vector<32x32xf32> -> vector<32x32xf32>
    %1069 = vector.extract_strided_slice %1068 {offsets = [0, 0], sizes = [32, 16], strides = [1, 1]} : vector<32x32xf32> to vector<32x16xf32>
    %cst_253 = arith.constant 1.000000e+00 : f32
    %1070 = vector.broadcast %cst_253 : f32 to vector<32x16xf32>
    %1071 = arith.subf %1070, %1069 : vector<32x16xf32>
    %1072 = arith.mulf %1046, %1071 : vector<32x16xf32>
    %1073 = vector.extract_strided_slice %1068 {offsets = [0, 16], sizes = [32, 16], strides = [1, 1]} : vector<32x32xf32> to vector<32x16xf32>
    %1074 = arith.addf %1072, %1073 : vector<32x16xf32>
    %cst_254 = arith.constant dense<0.000000e+00> : vector<2x16xf32>
    %1075 = tpu.matmul %1024, %1074, %cst_254 {dimension_numbers = #tpu.dot_dimension_numbers<[1], [0], [0], [1], [0, 0, 1, 1], [], []>} : vector<2x32xf32>, vector<32x16xf32>, vector<2x16xf32> -> vector<2x16xf32>
    %1076 = arith.index_cast %c6_i32 : i32 to index
    %c0_255 = arith.constant 0 : index
    %c0_256 = arith.constant 0 : index
    %1077 = vector.load %arg0[%1076, %c0_255, %c0_256] : memref<8x2x16xf32, #tpu.memory_space<vmem>>, vector<1x2x16xf32>
    %1078 = vector.shape_cast %1077 : vector<1x2x16xf32> to vector<2x16xf32>
    %1079 = tpu.concatenate %1078, %1075 in 1 : vector<2x16xf32>, vector<2x16xf32> -> vector<2x32xf32>
    %cst_257 = arith.constant dense<0.000000e+00> : vector<2x32xf32>
    %1080 = tpu.matmul %1079, %0, %cst_257 {dimension_numbers = #tpu.dot_dimension_numbers<[1], [0], [0], [1], [0, 0, 1, 1], [], []>} : vector<2x32xf32>, vector<32x32xf32>, vector<2x32xf32> -> vector<2x32xf32>
    %1081 = vector.broadcast %1 : vector<1x32xf32> to vector<2x32xf32>
    %1082 = arith.addf %1080, %1081 : vector<2x32xf32>
    %cst_258 = arith.constant 0.000000e+00 : f32
    %1083 = vector.broadcast %cst_258 : f32 to vector<2x32xf32>
    %1084 = arith.maximumf %1082, %1083 : vector<2x32xf32>
    %cst_259 = arith.constant dense<0.000000e+00> : vector<2x52xf32>
    %1085 = tpu.matmul %1084, %4, %cst_259 {dimension_numbers = #tpu.dot_dimension_numbers<[1], [0], [0], [1], [0, 0, 1, 1], [], []>} : vector<2x32xf32>, vector<32x52xf32>, vector<2x52xf32> -> vector<2x52xf32>
    %1086 = vector.broadcast %5 : vector<1x52xf32> to vector<2x52xf32>
    %1087 = arith.addf %1085, %1086 : vector<2x52xf32>
    %1088 = vector.extract_strided_slice %1087 {offsets = [0, 0], sizes = [2, 18], strides = [1, 1]} : vector<2x52xf32> to vector<2x18xf32>
    %1089 = vector.extract_strided_slice %1087 {offsets = [0, 18], sizes = [2, 18], strides = [1, 1]} : vector<2x52xf32> to vector<2x18xf32>
    %1090 = vector.extract_strided_slice %1087 {offsets = [0, 36], sizes = [2, 16], strides = [1, 1]} : vector<2x52xf32> to vector<2x16xf32>
    %1091 = arith.mulf %1074, %1074 : vector<32x16xf32>
    %cst_260 = arith.constant dense<0.000000e+00> : vector<32xf32>
    %1092 = vector.multi_reduction <add>, %1091, %cst_260 [1] : vector<32x16xf32> to vector<32xf32>
    %1093 = vector.shape_cast %1092 : vector<32xf32> to vector<32x1xf32>
    %cst_261 = arith.constant 9.99999993E-9 : f32
    %1094 = vector.broadcast %cst_261 : f32 to vector<32x1xf32>
    %1095 = arith.addf %1093, %1094 : vector<32x1xf32>
    %1096 = math.rsqrt %1095 : vector<32x1xf32>
    %1097 = vector.broadcast %1096 : vector<32x1xf32> to vector<32x16xf32>
    %1098 = arith.mulf %1074, %1097 : vector<32x16xf32>
    %1099 = vector.extract_strided_slice %1088 {offsets = [0, 0], sizes = [2, 16], strides = [1, 1]} : vector<2x18xf32> to vector<2x16xf32>
    %1100 = math.tanh %1099 : vector<2x16xf32>
    %1101 = vector.extract_strided_slice %1088 {offsets = [0, 16], sizes = [2, 1], strides = [1, 1]} : vector<2x18xf32> to vector<2x1xf32>
    %cst_262 = arith.constant 0.000000e+00 : f32
    %1102 = vector.broadcast %cst_262 : f32 to vector<2x1xf32>
    %1103 = arith.maximumf %1101, %1102 : vector<2x1xf32>
    %1104 = vector.broadcast %cst_262 : f32 to vector<2x1xf32>
    %1105 = arith.subf %1101, %1104 : vector<2x1xf32>
    %1106 = arith.cmpf one, %1105, %1105 : vector<2x1xf32>
    %1107 = vector.broadcast %cst_262 : f32 to vector<2x1xf32>
    %1108 = arith.addf %1101, %1107 : vector<2x1xf32>
    %1109 = math.absf %1105 : vector<2x1xf32>
    %cst_263 = arith.constant 0.000000e+00 : f32
    %1110 = vector.broadcast %cst_263 : f32 to vector<2x1xf32>
    %1111 = arith.subf %1110, %1109 : vector<2x1xf32>
    %1112 = math.exp %1111 : vector<2x1xf32>
    %1113 = math.log1p %1112 : vector<2x1xf32>
    %1114 = arith.addf %1103, %1113 : vector<2x1xf32>
    %1115 = arith.select %1106, %1108, %1114 : vector<2x1xi1>, vector<2x1xf32>
    %1116 = vector.extract_strided_slice %1088 {offsets = [0, 17], sizes = [2, 1], strides = [1, 1]} : vector<2x18xf32> to vector<2x1xf32>
    %1117 = arith.negf %1116 : vector<2x1xf32>
    %1118 = math.exp %1117 : vector<2x1xf32>
    %cst_264 = arith.constant 1.000000e+00 : f32
    %1119 = vector.broadcast %cst_264 : f32 to vector<2x1xf32>
    %1120 = arith.addf %1119, %1118 : vector<2x1xf32>
    %1121 = arith.divf %1119, %1120 : vector<2x1xf32>
    %1122 = arith.mulf %1100, %1100 : vector<2x16xf32>
    %cst_265 = arith.constant dense<0.000000e+00> : vector<2xf32>
    %1123 = vector.multi_reduction <add>, %1122, %cst_265 [1] : vector<2x16xf32> to vector<2xf32>
    %1124 = vector.shape_cast %1123 : vector<2xf32> to vector<2x1xf32>
    %cst_266 = arith.constant 9.99999993E-9 : f32
    %1125 = vector.broadcast %cst_266 : f32 to vector<2x1xf32>
    %1126 = arith.addf %1124, %1125 : vector<2x1xf32>
    %1127 = math.rsqrt %1126 : vector<2x1xf32>
    %1128 = vector.broadcast %1127 : vector<2x1xf32> to vector<2x16xf32>
    %1129 = arith.mulf %1100, %1128 : vector<2x16xf32>
    %cst_267 = arith.constant dense<0.000000e+00> : vector<2x32xf32>
    %1130 = tpu.matmul %1129, %1098, %cst_267 {dimension_numbers = #tpu.dot_dimension_numbers<[1], [1], [0], [0], [0, 0, 1, 0], [], []>} : vector<2x16xf32>, vector<32x16xf32>, vector<2x32xf32> -> vector<2x32xf32>
    %1131 = vector.broadcast %1115 : vector<2x1xf32> to vector<2x32xf32>
    %1132 = arith.mulf %1131, %1130 : vector<2x32xf32>
    %cst_268 = arith.constant dense<0xFF800000> : vector<2xf32>
    %1133 = vector.multi_reduction <maximumf>, %1132, %cst_268 [1] : vector<2x32xf32> to vector<2xf32>
    %1134 = vector.shape_cast %1133 : vector<2xf32> to vector<2x1xf32>
    %1135 = vector.broadcast %1134 : vector<2x1xf32> to vector<2x32xf32>
    %1136 = arith.subf %1132, %1135 : vector<2x32xf32>
    %1137 = math.exp %1136 : vector<2x32xf32>
    %cst_269 = arith.constant dense<0.000000e+00> : vector<2xf32>
    %1138 = vector.multi_reduction <add>, %1137, %cst_269 [1] : vector<2x32xf32> to vector<2xf32>
    %1139 = vector.shape_cast %1138 : vector<2xf32> to vector<2x1xf32>
    %1140 = vector.broadcast %1139 : vector<2x1xf32> to vector<2x32xf32>
    %1141 = arith.divf %1137, %1140 : vector<2x32xf32>
    %1142 = vector.broadcast %1121 : vector<2x1xf32> to vector<2x32xf32>
    %1143 = arith.mulf %1142, %1141 : vector<2x32xf32>
    %cst_270 = arith.constant 1.000000e+00 : f32
    %1144 = vector.broadcast %cst_270 : f32 to vector<2x1xf32>
    %1145 = arith.subf %1144, %1121 : vector<2x1xf32>
    %1146 = vector.broadcast %1145 : vector<2x1xf32> to vector<2x32xf32>
    %1147 = arith.mulf %1146, %974 : vector<2x32xf32>
    %1148 = arith.addf %1143, %1147 : vector<2x32xf32>
    %1149 = vector.extract_strided_slice %1089 {offsets = [0, 0], sizes = [2, 16], strides = [1, 1]} : vector<2x18xf32> to vector<2x16xf32>
    %1150 = math.tanh %1149 : vector<2x16xf32>
    %1151 = vector.extract_strided_slice %1089 {offsets = [0, 16], sizes = [2, 1], strides = [1, 1]} : vector<2x18xf32> to vector<2x1xf32>
    %cst_271 = arith.constant 0.000000e+00 : f32
    %1152 = vector.broadcast %cst_271 : f32 to vector<2x1xf32>
    %1153 = arith.maximumf %1151, %1152 : vector<2x1xf32>
    %1154 = vector.broadcast %cst_271 : f32 to vector<2x1xf32>
    %1155 = arith.subf %1151, %1154 : vector<2x1xf32>
    %1156 = arith.cmpf one, %1155, %1155 : vector<2x1xf32>
    %1157 = vector.broadcast %cst_271 : f32 to vector<2x1xf32>
    %1158 = arith.addf %1151, %1157 : vector<2x1xf32>
    %1159 = math.absf %1155 : vector<2x1xf32>
    %cst_272 = arith.constant 0.000000e+00 : f32
    %1160 = vector.broadcast %cst_272 : f32 to vector<2x1xf32>
    %1161 = arith.subf %1160, %1159 : vector<2x1xf32>
    %1162 = math.exp %1161 : vector<2x1xf32>
    %1163 = math.log1p %1162 : vector<2x1xf32>
    %1164 = arith.addf %1153, %1163 : vector<2x1xf32>
    %1165 = arith.select %1156, %1158, %1164 : vector<2x1xi1>, vector<2x1xf32>
    %1166 = vector.extract_strided_slice %1089 {offsets = [0, 17], sizes = [2, 1], strides = [1, 1]} : vector<2x18xf32> to vector<2x1xf32>
    %1167 = arith.negf %1166 : vector<2x1xf32>
    %1168 = math.exp %1167 : vector<2x1xf32>
    %cst_273 = arith.constant 1.000000e+00 : f32
    %1169 = vector.broadcast %cst_273 : f32 to vector<2x1xf32>
    %1170 = arith.addf %1169, %1168 : vector<2x1xf32>
    %1171 = arith.divf %1169, %1170 : vector<2x1xf32>
    %1172 = arith.mulf %1150, %1150 : vector<2x16xf32>
    %cst_274 = arith.constant dense<0.000000e+00> : vector<2xf32>
    %1173 = vector.multi_reduction <add>, %1172, %cst_274 [1] : vector<2x16xf32> to vector<2xf32>
    %1174 = vector.shape_cast %1173 : vector<2xf32> to vector<2x1xf32>
    %cst_275 = arith.constant 9.99999993E-9 : f32
    %1175 = vector.broadcast %cst_275 : f32 to vector<2x1xf32>
    %1176 = arith.addf %1174, %1175 : vector<2x1xf32>
    %1177 = math.rsqrt %1176 : vector<2x1xf32>
    %1178 = vector.broadcast %1177 : vector<2x1xf32> to vector<2x16xf32>
    %1179 = arith.mulf %1150, %1178 : vector<2x16xf32>
    %cst_276 = arith.constant dense<0.000000e+00> : vector<2x32xf32>
    %1180 = tpu.matmul %1179, %1098, %cst_276 {dimension_numbers = #tpu.dot_dimension_numbers<[1], [1], [0], [0], [0, 0, 1, 0], [], []>} : vector<2x16xf32>, vector<32x16xf32>, vector<2x32xf32> -> vector<2x32xf32>
    %1181 = vector.broadcast %1165 : vector<2x1xf32> to vector<2x32xf32>
    %1182 = arith.mulf %1181, %1180 : vector<2x32xf32>
    %cst_277 = arith.constant dense<0xFF800000> : vector<2xf32>
    %1183 = vector.multi_reduction <maximumf>, %1182, %cst_277 [1] : vector<2x32xf32> to vector<2xf32>
    %1184 = vector.shape_cast %1183 : vector<2xf32> to vector<2x1xf32>
    %1185 = vector.broadcast %1184 : vector<2x1xf32> to vector<2x32xf32>
    %1186 = arith.subf %1182, %1185 : vector<2x32xf32>
    %1187 = math.exp %1186 : vector<2x32xf32>
    %cst_278 = arith.constant dense<0.000000e+00> : vector<2xf32>
    %1188 = vector.multi_reduction <add>, %1187, %cst_278 [1] : vector<2x32xf32> to vector<2xf32>
    %1189 = vector.shape_cast %1188 : vector<2xf32> to vector<2x1xf32>
    %1190 = vector.broadcast %1189 : vector<2x1xf32> to vector<2x32xf32>
    %1191 = arith.divf %1187, %1190 : vector<2x32xf32>
    %1192 = vector.broadcast %1171 : vector<2x1xf32> to vector<2x32xf32>
    %1193 = arith.mulf %1192, %1191 : vector<2x32xf32>
    %cst_279 = arith.constant 1.000000e+00 : f32
    %1194 = vector.broadcast %cst_279 : f32 to vector<2x1xf32>
    %1195 = arith.subf %1194, %1171 : vector<2x1xf32>
    %1196 = vector.broadcast %1195 : vector<2x1xf32> to vector<2x32xf32>
    %1197 = arith.mulf %1196, %1024 : vector<2x32xf32>
    %1198 = arith.addf %1193, %1197 : vector<2x32xf32>
    %cst_280 = arith.constant dense<0.000000e+00> : vector<16xf32>
    %1199 = vector.multi_reduction <add>, %1074, %cst_280 [0] : vector<32x16xf32> to vector<16xf32>
    %1200 = vector.shape_cast %1199 : vector<16xf32> to vector<1x16xf32>
    %cst_281 = arith.constant 3.200000e+01 : f32
    %1201 = vector.broadcast %cst_281 : f32 to vector<1x16xf32>
    %1202 = arith.divf %1200, %1201 : vector<1x16xf32>
    %1203 = vector.broadcast %1202 : vector<1x16xf32> to vector<32x16xf32>
    %1204 = arith.subf %1074, %1203 : vector<32x16xf32>
    %1205 = arith.mulf %1204, %1204 : vector<32x16xf32>
    %cst_282 = arith.constant dense<0.000000e+00> : vector<16xf32>
    %1206 = vector.multi_reduction <add>, %1205, %cst_282 [0] : vector<32x16xf32> to vector<16xf32>
    %1207 = vector.shape_cast %1206 : vector<16xf32> to vector<1x16xf32>
    %cst_283 = arith.constant 3.200000e+01 : f32
    %1208 = vector.broadcast %cst_283 : f32 to vector<1x16xf32>
    %1209 = arith.divf %1207, %1208 : vector<1x16xf32>
    %1210 = vector.broadcast %1202 : vector<1x16xf32> to vector<32x16xf32>
    %1211 = arith.subf %1074, %1210 : vector<32x16xf32>
    %cst_284 = arith.constant 9.99999974E-6 : f32
    %1212 = vector.broadcast %cst_284 : f32 to vector<1x16xf32>
    %1213 = arith.addf %1209, %1212 : vector<1x16xf32>
    %1214 = math.rsqrt %1213 : vector<1x16xf32>
    %1215 = vector.broadcast %1214 : vector<1x16xf32> to vector<32x16xf32>
    %1216 = arith.mulf %1211, %1215 : vector<32x16xf32>
    %1217 = vector.broadcast %6 : vector<1x16xf32> to vector<32x16xf32>
    %1218 = arith.mulf %1216, %1217 : vector<32x16xf32>
    %1219 = vector.broadcast %7 : vector<1x16xf32> to vector<32x16xf32>
    %1220 = arith.addf %1218, %1219 : vector<32x16xf32>
    %1221 = arith.negf %1090 : vector<2x16xf32>
    %1222 = math.exp %1221 : vector<2x16xf32>
    %cst_285 = arith.constant 1.000000e+00 : f32
    %1223 = vector.broadcast %cst_285 : f32 to vector<2x16xf32>
    %1224 = arith.addf %1223, %1222 : vector<2x16xf32>
    %1225 = arith.divf %1223, %1224 : vector<2x16xf32>
    %1226 = arith.index_cast %c6_i32 : i32 to index
    %c0_286 = arith.constant 0 : index
    %c0_287 = arith.constant 0 : index
    %1227 = vector.load %arg13[%1226, %c0_286, %c0_287] : memref<8x2x16xf32, #tpu.memory_space<vmem>>, vector<1x2x16xf32>
    %1228 = vector.shape_cast %1227 : vector<1x2x16xf32> to vector<2x16xf32>
    %1229 = vector.shape_cast %1225 : vector<2x16xf32> to vector<1x2x16xf32>
    tpu.vector_store %arg13[%1226, %c0_286, %c0_287], %1229 {strides = array<i32>} : memref<8x2x16xf32, #tpu.memory_space<vmem>>, vector<1x2x16xf32>,
    %c7_i32 = arith.constant 7 : i32
    %cst_288 = arith.constant dense<0.000000e+00> : vector<2x32xf32>
    %1230 = tpu.matmul %1084, %2, %cst_288 {dimension_numbers = #tpu.dot_dimension_numbers<[1], [0], [0], [1], [0, 0, 1, 1], [], []>} : vector<2x32xf32>, vector<32x32xf32>, vector<2x32xf32> -> vector<2x32xf32>
    %1231 = vector.broadcast %3 : vector<1x32xf32> to vector<2x32xf32>
    %1232 = arith.addf %1230, %1231 : vector<2x32xf32>
    %1233 = vector.extract_strided_slice %1232 {offsets = [0, 0], sizes = [2, 16], strides = [1, 1]} : vector<2x32xf32> to vector<2x16xf32>
    %1234 = arith.negf %1233 : vector<2x16xf32>
    %1235 = math.exp %1234 : vector<2x16xf32>
    %cst_289 = arith.constant 1.000000e+00 : f32
    %1236 = vector.broadcast %cst_289 : f32 to vector<2x16xf32>
    %1237 = arith.addf %1236, %1235 : vector<2x16xf32>
    %1238 = arith.divf %1236, %1237 : vector<2x16xf32>
    %1239 = vector.extract_strided_slice %1232 {offsets = [0, 16], sizes = [2, 16], strides = [1, 1]} : vector<2x32xf32> to vector<2x16xf32>
    %1240 = math.tanh %1239 : vector<2x16xf32>
    %1241 = tpu.concatenate %1238, %1240 in 1 : vector<2x16xf32>, vector<2x16xf32> -> vector<2x32xf32>
    %cst_290 = arith.constant dense<0.000000e+00> : vector<32x32xf32>
    %1242 = tpu.matmul %1148, %1241, %cst_290 {dimension_numbers = #tpu.dot_dimension_numbers<[0], [0], [1], [1], [0, 1, 1, 1], [], []>} : vector<2x32xf32>, vector<2x32xf32>, vector<32x32xf32> -> vector<32x32xf32>
    %1243 = vector.extract_strided_slice %1242 {offsets = [0, 0], sizes = [32, 16], strides = [1, 1]} : vector<32x32xf32> to vector<32x16xf32>
    %cst_291 = arith.constant 1.000000e+00 : f32
    %1244 = vector.broadcast %cst_291 : f32 to vector<32x16xf32>
    %1245 = arith.subf %1244, %1243 : vector<32x16xf32>
    %1246 = arith.mulf %1220, %1245 : vector<32x16xf32>
    %1247 = vector.extract_strided_slice %1242 {offsets = [0, 16], sizes = [32, 16], strides = [1, 1]} : vector<32x32xf32> to vector<32x16xf32>
    %1248 = arith.addf %1246, %1247 : vector<32x16xf32>
    %cst_292 = arith.constant dense<0.000000e+00> : vector<2x16xf32>
    %1249 = tpu.matmul %1198, %1248, %cst_292 {dimension_numbers = #tpu.dot_dimension_numbers<[1], [0], [0], [1], [0, 0, 1, 1], [], []>} : vector<2x32xf32>, vector<32x16xf32>, vector<2x16xf32> -> vector<2x16xf32>
    %1250 = arith.index_cast %c7_i32 : i32 to index
    %c0_293 = arith.constant 0 : index
    %c0_294 = arith.constant 0 : index
    %1251 = vector.load %arg0[%1250, %c0_293, %c0_294] : memref<8x2x16xf32, #tpu.memory_space<vmem>>, vector<1x2x16xf32>
    %1252 = vector.shape_cast %1251 : vector<1x2x16xf32> to vector<2x16xf32>
    %1253 = tpu.concatenate %1252, %1249 in 1 : vector<2x16xf32>, vector<2x16xf32> -> vector<2x32xf32>
    %cst_295 = arith.constant dense<0.000000e+00> : vector<2x32xf32>
    %1254 = tpu.matmul %1253, %0, %cst_295 {dimension_numbers = #tpu.dot_dimension_numbers<[1], [0], [0], [1], [0, 0, 1, 1], [], []>} : vector<2x32xf32>, vector<32x32xf32>, vector<2x32xf32> -> vector<2x32xf32>
    %1255 = vector.broadcast %1 : vector<1x32xf32> to vector<2x32xf32>
    %1256 = arith.addf %1254, %1255 : vector<2x32xf32>
    %cst_296 = arith.constant 0.000000e+00 : f32
    %1257 = vector.broadcast %cst_296 : f32 to vector<2x32xf32>
    %1258 = arith.maximumf %1256, %1257 : vector<2x32xf32>
    %cst_297 = arith.constant dense<0.000000e+00> : vector<2x52xf32>
    %1259 = tpu.matmul %1258, %4, %cst_297 {dimension_numbers = #tpu.dot_dimension_numbers<[1], [0], [0], [1], [0, 0, 1, 1], [], []>} : vector<2x32xf32>, vector<32x52xf32>, vector<2x52xf32> -> vector<2x52xf32>
    %1260 = vector.broadcast %5 : vector<1x52xf32> to vector<2x52xf32>
    %1261 = arith.addf %1259, %1260 : vector<2x52xf32>
    %1262 = vector.extract_strided_slice %1261 {offsets = [0, 0], sizes = [2, 18], strides = [1, 1]} : vector<2x52xf32> to vector<2x18xf32>
    %1263 = vector.extract_strided_slice %1261 {offsets = [0, 18], sizes = [2, 18], strides = [1, 1]} : vector<2x52xf32> to vector<2x18xf32>
    %1264 = vector.extract_strided_slice %1261 {offsets = [0, 36], sizes = [2, 16], strides = [1, 1]} : vector<2x52xf32> to vector<2x16xf32>
    %1265 = arith.mulf %1248, %1248 : vector<32x16xf32>
    %cst_298 = arith.constant dense<0.000000e+00> : vector<32xf32>
    %1266 = vector.multi_reduction <add>, %1265, %cst_298 [1] : vector<32x16xf32> to vector<32xf32>
    %1267 = vector.shape_cast %1266 : vector<32xf32> to vector<32x1xf32>
    %cst_299 = arith.constant 9.99999993E-9 : f32
    %1268 = vector.broadcast %cst_299 : f32 to vector<32x1xf32>
    %1269 = arith.addf %1267, %1268 : vector<32x1xf32>
    %1270 = math.rsqrt %1269 : vector<32x1xf32>
    %1271 = vector.broadcast %1270 : vector<32x1xf32> to vector<32x16xf32>
    %1272 = arith.mulf %1248, %1271 : vector<32x16xf32>
    %1273 = vector.extract_strided_slice %1262 {offsets = [0, 0], sizes = [2, 16], strides = [1, 1]} : vector<2x18xf32> to vector<2x16xf32>
    %1274 = math.tanh %1273 : vector<2x16xf32>
    %1275 = vector.extract_strided_slice %1262 {offsets = [0, 16], sizes = [2, 1], strides = [1, 1]} : vector<2x18xf32> to vector<2x1xf32>
    %cst_300 = arith.constant 0.000000e+00 : f32
    %1276 = vector.broadcast %cst_300 : f32 to vector<2x1xf32>
    %1277 = arith.maximumf %1275, %1276 : vector<2x1xf32>
    %1278 = vector.broadcast %cst_300 : f32 to vector<2x1xf32>
    %1279 = arith.subf %1275, %1278 : vector<2x1xf32>
    %1280 = arith.cmpf one, %1279, %1279 : vector<2x1xf32>
    %1281 = vector.broadcast %cst_300 : f32 to vector<2x1xf32>
    %1282 = arith.addf %1275, %1281 : vector<2x1xf32>
    %1283 = math.absf %1279 : vector<2x1xf32>
    %cst_301 = arith.constant 0.000000e+00 : f32
    %1284 = vector.broadcast %cst_301 : f32 to vector<2x1xf32>
    %1285 = arith.subf %1284, %1283 : vector<2x1xf32>
    %1286 = math.exp %1285 : vector<2x1xf32>
    %1287 = math.log1p %1286 : vector<2x1xf32>
    %1288 = arith.addf %1277, %1287 : vector<2x1xf32>
    %1289 = arith.select %1280, %1282, %1288 : vector<2x1xi1>, vector<2x1xf32>
    %1290 = vector.extract_strided_slice %1262 {offsets = [0, 17], sizes = [2, 1], strides = [1, 1]} : vector<2x18xf32> to vector<2x1xf32>
    %1291 = arith.negf %1290 : vector<2x1xf32>
    %1292 = math.exp %1291 : vector<2x1xf32>
    %cst_302 = arith.constant 1.000000e+00 : f32
    %1293 = vector.broadcast %cst_302 : f32 to vector<2x1xf32>
    %1294 = arith.addf %1293, %1292 : vector<2x1xf32>
    %1295 = arith.divf %1293, %1294 : vector<2x1xf32>
    %1296 = arith.mulf %1274, %1274 : vector<2x16xf32>
    %cst_303 = arith.constant dense<0.000000e+00> : vector<2xf32>
    %1297 = vector.multi_reduction <add>, %1296, %cst_303 [1] : vector<2x16xf32> to vector<2xf32>
    %1298 = vector.shape_cast %1297 : vector<2xf32> to vector<2x1xf32>
    %cst_304 = arith.constant 9.99999993E-9 : f32
    %1299 = vector.broadcast %cst_304 : f32 to vector<2x1xf32>
    %1300 = arith.addf %1298, %1299 : vector<2x1xf32>
    %1301 = math.rsqrt %1300 : vector<2x1xf32>
    %1302 = vector.broadcast %1301 : vector<2x1xf32> to vector<2x16xf32>
    %1303 = arith.mulf %1274, %1302 : vector<2x16xf32>
    %cst_305 = arith.constant dense<0.000000e+00> : vector<2x32xf32>
    %1304 = tpu.matmul %1303, %1272, %cst_305 {dimension_numbers = #tpu.dot_dimension_numbers<[1], [1], [0], [0], [0, 0, 1, 0], [], []>} : vector<2x16xf32>, vector<32x16xf32>, vector<2x32xf32> -> vector<2x32xf32>
    %1305 = vector.broadcast %1289 : vector<2x1xf32> to vector<2x32xf32>
    %1306 = arith.mulf %1305, %1304 : vector<2x32xf32>
    %cst_306 = arith.constant dense<0xFF800000> : vector<2xf32>
    %1307 = vector.multi_reduction <maximumf>, %1306, %cst_306 [1] : vector<2x32xf32> to vector<2xf32>
    %1308 = vector.shape_cast %1307 : vector<2xf32> to vector<2x1xf32>
    %1309 = vector.broadcast %1308 : vector<2x1xf32> to vector<2x32xf32>
    %1310 = arith.subf %1306, %1309 : vector<2x32xf32>
    %1311 = math.exp %1310 : vector<2x32xf32>
    %cst_307 = arith.constant dense<0.000000e+00> : vector<2xf32>
    %1312 = vector.multi_reduction <add>, %1311, %cst_307 [1] : vector<2x32xf32> to vector<2xf32>
    %1313 = vector.shape_cast %1312 : vector<2xf32> to vector<2x1xf32>
    %1314 = vector.broadcast %1313 : vector<2x1xf32> to vector<2x32xf32>
    %1315 = arith.divf %1311, %1314 : vector<2x32xf32>
    %1316 = vector.broadcast %1295 : vector<2x1xf32> to vector<2x32xf32>
    %1317 = arith.mulf %1316, %1315 : vector<2x32xf32>
    %cst_308 = arith.constant 1.000000e+00 : f32
    %1318 = vector.broadcast %cst_308 : f32 to vector<2x1xf32>
    %1319 = arith.subf %1318, %1295 : vector<2x1xf32>
    %1320 = vector.broadcast %1319 : vector<2x1xf32> to vector<2x32xf32>
    %1321 = arith.mulf %1320, %1148 : vector<2x32xf32>
    %1322 = arith.addf %1317, %1321 : vector<2x32xf32>
    %1323 = vector.extract_strided_slice %1263 {offsets = [0, 0], sizes = [2, 16], strides = [1, 1]} : vector<2x18xf32> to vector<2x16xf32>
    %1324 = math.tanh %1323 : vector<2x16xf32>
    %1325 = vector.extract_strided_slice %1263 {offsets = [0, 16], sizes = [2, 1], strides = [1, 1]} : vector<2x18xf32> to vector<2x1xf32>
    %cst_309 = arith.constant 0.000000e+00 : f32
    %1326 = vector.broadcast %cst_309 : f32 to vector<2x1xf32>
    %1327 = arith.maximumf %1325, %1326 : vector<2x1xf32>
    %1328 = vector.broadcast %cst_309 : f32 to vector<2x1xf32>
    %1329 = arith.subf %1325, %1328 : vector<2x1xf32>
    %1330 = arith.cmpf one, %1329, %1329 : vector<2x1xf32>
    %1331 = vector.broadcast %cst_309 : f32 to vector<2x1xf32>
    %1332 = arith.addf %1325, %1331 : vector<2x1xf32>
    %1333 = math.absf %1329 : vector<2x1xf32>
    %cst_310 = arith.constant 0.000000e+00 : f32
    %1334 = vector.broadcast %cst_310 : f32 to vector<2x1xf32>
    %1335 = arith.subf %1334, %1333 : vector<2x1xf32>
    %1336 = math.exp %1335 : vector<2x1xf32>
    %1337 = math.log1p %1336 : vector<2x1xf32>
    %1338 = arith.addf %1327, %1337 : vector<2x1xf32>
    %1339 = arith.select %1330, %1332, %1338 : vector<2x1xi1>, vector<2x1xf32>
    %1340 = vector.extract_strided_slice %1263 {offsets = [0, 17], sizes = [2, 1], strides = [1, 1]} : vector<2x18xf32> to vector<2x1xf32>
    %1341 = arith.negf %1340 : vector<2x1xf32>
    %1342 = math.exp %1341 : vector<2x1xf32>
    %cst_311 = arith.constant 1.000000e+00 : f32
    %1343 = vector.broadcast %cst_311 : f32 to vector<2x1xf32>
    %1344 = arith.addf %1343, %1342 : vector<2x1xf32>
    %1345 = arith.divf %1343, %1344 : vector<2x1xf32>
    %1346 = arith.mulf %1324, %1324 : vector<2x16xf32>
    %cst_312 = arith.constant dense<0.000000e+00> : vector<2xf32>
    %1347 = vector.multi_reduction <add>, %1346, %cst_312 [1] : vector<2x16xf32> to vector<2xf32>
    %1348 = vector.shape_cast %1347 : vector<2xf32> to vector<2x1xf32>
    %cst_313 = arith.constant 9.99999993E-9 : f32
    %1349 = vector.broadcast %cst_313 : f32 to vector<2x1xf32>
    %1350 = arith.addf %1348, %1349 : vector<2x1xf32>
    %1351 = math.rsqrt %1350 : vector<2x1xf32>
    %1352 = vector.broadcast %1351 : vector<2x1xf32> to vector<2x16xf32>
    %1353 = arith.mulf %1324, %1352 : vector<2x16xf32>
    %cst_314 = arith.constant dense<0.000000e+00> : vector<2x32xf32>
    %1354 = tpu.matmul %1353, %1272, %cst_314 {dimension_numbers = #tpu.dot_dimension_numbers<[1], [1], [0], [0], [0, 0, 1, 0], [], []>} : vector<2x16xf32>, vector<32x16xf32>, vector<2x32xf32> -> vector<2x32xf32>
    %1355 = vector.broadcast %1339 : vector<2x1xf32> to vector<2x32xf32>
    %1356 = arith.mulf %1355, %1354 : vector<2x32xf32>
    %cst_315 = arith.constant dense<0xFF800000> : vector<2xf32>
    %1357 = vector.multi_reduction <maximumf>, %1356, %cst_315 [1] : vector<2x32xf32> to vector<2xf32>
    %1358 = vector.shape_cast %1357 : vector<2xf32> to vector<2x1xf32>
    %1359 = vector.broadcast %1358 : vector<2x1xf32> to vector<2x32xf32>
    %1360 = arith.subf %1356, %1359 : vector<2x32xf32>
    %1361 = math.exp %1360 : vector<2x32xf32>
    %cst_316 = arith.constant dense<0.000000e+00> : vector<2xf32>
    %1362 = vector.multi_reduction <add>, %1361, %cst_316 [1] : vector<2x32xf32> to vector<2xf32>
    %1363 = vector.shape_cast %1362 : vector<2xf32> to vector<2x1xf32>
    %1364 = vector.broadcast %1363 : vector<2x1xf32> to vector<2x32xf32>
    %1365 = arith.divf %1361, %1364 : vector<2x32xf32>
    %1366 = vector.broadcast %1345 : vector<2x1xf32> to vector<2x32xf32>
    %1367 = arith.mulf %1366, %1365 : vector<2x32xf32>
    %cst_317 = arith.constant 1.000000e+00 : f32
    %1368 = vector.broadcast %cst_317 : f32 to vector<2x1xf32>
    %1369 = arith.subf %1368, %1345 : vector<2x1xf32>
    %1370 = vector.broadcast %1369 : vector<2x1xf32> to vector<2x32xf32>
    %1371 = arith.mulf %1370, %1198 : vector<2x32xf32>
    %1372 = arith.addf %1367, %1371 : vector<2x32xf32>
    %cst_318 = arith.constant dense<0.000000e+00> : vector<16xf32>
    %1373 = vector.multi_reduction <add>, %1248, %cst_318 [0] : vector<32x16xf32> to vector<16xf32>
    %1374 = vector.shape_cast %1373 : vector<16xf32> to vector<1x16xf32>
    %cst_319 = arith.constant 3.200000e+01 : f32
    %1375 = vector.broadcast %cst_319 : f32 to vector<1x16xf32>
    %1376 = arith.divf %1374, %1375 : vector<1x16xf32>
    %1377 = vector.broadcast %1376 : vector<1x16xf32> to vector<32x16xf32>
    %1378 = arith.subf %1248, %1377 : vector<32x16xf32>
    %1379 = arith.mulf %1378, %1378 : vector<32x16xf32>
    %cst_320 = arith.constant dense<0.000000e+00> : vector<16xf32>
    %1380 = vector.multi_reduction <add>, %1379, %cst_320 [0] : vector<32x16xf32> to vector<16xf32>
    %1381 = vector.shape_cast %1380 : vector<16xf32> to vector<1x16xf32>
    %cst_321 = arith.constant 3.200000e+01 : f32
    %1382 = vector.broadcast %cst_321 : f32 to vector<1x16xf32>
    %1383 = arith.divf %1381, %1382 : vector<1x16xf32>
    %1384 = vector.broadcast %1376 : vector<1x16xf32> to vector<32x16xf32>
    %1385 = arith.subf %1248, %1384 : vector<32x16xf32>
    %cst_322 = arith.constant 9.99999974E-6 : f32
    %1386 = vector.broadcast %cst_322 : f32 to vector<1x16xf32>
    %1387 = arith.addf %1383, %1386 : vector<1x16xf32>
    %1388 = math.rsqrt %1387 : vector<1x16xf32>
    %1389 = vector.broadcast %1388 : vector<1x16xf32> to vector<32x16xf32>
    %1390 = arith.mulf %1385, %1389 : vector<32x16xf32>
    %1391 = vector.broadcast %6 : vector<1x16xf32> to vector<32x16xf32>
    %1392 = arith.mulf %1390, %1391 : vector<32x16xf32>
    %1393 = vector.broadcast %7 : vector<1x16xf32> to vector<32x16xf32>
    %1394 = arith.addf %1392, %1393 : vector<32x16xf32>
    %1395 = arith.negf %1264 : vector<2x16xf32>
    %1396 = math.exp %1395 : vector<2x16xf32>
    %cst_323 = arith.constant 1.000000e+00 : f32
    %1397 = vector.broadcast %cst_323 : f32 to vector<2x16xf32>
    %1398 = arith.addf %1397, %1396 : vector<2x16xf32>
    %1399 = arith.divf %1397, %1398 : vector<2x16xf32>
    %1400 = arith.index_cast %c7_i32 : i32 to index
    %c0_324 = arith.constant 0 : index
    %c0_325 = arith.constant 0 : index
    %1401 = vector.load %arg13[%1400, %c0_324, %c0_325] : memref<8x2x16xf32, #tpu.memory_space<vmem>>, vector<1x2x16xf32>
    %1402 = vector.shape_cast %1401 : vector<1x2x16xf32> to vector<2x16xf32>
    %1403 = vector.shape_cast %1399 : vector<2x16xf32> to vector<1x2x16xf32>
    tpu.vector_store %arg13[%1400, %c0_324, %c0_325], %1403 {strides = array<i32>} : memref<8x2x16xf32, #tpu.memory_space<vmem>>, vector<1x2x16xf32>,
    %c8_i32 = arith.constant 8 : i32
    return
  }
}

</mosaic_0001>

<bundles_post_ra>
// kernel: tpu_custom_call.1
= control target key start
LH: loop header
LB: loop body
LE: loop exit
PB: predicated region body
PF: predicated region fallthrough
CT: control target
= control target key end

     0   :  { %18 = vsyncpa [#allocation3], 0  ;;  %s9589_s0 = inlined_call_operand.hbm [shape: f32[8,2,16], index: 0, kind: input, shape index: {}]   ;;  %s9590_s1 = inlined_call_operand.vmem [shape: f32[32,16], index: 1, kind: input, shape index: {}]   ;;  %s9591_s2 = inlined_call_operand.vmem [shape: f32[2,32], index: 2, kind: input, shape index: {}]   ;;  %s9592_s3 = inlined_call_operand.hbm [shape: f32[2,32], index: 3, kind: input, shape index: {}]   ;;  %s9593_s4 = inlined_call_operand.hbm [shape: f32[2,32], index: 4, kind: input, shape index: {}]   ;;  %s9594_s5 = inlined_call_operand.vmem [shape: f32[32,32], index: 5, kind: input, shape index: {}]   ;;  %s9595_s6 = inlined_call_operand.vmem [shape: f32[1,32], index: 6, kind: input, shape index: {}]   ;;  %s9596_s7 = inlined_call_operand.vmem [shape: f32[32,32], index: 7, kind: input, shape index: {}]   ;;  %s9597_s8 = inlined_call_operand.vmem [shape: f32[1,32], index: 8, kind: input, shape index: {}]   ;;  %s9598_s9 = inlined_call_operand.hbm [shape: f32[32,52], index: 9, kind: input, shape index: {}]   ;;  %s9599_s10 = inlined_call_operand.vmem [shape: f32[1,52], index: 10, kind: input, shape index: {}]   ;;  %s9600_s11 = inlined_call_operand.vmem [shape: f32[1,16], index: 11, kind: input, shape index: {}]   ;;  %s9601_s12 = inlined_call_operand.vmem [shape: f32[1,16], index: 12, kind: input, shape index: {}]   ;;  %s9602_s13 = inlined_call_operand.hbm [shape: f32[8,2,16], index: 13, kind: output, shape index: {}]  }
   0x1   :  { %19 = vsyncpa [#allocation6], 0 }
   0x2   :  { %20 = vsyncpa [#allocation9], 0 }
   0x3   :  { %21 = vsyncpa [#allocation4], 0  ;;  %s8080_s25 = smov [#allocation5]   ;;  %s8081_s27 = smov [#allocation2]  }
   0x4   :  { %s44_s26 = sshll.u32 %s8080_s25, 4  ;;  %s27_s28 = sshll.u32 %s8081_s27, 4  ;;  %s45_s26 = int_to_ptr.vmem [resolvable:$true] %s44_s26  ;;  %s8170_s28 = int_to_ptr.vmem [resolvable:$true] %s27_s28 }
   0x5   :  { %s7962_s14 = scalar_lea.hbm %s9592_s3, 32 }
   0x6   :  { %p7963_p0 = scmp.ne.s32.totalorder %s9592_s3, %s7962_s14  ;;  %p7966_p1 = scmp.lt.u32.totalorder %s7962_s14, %s9592_s3 }
   0x8   :  { %p7968_p2 = pnand %p7966_p1, %p7963_p0 }
   0xa   :  { %7971 = shalt.err (!%p7968_p2)
}
   0xb   :  { %s7972_s19 = scalar_lea.vmem %s45_s26, 32  ;;  %p7977_p4 = scmp.lt.s32.totalorder %s45_s26, %s45_s26 }
   0xc   :  { %p7973_p3 = scmp.ne.s32.totalorder %s45_s26, %s7972_s19  ;;  %p7978_p5 = scmp.lt.s32.totalorder %s7972_s19, %s7972_s19 }
   0xe   :  { %p7979_p6 = por %p7978_p5, %p7977_p4 }
  0x10   :  { %p7980_p7 = pnand %p7979_p6, %p7973_p3 }
  0x12   :  { %7983 = shalt.err (!%p7980_p7)
}
  0x13   :  { %47 = dma.hbm_to_vmem [thread:$0]  %s9592_s3, 32, %s45_s26, [#allocation6]  }
  0x14   :  { %s7984_s24 = scalar_lea.hbm %s9589_s0, 256 }
  0x15   :  { %p7985_p8 = scmp.ne.s32.totalorder %s9589_s0, %s7984_s24  ;;  %p7988_p9 = scmp.lt.u32.totalorder %s7984_s24, %s9589_s0 }
  0x17   :  { %p7990_p10 = pnand %p7988_p9, %p7985_p8 }
  0x19   :  { %7993 = shalt.err (!%p7990_p10)
}
  0x1a   :  { %s7994_s14 = scalar_lea.vmem %s8170_s28, 256  ;;  %p7999_p12 = scmp.lt.s32.totalorder %s8170_s28, %s8170_s28 }
  0x1b   :  { %p7995_p11 = scmp.ne.s32.totalorder %s8170_s28, %s7994_s14  ;;  %p8000_p13 = scmp.lt.s32.totalorder %s7994_s14, %s7994_s14 }
  0x1d   :  { %p8001_p0 = por %p8000_p13, %p7999_p12 }
  0x1f   :  { %p8002_p1 = pnand %p8001_p0, %p7995_p11 }
  0x21   :  { %8005 = shalt.err (!%p8002_p1)
}
  0x22   :  { %s8082_s3 = smov 32   ;;  %s8083_s26 = smov 2  }
  0x23   :  { %33 = dma.hbm_to_vmem [thread:$0]  %s9589_s0, 256, %s8170_s28, [#allocation3], %s8082_s3, %s8082_s3, %s8083_s26  }
  0x24   :  { %s8084_s17 = smov [#allocation7]   ;;  %s8085_s19 = smov [#allocation8]  }
  0x25   :  { %s54_s18 = sshll.u32 %s8084_s17, 4  ;;  %s71_s20 = sshll.u32 %s8085_s19, 4  ;;  %s55_s18 = int_to_ptr.vmem [resolvable:$true] %s54_s18  ;;  %s8204_s20 = int_to_ptr.vmem [resolvable:$true] %s71_s20 }
  0x26   :  { %s8006_s23 = scalar_lea.hbm %s9593_s4, 32 }
  0x27   :  { %p8007_p2 = scmp.ne.s32.totalorder %s9593_s4, %s8006_s23  ;;  %p8010_p3 = scmp.lt.u32.totalorder %s8006_s23, %s9593_s4 }
  0x29   :  { %p8012_p4 = pnand %p8010_p3, %p8007_p2 }
  0x2b   :  { %8015 = shalt.err (!%p8012_p4)
}
  0x2c   :  { %s8016_s0 = scalar_lea.vmem %s55_s18, 32  ;;  %p8021_p6 = scmp.lt.s32.totalorder %s55_s18, %s55_s18 }
  0x2d   :  { %p8017_p5 = scmp.ne.s32.totalorder %s55_s18, %s8016_s0  ;;  %p8022_p7 = scmp.lt.s32.totalorder %s8016_s0, %s8016_s0 }
  0x2f   :  { %p8023_p8 = por %p8022_p7, %p8021_p6 }
  0x31   :  { %p8024_p9 = pnand %p8023_p8, %p8017_p5 }
  0x33   :  { %8027 = shalt.err (!%p8024_p9)
}
  0x34   :  { %57 = dma.hbm_to_vmem [thread:$0]  %s9593_s4, 32, %s55_s18, [#allocation6]  }
  0x35   :  { %s8028_s16 = scalar_lea.hbm %s9598_s9, 512 }
  0x36   :  { %p8029_p10 = scmp.ne.s32.totalorder %s9598_s9, %s8028_s16  ;;  %p8032_p11 = scmp.lt.u32.totalorder %s8028_s16, %s9598_s9 }
  0x38   :  { %p8034_p12 = pnand %p8032_p11, %p8029_p10 }
  0x3a   :  { %8037 = shalt.err (!%p8034_p12)
}
  0x3b   :  { %s8038_s23 = scalar_lea.vmem %s8204_s20, 512  ;;  %p8043_p0 = scmp.lt.s32.totalorder %s8204_s20, %s8204_s20 }
  0x3c   :  { %p8039_p13 = scmp.ne.s32.totalorder %s8204_s20, %s8038_s23  ;;  %p8044_p1 = scmp.lt.s32.totalorder %s8038_s23, %s8038_s23 }
  0x3e   :  { %p8045_p2 = por %p8044_p1, %p8043_p0 }
  0x40   :  { %p8046_p3 = pnand %p8045_p2, %p8039_p13 }
  0x42   :  { %8049 = shalt.err (!%p8046_p3)
}
  0x43   :  { %s8086_s4 = smov 128   ;;  %s8087_s18 = smov 8  }
  0x44   :  { %77 = dma.hbm_to_vmem [thread:$0]  %s9598_s9, 512, %s8204_s20, [#allocation9], %s8086_s4, %s8086_s4, %s8087_s18  }
  0x45   :  { %8072 = dma.done.wait [#allocation3], 256  }
  0x46   :  { %8073 = vsyncadd [#allocation3], 4294967040 }
  0x47   :  { %8074 = dma.done.wait [#allocation6], 64  }
  0x48   :  { %8075 = vsyncadd [#allocation6], 4294967232 }
  0x49   :  { %8076 = dma.done.wait [#allocation9], 512  }
  0x4a   :  { %8077 = vsyncadd [#allocation9], 4294966784  ;;  %v8088_v0 = vmov 0.0|0.0   ;;  %vm8089_vm0 = vmmov 0   ;;  %v8090_v1 = vmov 0.0   ;;  %v101_v2 = vld [vmem:[%s9596_s7] sm:$0xff] }
  0x4b   :  { %7313 = vmatprep.subr.bf16.mxu0 %v8088_v0  ;;  %6751 = vmatprep.mubr.msk.f32.mxu0 %vm8089_vm0, %v8090_v1  ;;  %v102_v3 = vld [vmem:[%s9596_s7 + $0x8] sm:$0xff]  ;;  %v103_v4 = vld [vmem:[%s9596_s7 + $0x10] sm:$0xff]  ;;  %v104_v6 = vld [vmem:[%s9596_s7 + $0x18] sm:$0xff]  ;;  %vm126_vm1 = vcmask 261120   ;;  %vm241_vm2 = vcmask 15360   ;;  %vm207_vm3 = vcmask 130048  }
  0x4c   :  { %7319 = vmatprep.subr.bf16.mxu1 %v8088_v0  ;;  %6770 = vmatprep.mubr.msk.f32.mxu1 %vm8089_vm0, %v8090_v1  ;;  %v8250_v5 = vpack.c.bf16 %v102_v3, %v101_v2  ;;  %v8255_v7 = vld [vmem:[#allocation5] sm:$0x3]  ;;  %v8259_v8 = vpack.c.bf16 %v104_v6, %v103_v4  ;;  %v119_v9 = vld [vmem:[#allocation7] sm:$0x3]  ;;  %v8268_v11 = vld [vmem:[%s9597_s8] ss:$0 sm:$0xff] }
  0x4d   :  { %209 = vxpose.xlu0.b32.start.end [1/1] (short) (narrow) %v8255_v7, 32  ;;  %vm254_vm4 = vcmask 1041408   ;;  %s8091_s16 = smov 112   ;;  %v114_v30 = vld [vmem:[%s9590_s1 + $0x8] sm:$0xff]  ;;  %v113_v31 = vld [vmem:[%s9590_s1] sm:$0xff]  ;;  %v115_v41 = vld [vmem:[%s9590_s1 + $0x10] sm:$0xff] }
  0x4e   :  { %7315 = vmatpush3.bf16.msra.mxu0 %v8250_v5  ;;  %v116_v43 = vld [vmem:[%s9590_s1 + $0x18] sm:$0xff]  ;;  %v8315_v52 = vld [vmem:[%s9591_s2] sm:$0x3]  ;;  %v97_v54 = vld [vmem:[%s9594_s5 + $0x8] sm:$0xff]  ;;  %s8092_s14 = smov 16   ;;  %vm663_vm6 = vcmask 123904  }
  0x4f   :  { %7316 = vmatprep.subr.bf16.mxu0 %v8088_v0  ;;  %v96_v53 = vld [vmem:[%s9594_s5] sm:$0xff]  ;;  %v98_v55 = vld [vmem:[%s9594_s5 + $0x10] sm:$0xff]  ;;  %v99_v57 = vld [vmem:[%s9594_s5 + $0x18] sm:$0xff]  ;;  %s8094_s19 = smov 110   ;;  %vm761_vm9 = vcmask 254976  }
  0x50   :  { %v8331_v56 = vpack.c.bf16 %v97_v54, %v96_v53  ;;  %v8337_v58 = vpack.c.bf16 %v99_v57, %v98_v55  ;;  %v106_v6 = vld [vmem:[#allocation8] sm:$0xff]  ;;  %vm8368_vm5 = vmpackc.low %vm207_vm3, %vm207_vm3 }
  0x52   :  { %7318 = vmatpush3.bf16.msra.mxu0 %v8259_v8 }
  0x55   :  { %6752 = vmatmul.mubr.msk.f32.vlgmr.msra.gmra.mrb[0].mxu0 %vm126_vm1, %v119_v9  ;;  %v107_v9 = vld [vmem:[#allocation8 + $0x8] sm:$0xff] }
  0xcd   :  { %v225_v10 = vpop.trf.xlu0 }
  0xce   :  { %6756 = vmatprep.mubr.msk.f32.mxu0 %vm241_vm2, %v225_v10  ;;  %v108_v10 = vld [vmem:[#allocation8 + $0x10] sm:$0xff] }
  0xd1   :  { %v226_v18 = vpop.trf.xlu0 }
  0xd5   :  { %v227_v20 = vpop.trf.xlu0 }
  0xd9   :  { %v228_v23 = vpop.trf.xlu0 }
 0x128   :  { %v196_v12 = vpop.f32.mrb[0].mxu0 }
 0x129   :  { %v197_v13 = vadd.f32 %v8268_v11, %v196_v12  ;;  %v6753_v14 = vpop.f32.mrb[1].mxu0  ;;  %v8352_v12 = vpack.c.bf16 %v107_v9, %v106_v6 }
 0x12b   :  { %v6312_v15 = vmul.f32 -1.442695, %v197_v13 }
 0x12d   :  { %7671 = vpow2.f32 %v6312_v15  ;;  %v444_v15 = vld [vmem:[#allocation2] sm:$0x3] }
 0x12e   :  { %7673 = vtanh.f32 %v197_v13  ;;  %v109_v13 = vld [vmem:[#allocation8 + $0x18] sm:$0xff] }
 0x12f   :  { %v8355_v14 = vpack.c.bf16 %v109_v13, %v108_v10 }
 0x137   :  { %v7672_v16 = vpop.eup %7671 }
 0x138   :  { %v203_v17 = vadd.f32 1.0, %v7672_v16  ;;  %v7674_v19 = vpop.eup %7673 }
 0x13a   :  { %7675 = vrcp.f32 %v203_v17 }
 0x144   :  { %v7676_v21 = vpop.eup %7675 }
 0x145   :  { %v208_v22 = vsel %vm207_vm3, %v7676_v21, %v7674_v19 }
 0x146   :  { %6754 = vmatprep.subr.msk.mxu0 %vm254_vm4, %v208_v22 }
 0x147   :  { %6755 = vmatpush3.msk.msra.mxu0 %vm254_vm4, %v208_v22 }
 0x148   :  { %6757 = vmatmul.mubr.msk.f32.vlgmr.msra.gmra.mrb[2].mxu0 %vm241_vm2, %v226_v18  ;;  %7325 = vmatprep.subr.bf16.mxu0 %v8088_v0 }
 0x149   :  { %6759 = vmatprep.mubr.msk.f32.mxu0 %vm241_vm2, %v227_v20  ;;  %7327 = vmatpush3.bf16.msra.mxu0 %v8331_v56 }
 0x14a   :  { %7328 = vmatprep.subr.bf16.mxu0 %v8088_v0 }
 0x14c   :  { %6760 = vmatmul.mubr.msk.f32.gmra.mrb[4].mxu0 %vm241_vm2, %v228_v23 }
 0x14d   :  { %6781 = vmatprep.mubr.msk.f32.mxu0 %vm8089_vm0, %v8090_v1  ;;  %7330 = vmatpush3.bf16.msra.mxu0 %v8337_v58 }
 0x14e   :  { %7337 = vmatprep.subr.bf16.mxu0 %v8088_v0 }
 0x21b   :  { %v6758_v24 = vpop.f32.mrb[2].mxu0 }
 0x21c   :  { %357 = vrot.lane.b32.xlu1 %v6758_v24, %s8091_s16  ;;  %v324_v25 = vpop.f32.mrb[3].mxu0  ;;  %v344_v28 = vsub.f32 1.0, %v6758_v24 }
 0x21d   :  { %355 = vrot.lane.b32.xlu0 %v324_v25, %s8091_s16  ;;  %v343_v29 = vsub.f32 1.0, %v324_v25 }
 0x21e   :  { %v348_v32 = vmul.f32 %v344_v28, %v114_v30 }
 0x21f   :  { %v6761_v26 = vpop.f32.mrb[4].mxu0  ;;  %v347_v34 = vmul.f32 %v343_v29, %v113_v31 }
 0x220   :  { %v334_v27 = vpop.f32.mrb[5].mxu0  ;;  %v346_v38 = vsub.f32 1.0, %v6761_v26 }
 0x221   :  { %359 = vrot.lane.b32.xlu1 %v334_v27, %s8091_s16  ;;  %v345_v39 = vsub.f32 1.0, %v334_v27 }
 0x222   :  { %v350_v45 = vmul.f32 %v346_v38, %v116_v43 }
 0x223   :  { %v349_v44 = vmul.f32 %v345_v39, %v115_v41  ;;  %v8383_v39 = vld [vmem:[%s9595_s6] ss:$0 sm:$0xff] }
 0x225   :  { %361 = vrot.lane.b32.xlu1 %v6761_v26, %s8091_s16 }
 0x28e   :  { %v358_v33 = vpop.permute.xlu1 %357 }
 0x28f   :  { %v8290_v35 = vadd.f32 %v358_v33, %v348_v32  ;;  %v356_v36 = vpop.permute.xlu0 %355 }
 0x290   :  { %v8292_v37 = vadd.f32 %v356_v36, %v347_v34 }
 0x291   :  { %v610_v63 = vmul.f32 %v8290_v35, %v8290_v35 }
 0x292   :  { %v7320_v40 = vpack.c.bf16 %v8290_v35, %v8292_v37  ;;  %v609_v61 = vmul.f32 %v8292_v37, %v8292_v37 }
 0x293   :  { %v360_v42 = vpop.permute.xlu1 %359  ;;  %v616_v2 = vsel %vm207_vm3, %v610_v63, 0.0 }
 0x294   :  { %7321 = vmatpush3.bf16.msra.mxu1 %v7320_v40  ;;  %v8303_v47 = vadd.f32 %v360_v42, %v349_v44  ;;  %v613_v62 = vsel %vm207_vm3, %v609_v61, 0.0  ;;  %v8093_v44 = vmov 16  }
 0x295   :  { %7322 = vmatprep.subr.bf16.mxu1 %v8088_v0  ;;  %7637 = vset.pattern.permute.xlu1 %v8093_v44 }
 0x296   :  { %v611_v3 = vmul.f32 %v8303_v47, %v8303_v47 }
 0x297   :  { %v362_v46 = vpop.permute.xlu1 %361 }
 0x298   :  { %v8305_v48 = vadd.f32 %v362_v46, %v350_v45  ;;  %v619_v4 = vsel %vm207_vm3, %v611_v3, 0.0  ;;  %v8403_v45 = vld [vmem:[%s9599_s10] ss:$0 sm:$0xff] }
 0x29a   :  { %v7323_v49 = vpack.c.bf16 %v8305_v48, %v8303_v47  ;;  %v612_v50 = vmul.f32 %v8305_v48, %v8305_v48 }
 0x29c   :  { %7324 = vmatpush3.bf16.msra.mxu1 %v7323_v49  ;;  %v622_v51 = vsel %vm207_vm3, %v612_v50, 0.0 }
 0x29d   :  { %623 = vadd.xlane.f32.xlu0 %v622_v51  ;;  %7331 = vmatprep.subr.bf16.mxu1 %v8088_v0 }
 0x29f   :  { %6771 = vmatmul.mubr.msk.f32.vlgmr.msra.gmra.mrb[0].mxu1 %vm126_vm1, %v8315_v52 }
 0x2a0   :  { %6792 = vmatprep.mubr.msk.f32.mxu1 %vm8089_vm0, %v8090_v1  ;;  %7333 = vmatpush3.bf16.msra.mxu1 %v8352_v12 }
 0x2a1   :  { %7334 = vmatprep.subr.bf16.mxu1 %v8088_v0 }
 0x2a4   :  { %7336 = vmatpush3.bf16.msra.mxu1 %v8355_v14 }
 0x2a5   :  { %7345 = vmatprep.subr.bf16.mxu1 %v8088_v0 }
 0x32a   :  { %v624_v22 = vpop.xlane.xlu0 %623 }
 0x32b   :  { %v628_v24 = vadd.f32 1e-08, %v624_v22 }
 0x372   :  { %v440_v59 = vpop.f32.mrb[0].mxu1 }
 0x373   :  { %446 = vrot.lane.b32.xlu1 %v440_v59, %s8092_s14  ;;  %v6772_v60 = vpop.f32.mrb[1].mxu1 }
 0x397   :  { %614 = vadd.xlane.f32.xlu1 %v613_v62 }
 0x39b   :  { %617 = vadd.xlane.f32.xlu1 %v616_v2 }
 0x39f   :  { %620 = vadd.xlane.f32.xlu1 %v619_v4 }
 0x3e5   :  { %v447_v16 = vpop.permute.xlu1 %446 }
 0x3e6   :  { %v449_v17 = vsel %vm207_vm3, %v444_v15, %v447_v16  ;;  %v8095_v16 = vmov 17  }
 0x3e7   :  { %6782 = vmatmul.mubr.msk.f32.vlgmr.msra.gmra.mrb[6].mxu0 %vm126_vm1, %v449_v17 }
 0x3e8   :  { %6803 = vmatprep.mubr.msk.f32.mxu0 %vm8089_vm0, %v8090_v1 }
 0x424   :  { %v615_v18 = vpop.xlane.xlu1 %614 }
 0x425   :  { %v625_v19 = vadd.f32 1e-08, %v615_v18 }
 0x427   :  { %7677 = vrsqrt.f32 %v625_v19 }
 0x428   :  { %v618_v20 = vpop.xlane.xlu1 %617 }
 0x429   :  { %v626_v21 = vadd.f32 1e-08, %v618_v20 }
 0x42b   :  { %7679 = vrsqrt.f32 %v626_v21 }
 0x42c   :  { %v621_v23 = vpop.xlane.xlu1 %620 }
 0x42d   :  { %v627_v25 = vadd.f32 1e-08, %v621_v23 }
 0x42f   :  { %7681 = vrsqrt.f32 %v627_v25 }
 0x430   :  { %7683 = vrsqrt.f32 %v628_v24 }
 0x431   :  { %v7678_v26 = vpop.eup %7677 }
 0x432   :  { %v633_v28 = vmul.f32 %v7678_v26, %v8292_v37 }
 0x435   :  { %v7680_v27 = vpop.eup %7679 }
 0x436   :  { %v634_v29 = vmul.f32 %v7680_v27, %v8290_v35 }
 0x438   :  { %v7338_v31 = vpack.c.bf16 %v634_v29, %v633_v28 }
 0x439   :  { %v7682_v32 = vpop.eup %7681 }
 0x43a   :  { %7340 = vmatpush3.bf16.xpose.msk.msra.mxu0 %vm8368_vm5, %v7338_v31  ;;  %v7684_v33 = vpop.eup %7683  ;;  %v635_v34 = vmul.f32 %v7682_v32, %v8303_v47 }
 0x43b   :  { %7341 = vmatprep.subr.bf16.mxu0 %v8088_v0  ;;  %v636_v36 = vmul.f32 %v7684_v33, %v8305_v48 }
 0x43d   :  { %v7342_v38 = vpack.c.bf16 %v636_v36, %v635_v34 }
 0x442   :  { %7344 = vmatpush3.bf16.xpose.msk.msra.mxu0 %vm8368_vm5, %v7342_v38 }
 0x443   :  { %7353 = vmatprep.subr.bf16.mxu0 %v8088_v0 }
 0x4ba   :  { %v525_v40 = vpop.f32.mrb[6].mxu0 }
 0x4bb   :  { %v8386_v41 = vadd.f32 %v8383_v39, %v525_v40  ;;  %v6783_v42 = vpop.f32.mrb[7].mxu0 }
 0x4bd   :  { %v529_v43 = vmax.f32 %v8386_v41, 0.0 }
 0x4bf   :  { %6793 = vmatmul.mubr.msk.f32.vlgmr.msra.gmra.mrb[2].mxu1 %vm126_vm1, %v529_v43 }
 0x4c0   :  { %7348 = vmatpush3.bf16.xpose.msk.msra.mxu1 %vm8368_vm5, %v7338_v31  ;;  %6814 = vmatprep.mubr.msk.f32.mxu1 %vm8089_vm0, %v8090_v1 }
 0x4c1   :  { %7349 = vmatprep.subr.bf16.mxu1 %v8088_v0 }
 0x4c8   :  { %7352 = vmatpush3.bf16.xpose.msk.msra.mxu1 %vm8368_vm5, %v7342_v38 }
 0x592   :  { %v605_v46 = vpop.f32.mrb[2].mxu1 }
 0x593   :  { %v606_v49 = vadd.f32 %v8403_v45, %v605_v46  ;;  %v6794_v50 = vpop.f32.mrb[3].mxu1 }
 0x595   :  { %7685 = vtanh.f32 %v606_v49  ;;  %v641_v51 = vand.u32 2147483647, %v606_v49  ;;  %v638_v9 = vmax.f32 %v606_v49, 0.0  ;;  %vm639_vm8 = vcmp.ne.f32.partialorder %v606_v49, %v606_v49 }
 0x596   :  { %v6323_v17 = vmul.f32 -1.442695, %v606_v49 }
 0x597   :  { %v642_v53 = vsub.f32 0.0, %v641_v51 }
 0x599   :  { %v643_v54 = vmul.f32 1.442695, %v642_v53  ;;  %v8096_v53 = vmov 34  }
 0x59a   :  { %7639 = vset.pattern.permute.xlu0 %v8096_v53 }
 0x59b   :  { %7687 = vpow2.f32 %v643_v54 }
 0x59f   :  { %v8406_v55 = vpop.eup %7685 }
 0x5a0   :  { %v662_v57 = vmul.f32 %v8406_v55, %v8406_v55 }
 0x5a2   :  { %v664_v59 = vsel %vm663_vm6, %v662_v57, 0.0 }
 0x5a3   :  { %665 = vadd.xlane.f32.xlu1 %v664_v59 }
 0x5a5   :  { %v7688_v60 = vpop.eup %7687 }
 0x5a6   :  { %v645_v61 = vadd.f32 1.0, %v7688_v60  ;;  %v648_v62 = vmul.f32 -0.5, %v7688_v60  ;;  %v651_v2 = vand.u32 2147483647, %v7688_v60 }
 0x5a8   :  { %7689 = vlog2.f32 %v645_v61  ;;  %v649_v63 = vadd.f32 1.0, %v648_v62  ;;  %vm652_vm7 = vcmp.lt.f32.partialorder %v651_v2, 0.0004427343  ;;  %v8097_v2 = vmov 35  }
 0x5a9   :  { %7691 = vpow2.f32 %v6323_v17 }
 0x5aa   :  { %v650_v6 = vmul.f32 %v7688_v60, %v649_v63 }
 0x5b2   :  { %v7690_v3 = vpop.eup %7689 }
 0x5b3   :  { %v647_v4 = vmul.f32 0.6931472, %v7690_v3  ;;  %v7692_v21 = vpop.eup %7691 }
 0x5b4   :  { %788 = vrot.lane.b32.xlu1 %v662_v57, %s8094_s19  ;;  %v659_v23 = vadd.f32 1.0, %v7692_v21 }
 0x5b5   :  { %v653_v10 = vsel %vm652_vm7, %v650_v6, %v647_v4 }
 0x5b6   :  { %v654_v13 = vadd.f32 %v653_v10, %v638_v9 }
 0x5b8   :  { %v8412_v15 = vsel %vm639_vm8, %v606_v49, %v654_v13 }
 0x5b9   :  { %757 = vperm.xlu1 %7637, %v8412_v15  }
 0x5bd   :  { %7638 = vset.pattern.permute.xlu1 %v8095_v16 }
 0x630   :  { %v666_v18 = vpop.xlane.xlu1 %665 }
 0x631   :  { %v667_v19 = vadd.f32 1e-08, %v666_v18 }
 0x633   :  { %7693 = vrsqrt.f32 %v667_v19 }
 0x634   :  { %v789_v20 = vpop.permute.xlu1 %788  ;;  %7695 = vrcp.f32 %v659_v23 }
 0x635   :  { %v791_v22 = vsel %vm663_vm6, %v789_v20, 0.0 }
 0x636   :  { %792 = vadd.xlane.f32.xlu1 %v791_v22 }
 0x638   :  { %v758_v28 = vpop.permute.xlu1 %757 }
 0x63d   :  { %v7694_v24 = vpop.eup %7693 }
 0x63e   :  { %v669_v25 = vmul.f32 %v7694_v24, %v8406_v55  ;;  %v8424_v26 = vpop.eup %7695 }
 0x63f   :  { %v779_v27 = vsub.f32 1.0, %v8424_v26 }
 0x640   :  { %6804 = vmatmul.mubr.msk.f32.vlgmr.msra.gmra.mrb[8].mxu0 %vm207_vm3, %v669_v25 }
 0x641   :  { %7355 = vmatpush3.bf16.msra.mxu0 %v8250_v5  ;;  %6825 = vmatprep.mubr.msk.f32.mxu0 %vm8089_vm0, %v8090_v1 }
 0x642   :  { %7356 = vmatprep.subr.bf16.mxu0 %v8088_v0 }
 0x645   :  { %7358 = vmatpush3.bf16.msra.mxu0 %v8259_v8 }
 0x646   :  { %7365 = vmatprep.subr.bf16.mxu0 %v8088_v0 }
 0x647   :  { %775 = vperm.xlu1 %7638, %v8424_v26  }
 0x648   :  { %6826 = vmatmul.mubr.msk.f32.vlgmr.msra.gmra.mrb[10].mxu0 %vm126_vm1, %v529_v43 }
 0x649   :  { %7367 = vmatpush3.bf16.msra.mxu0 %v8331_v56  ;;  %6855 = vmatprep.mubr.msk.f32.mxu0 %vm8089_vm0, %v8090_v1 }
 0x64a   :  { %7368 = vmatprep.subr.bf16.mxu0 %v8088_v0 }
 0x64b   :  { %782 = vperm.xlu1 %7638, %v779_v27  }
 0x64d   :  { %7370 = vmatpush3.bf16.msra.mxu0 %v8337_v58 }
 0x64e   :  { %7377 = vmatprep.subr.bf16.mxu0 %v8088_v0 }
 0x6c3   :  { %v793_v34 = vpop.xlane.xlu1 %792 }
 0x6c4   :  { %v794_v36 = vadd.f32 1e-08, %v793_v34  ;;  %v900_v34 = vsel %vm207_vm3, %v8290_v35, 0.0 }
 0x6c6   :  { %7697 = vrsqrt.f32 %v794_v36  ;;  %v899_v36 = vsel %vm207_vm3, %v8292_v37, 0.0 }
 0x6c7   :  { %v776_v4 = vpop.permute.xlu1 %775 }
 0x6cb   :  { %v783_v9 = vpop.permute.xlu1 %782 }
 0x6cc   :  { %v785_v13 = vmul.f32 %v783_v9, %v8255_v7 }
 0x6d0   :  { %v7698_v43 = vpop.eup %7697 }
 0x6d1   :  { %v796_v50 = vmul.f32 %v7698_v43, %v8406_v55 }
 0x713   :  { %v751_v29 = vpop.f32.mrb[8].mxu0 }
 0x714   :  { %v760_v31 = vmul.f32 %v758_v28, %v751_v29  ;;  %v6805_v32 = vpop.f32.mrb[9].mxu0 }
 0x716   :  { %v762_v33 = vsel %vm761_vm9, %v760_v31, -inf }
 0x717   :  { %763 = vmax.xlane.f32.xlu0 %v762_v33 }
 0x71b   :  { %v1032_v38 = vpop.f32.mrb[10].mxu0 }
 0x71c   :  { %v1033_v40 = vadd.f32 %v8268_v11, %v1032_v38  ;;  %v6827_v41 = vpop.f32.mrb[11].mxu0 }
 0x71d   :  { %v901_v41 = vadd.f32 %v900_v34, %v899_v36  ;;  %v8505_v34 = vld [vmem:[%s9600_s11] ss:$0 sm:$0xff] }
 0x71e   :  { %v6337_v42 = vmul.f32 -1.442695, %v1033_v40 }
 0x720   :  { %7699 = vpow2.f32 %v6337_v42  ;;  %v904_v42 = vsel %vm207_vm3, %v8305_v48, 0.0 }
 0x721   :  { %7701 = vtanh.f32 %v1033_v40  ;;  %v902_v40 = vsel %vm207_vm3, %v8303_v47, 0.0 }
 0x722   :  { %v903_v43 = vadd.f32 %v902_v40, %v901_v41 }
 0x72a   :  { %v7700_v46 = vpop.eup %7699 }
 0x72b   :  { %v1039_v49 = vadd.f32 1.0, %v7700_v46  ;;  %v7702_v51 = vpop.eup %7701  ;;  %v905_v46 = vadd.f32 %v904_v42, %v903_v43  ;;  %v8512_v43 = vld [vmem:[%s9601_s12] ss:$0 sm:$0xff] }
 0x72d   :  { %7703 = vrcp.f32 %v1039_v49  ;;  %798 = vrot.lane.b32.xlu0 %v796_v50, %s8094_s19 }
 0x737   :  { %v7704_v54 = vpop.eup %7703 }
 0x738   :  { %v1043_v57 = vsel %vm207_vm3, %v7704_v54, %v7702_v51  ;;  %v906_v51 = vrot.slane %v905_v46, 4 }
 0x739   :  { %6828 = vmatprep.subr.msk.mxu1 %vm254_vm4, %v1043_v57 }
 0x73a   :  { %v907_v54 = vadd.f32 %v906_v51, %v905_v46 }
 0x7a4   :  { %v764_v59 = vpop.xlane.xlu0 %763 }
 0x7a5   :  { %v765_v60 = vsub.f32 %v760_v31, %v764_v59 }
 0x7a7   :  { %v766_v61 = vmul.f32 1.442695, %v765_v60 }
 0x7a8   :  { %v799_v62 = vpop.permute.xlu0 %798 }
 0x7a9   :  { %7705 = vpow2.f32 %v766_v61  ;;  %6815 = vmatmul.mubr.msk.f32.vlgmr.msra.gmra.mrb[4].mxu1 %vm207_vm3, %v799_v62 }
 0x7aa   :  { %6829 = vmatpush3.msk.msra.mxu1 %vm254_vm4, %v1043_v57  ;;  %v908_v57 = vrot.slane %v907_v54, 2 }
 0x7ab   :  { %7359 = vmatprep.subr.bf16.mxu1 %v8088_v0 }
 0x7ac   :  { %v909_v59 = vadd.f32 %v908_v57, %v907_v54 }
 0x7ae   :  { %v910_v60 = vrot.slane %v909_v59, 1 }
 0x7b0   :  { %v911_v61 = vadd.f32 %v910_v60, %v909_v59 }
 0x7b2   :  { %v913_v62 = vmul.f32 0.03125, %v911_v61 }
 0x7b3   :  { %v7706_v55 = vpop.eup %7705 }
 0x7b4   :  { %v768_v63 = vsel %vm761_vm9, %v7706_v55, 0.0 }
 0x7b5   :  { %769 = vadd.xlane.f32.xlu0 %v768_v63  ;;  %v915_v63 = vsub.f32 %v8290_v35, %v913_v62 }
 0x7cb   :  { %873 = vperm.xlu0 %7639, %v8412_v15  }
 0x7cf   :  { %7640 = vset.pattern.permute.xlu0 %v8097_v2 }
 0x842   :  { %v770_v3 = vpop.xlane.xlu0 %769 }
 0x843   :  { %7707 = vrcp.f32 %v770_v3 }
 0x84a   :  { %v874_v20 = vpop.permute.xlu0 %873 }
 0x84d   :  { %v7708_v6 = vpop.eup %7707 }
 0x84e   :  { %v772_v10 = vmul.f32 %v7708_v6, %v7706_v55  ;;  %v914_v55 = vsub.f32 %v8292_v37, %v913_v62  ;;  %v916_v6 = vsub.f32 %v8303_v47, %v913_v62 }
 0x850   :  { %v778_v17 = vmul.f32 %v776_v4, %v772_v10  ;;  %v918_v3 = vmul.f32 %v914_v55, %v914_v55  ;;  %v919_v4 = vmul.f32 %v915_v63, %v915_v63 }
 0x852   :  { %v8454_v18 = vadd.f32 %v785_v13, %v778_v17  ;;  %v922_v9 = vsel %vm207_vm3, %v918_v3, 0.0  ;;  %v923_v10 = vsel %vm207_vm3, %v919_v4, 0.0  ;;  %v917_v13 = vsub.f32 %v8305_v48, %v913_v62 }
 0x853   :  { %v920_v17 = vmul.f32 %v916_v6, %v916_v6 }
 0x854   :  { %1044 = vxpose.xlu1.b32.start.end [1/1] (short) (narrow) %v8454_v18, 32 }
 0x872   :  { %7641 = vset.pattern.permute.xlu1 %v8097_v2 }
 0x87c   :  { %v868_v19 = vpop.f32.mrb[4].mxu1 }
 0x87d   :  { %v6816_v15 = vpop.f32.mrb[5].mxu1  ;;  %v876_v21 = vmul.f32 %v874_v20, %v868_v19  ;;  %v924_v19 = vadd.f32 %v923_v10, %v922_v9  ;;  %v925_v20 = vsel %vm207_vm3, %v920_v17, 0.0 }
 0x87e   :  { %v921_v15 = vmul.f32 %v917_v13, %v917_v13 }
 0x87f   :  { %v877_v22 = vsel %vm761_vm9, %v876_v21, -inf }
 0x880   :  { %v927_v37 = vsel %vm207_vm3, %v921_v15, 0.0 }
 0x887   :  { %878 = vmax.xlane.f32.xlu1 %v877_v22 }
 0x898   :  { %894 = vperm.xlu1 %7641, %v779_v27  }
 0x89c   :  { %7642 = vset.pattern.permute.xlu1 %v8093_v44 }
 0x8d4   :  { %v1060_v7 = vpop.trf.xlu1 }
 0x8d5   :  { %6830 = vmatprep.mubr.msk.f32.mxu1 %vm241_vm2, %v1060_v7 }
 0x8d8   :  { %v1061_v23 = vpop.trf.xlu1 }
 0x8d9   :  { %6831 = vmatmul.mubr.msk.f32.vlgmr.msra.gmra.mrb[6].mxu1 %vm241_vm2, %v1061_v23 }
 0x8dc   :  { %v1062_v24 = vpop.trf.xlu1 }
 0x8dd   :  { %6833 = vmatprep.mubr.msk.f32.mxu1 %vm241_vm2, %v1062_v24 }
 0x8e0   :  { %v1063_v25 = vpop.trf.xlu1 }
 0x8e1   :  { %6834 = vmatmul.mubr.msk.f32.gmra.mrb[8].mxu1 %vm241_vm2, %v1063_v25 }
 0x8e2   :  { %6844 = vmatprep.mubr.msk.f32.mxu1 %vm8089_vm0, %v8090_v1 }
 0x914   :  { %v879_v28 = vpop.xlane.xlu1 %878 }
 0x915   :  { %v880_v29 = vsub.f32 %v876_v21, %v879_v28  ;;  %v926_v21 = vadd.f32 %v925_v20, %v924_v19 }
 0x917   :  { %v881_v27 = vmul.f32 1.442695, %v880_v29  ;;  %v928_v22 = vadd.f32 %v927_v37, %v926_v21 }
 0x918   :  { %v895_v40 = vpop.permute.xlu1 %894 }
 0x919   :  { %7709 = vpow2.f32 %v881_v27  ;;  %v929_v35 = vrot.slane %v928_v22, 4 }
 0x91b   :  { %v930_v7 = vadd.f32 %v929_v35, %v928_v22 }
 0x91d   :  { %v931_v23 = vrot.slane %v930_v7, 2 }
 0x91f   :  { %v932_v24 = vadd.f32 %v931_v23, %v930_v7 }
 0x921   :  { %v933_v47 = vrot.slane %v932_v24, 1 }
 0x923   :  { %v8468_v31 = vpop.eup %7709  ;;  %v934_v25 = vadd.f32 %v933_v47, %v932_v24 }
 0x924   :  { %v883_v32 = vsel %vm761_vm9, %v8468_v31, 0.0 }
 0x925   :  { %884 = vadd.xlane.f32.xlu0 %v883_v32  ;;  %v935_v28 = vmul.f32 0.03125, %v934_v25  ;;  %v897_v25 = vmul.f32 %v895_v40, %v8315_v52 }
 0x927   :  { %v936_v29 = vadd.f32 1e-05, %v935_v28 }
 0x929   :  { %7711 = vrsqrt.f32 %v936_v29 }
 0x933   :  { %v7712_v27 = vpop.eup %7711 }
 0x934   :  { %v939_v48 = vmul.f32 %v7712_v27, %v915_v63  ;;  %v938_v32 = vmul.f32 %v7712_v27, %v914_v55  ;;  %v940_v60 = vmul.f32 %v7712_v27, %v916_v6  ;;  %v941_v61 = vmul.f32 %v7712_v27, %v917_v13 }
 0x936   :  { %v949_v41 = vmul.f32 %v8505_v34, %v939_v48  ;;  %v948_v42 = vmul.f32 %v8505_v34, %v938_v32  ;;  %v950_v9 = vmul.f32 %v8505_v34, %v940_v60  ;;  %v951_v10 = vmul.f32 %v8505_v34, %v941_v61 }
 0x938   :  { %v959_v57 = vadd.f32 %v8512_v43, %v949_v41  ;;  %v958_v59 = vadd.f32 %v8512_v43, %v948_v42  ;;  %v960_v20 = vadd.f32 %v8512_v43, %v950_v9  ;;  %v961_v21 = vadd.f32 %v8512_v43, %v951_v10  ;;  %v1278_v41 = vld [vmem:[#allocation2 + $0x2] sm:$0x3] }
 0x93b   :  { %889 = vperm.xlu0 %7640, %v8424_v26  }
 0x9ac   :  { %v8473_v33 = vpop.f32.mrb[6].mxu1 }
 0x9ad   :  { %1190 = vrot.lane.b32.xlu1 %v8473_v33, %s8091_s16  ;;  %v1157_v38 = vpop.f32.mrb[7].mxu1  ;;  %v1177_v46 = vsub.f32 1.0, %v8473_v33 }
 0x9ae   :  { %v1176_v51 = vsub.f32 1.0, %v1157_v38 }
 0x9af   :  { %v1181_v62 = vmul.f32 %v1177_v46, %v959_v57 }
 0x9b0   :  { %v1180_v55 = vmul.f32 %v1176_v51, %v958_v59 }
 0x9b1   :  { %1188 = vrot.lane.b32.xlu1 %v1157_v38, %s8091_s16 }
 0x9b2   :  { %v885_v36 = vpop.xlane.xlu0 %884 }
 0x9b3   :  { %7713 = vrcp.f32 %v885_v36 }
 0x9b4   :  { %v8486_v49 = vpop.f32.mrb[8].mxu1 }
 0x9b5   :  { %v8488_v50 = vpop.f32.mrb[9].mxu1  ;;  %v1179_v6 = vsub.f32 1.0, %v8486_v49 }
 0x9b6   :  { %1192 = vrot.lane.b32.xlu1 %v8488_v50, %s8091_s16  ;;  %v1178_v13 = vsub.f32 1.0, %v8488_v50 }
 0x9b7   :  { %v1183_v35 = vmul.f32 %v1179_v6, %v961_v21 }
 0x9b8   :  { %v1182_v22 = vmul.f32 %v1178_v13, %v960_v20 }
 0x9ba   :  { %1194 = vrot.lane.b32.xlu1 %v8486_v49, %s8091_s16  ;;  %v890_v23 = vpop.permute.xlu0 %889 }
 0x9bd   :  { %v7714_v17 = vpop.eup %7713 }
 0x9be   :  { %v887_v37 = vmul.f32 %v7714_v17, %v8468_v31 }
 0x9c0   :  { %v892_v24 = vmul.f32 %v890_v23, %v887_v37 }
 0x9c2   :  { %v8541_v28 = vadd.f32 %v897_v25, %v892_v24 }
 0xa1f   :  { %v1191_v54 = vpop.permute.xlu1 %1190 }
 0xa20   :  { %v8517_v3 = vadd.f32 %v1191_v54, %v1181_v62 }
 0xa22   :  { %v1432_v29 = vmul.f32 %v8517_v3, %v8517_v3 }
 0xa23   :  { %v1189_v63 = vpop.permute.xlu1 %1188 }
 0xa24   :  { %v8519_v4 = vadd.f32 %v1189_v63, %v1180_v55  ;;  %v1438_v27 = vsel %vm207_vm3, %v1432_v29, 0.0 }
 0xa26   :  { %v7360_v33 = vpack.c.bf16 %v8517_v3, %v8519_v4  ;;  %v1431_v38 = vmul.f32 %v8519_v4, %v8519_v4 }
 0xa28   :  { %7361 = vmatpush3.bf16.msra.mxu1 %v7360_v33  ;;  %v1193_v19 = vpop.permute.xlu1 %1192  ;;  %v1435_v15 = vsel %vm207_vm3, %v1431_v38, 0.0 }
 0xa29   :  { %1436 = vadd.xlane.f32.xlu1 %v1435_v15  ;;  %7362 = vmatprep.subr.bf16.mxu1 %v8088_v0  ;;  %v8534_v49 = vadd.f32 %v1193_v19, %v1182_v22 }
 0xa2b   :  { %v1433_v48 = vmul.f32 %v8534_v49, %v8534_v49 }
 0xa2c   :  { %v1195_v7 = vpop.permute.xlu1 %1194 }
 0xa2d   :  { %v8536_v50 = vadd.f32 %v1195_v7, %v1183_v35  ;;  %v1441_v32 = vsel %vm207_vm3, %v1433_v48, 0.0 }
 0xa2f   :  { %v7363_v47 = vpack.c.bf16 %v8536_v50, %v8534_v49  ;;  %v1434_v36 = vmul.f32 %v8536_v50, %v8536_v50 }
 0xa31   :  { %7364 = vmatpush3.bf16.msra.mxu1 %v7363_v47  ;;  %v1444_v40 = vsel %vm207_vm3, %v1434_v36, 0.0 }
 0xa32   :  { %7371 = vmatprep.subr.bf16.mxu1 %v8088_v0 }
 0xa34   :  { %6845 = vmatmul.mubr.msk.f32.vlgmr.msra.gmra.mrb[10].mxu1 %vm126_vm1, %v8541_v28 }
 0xa35   :  { %7373 = vmatpush3.bf16.msra.mxu1 %v8352_v12  ;;  %6866 = vmatprep.mubr.msk.f32.mxu1 %vm8089_vm0, %v8090_v1 }
 0xa36   :  { %7374 = vmatprep.subr.bf16.mxu1 %v8088_v0 }
 0xa39   :  { %7376 = vmatpush3.bf16.msra.mxu1 %v8355_v14 }
 0xa3a   :  { %7385 = vmatprep.subr.bf16.mxu1 %v8088_v0 }
 0xab6   :  { %v1437_v51 = vpop.xlane.xlu1 %1436 }
 0xab7   :  { %v1447_v54 = vadd.f32 1e-08, %v1437_v51 }
 0xab9   :  { %7715 = vrsqrt.f32 %v1447_v54 }
 0xac3   :  { %v7716_v63 = vpop.eup %7715 }
 0xac4   :  { %v1455_v10 = vmul.f32 %v7716_v63, %v8519_v4 }
 0xb07   :  { %v1273_v52 = vpop.f32.mrb[10].mxu1 }
 0xb08   :  { %1280 = vrot.lane.b32.xlu0 %v1273_v52, %s8092_s14  ;;  %v6846_v31 = vpop.f32.mrb[11].mxu1 }
 0xb27   :  { %1439 = vadd.xlane.f32.xlu0 %v1438_v27 }
 0xb2b   :  { %1442 = vadd.xlane.f32.xlu0 %v1441_v32 }
 0xb2f   :  { %1445 = vadd.xlane.f32.xlu0 %v1444_v40 }
 0xb7a   :  { %v1281_v42 = vpop.permute.xlu0 %1280 }
 0xb7b   :  { %v1283_v46 = vsel %vm207_vm3, %v1278_v41, %v1281_v42 }
 0xb7c   :  { %6856 = vmatmul.mubr.msk.f32.vlgmr.msra.gmra.mrb[12].mxu0 %vm126_vm1, %v1283_v46 }
 0xb7d   :  { %6877 = vmatprep.mubr.msk.f32.mxu0 %vm8089_vm0, %v8090_v1 }
 0xbb4   :  { %v1440_v57 = vpop.xlane.xlu0 %1439 }
 0xbb5   :  { %v1448_v59 = vadd.f32 1e-08, %v1440_v57 }
 0xbb7   :  { %7717 = vrsqrt.f32 %v1448_v59 }
 0xbb8   :  { %v1443_v60 = vpop.xlane.xlu0 %1442 }
 0xbb9   :  { %v1449_v61 = vadd.f32 1e-08, %v1443_v60 }
 0xbbb   :  { %7719 = vrsqrt.f32 %v1449_v61 }
 0xbbc   :  { %v1446_v62 = vpop.xlane.xlu0 %1445 }
 0xbbd   :  { %v1450_v55 = vadd.f32 1e-08, %v1446_v62 }
 0xbbf   :  { %7721 = vrsqrt.f32 %v1450_v55 }
 0xbc1   :  { %v7718_v9 = vpop.eup %7717 }
 0xbc2   :  { %v1456_v33 = vmul.f32 %v7718_v9, %v8517_v3 }
 0xbc4   :  { %v7378_v38 = vpack.c.bf16 %v1456_v33, %v1455_v10 }
 0xbc5   :  { %v7720_v17 = vpop.eup %7719 }
 0xbc6   :  { %7380 = vmatpush3.bf16.xpose.msk.msra.mxu0 %vm8368_vm5, %v7378_v38  ;;  %v1457_v13 = vmul.f32 %v7720_v17, %v8534_v49 }
 0xbc7   :  { %7381 = vmatprep.subr.bf16.mxu0 %v8088_v0 }
 0xbc9   :  { %v7722_v6 = vpop.eup %7721 }
 0xbca   :  { %v1458_v19 = vmul.f32 %v7722_v6, %v8536_v50 }
 0xbcc   :  { %v7382_v15 = vpack.c.bf16 %v1458_v19, %v1457_v13 }
 0xbce   :  { %7384 = vmatpush3.bf16.xpose.msk.msra.mxu0 %vm8368_vm5, %v7382_v15 }
 0xbcf   :  { %7393 = vmatprep.subr.bf16.mxu0 %v8088_v0 }
 0xc4f   :  { %v1353_v20 = vpop.f32.mrb[12].mxu0 }
 0xc50   :  { %v1354_v21 = vadd.f32 %v8383_v39, %v1353_v20  ;;  %v6857_v37 = vpop.f32.mrb[13].mxu0 }
 0xc52   :  { %v1357_v22 = vmax.f32 %v1354_v21, 0.0 }
 0xc54   :  { %6867 = vmatmul.mubr.msk.f32.vlgmr.msra.gmra.mrb[12].mxu1 %vm126_vm1, %v1357_v22 }
 0xc55   :  { %7388 = vmatpush3.bf16.xpose.msk.msra.mxu1 %vm8368_vm5, %v7378_v38  ;;  %6888 = vmatprep.mubr.msk.f32.mxu1 %vm8089_vm0, %v8090_v1 }
 0xc56   :  { %7389 = vmatprep.subr.bf16.mxu1 %v8088_v0 }
 0xc5d   :  { %7392 = vmatpush3.bf16.xpose.msk.msra.mxu1 %vm8368_vm5, %v7382_v15 }
 0xd27   :  { %v1427_v35 = vpop.f32.mrb[12].mxu1 }
 0xd28   :  { %v1428_v7 = vadd.f32 %v8403_v45, %v1427_v35  ;;  %v6868_v23 = vpop.f32.mrb[13].mxu1 }
 0xd2a   :  { %7723 = vtanh.f32 %v1428_v7  ;;  %v1463_v39 = vand.u32 2147483647, %v1428_v7  ;;  %v1460_v42 = vmax.f32 %v1428_v7, 0.0  ;;  %vm1461_vm11 = vcmp.ne.f32.partialorder %v1428_v7, %v1428_v7 }
 0xd2b   :  { %v6346_v57 = vmul.f32 -1.442695, %v1428_v7 }
 0xd2c   :  { %v1464_v24 = vsub.f32 0.0, %v1463_v39 }
 0xd2e   :  { %v1465_v47 = vmul.f32 1.442695, %v1464_v24 }
 0xd30   :  { %7725 = vpow2.f32 %v1465_v47 }
 0xd34   :  { %v7724_v25 = vpop.eup %7723 }
 0xd35   :  { %v1484_v52 = vmul.f32 %v7724_v25, %v7724_v25 }
 0xd37   :  { %1608 = vrot.lane.b32.xlu0 %v1484_v52, %s8094_s19  ;;  %v1485_v31 = vsel %vm663_vm6, %v1484_v52, 0.0 }
 0xd38   :  { %1486 = vadd.xlane.f32.xlu1 %v1485_v31 }
 0xd3a   :  { %v7726_v29 = vpop.eup %7725 }
 0xd3b   :  { %v1467_v27 = vadd.f32 1.0, %v7726_v29  ;;  %v1470_v48 = vmul.f32 -0.5, %v7726_v29  ;;  %v1473_v36 = vand.u32 2147483647, %v7726_v29 }
 0xd3d   :  { %7727 = vlog2.f32 %v1467_v27  ;;  %v1471_v32 = vadd.f32 1.0, %v1470_v48  ;;  %vm1474_vm10 = vcmp.lt.f32.partialorder %v1473_v36, 0.0004427343 }
 0xd3e   :  { %7729 = vpow2.f32 %v6346_v57 }
 0xd3f   :  { %v1472_v41 = vmul.f32 %v7726_v29, %v1471_v32 }
 0xd47   :  { %v7728_v45 = vpop.eup %7727 }
 0xd48   :  { %v1469_v40 = vmul.f32 0.6931472, %v7728_v45  ;;  %v7730_v60 = vpop.eup %7729 }
 0xd49   :  { %v1481_v62 = vadd.f32 1.0, %v7730_v60 }
 0xd4a   :  { %v1475_v46 = vsel %vm1474_vm10, %v1472_v41, %v1469_v40 }
 0xd4b   :  { %v1476_v51 = vadd.f32 %v1475_v46, %v1460_v42  ;;  %7731 = vrcp.f32 %v1481_v62 }
 0xd4d   :  { %v8588_v54 = vsel %vm1461_vm11, %v1428_v7, %v1476_v51 }
 0xd4e   :  { %1578 = vperm.xlu1 %7642, %v8588_v54  }
 0xd52   :  { %7643 = vset.pattern.permute.xlu1 %v8095_v16 }
 0xd55   :  { %v8593_v55 = vpop.eup %7731 }
 0xd56   :  { %v1599_v36 = vsub.f32 1.0, %v8593_v55 }
 0xda9   :  { %v1609_v59 = vpop.permute.xlu0 %1608 }
 0xdaa   :  { %v1611_v61 = vsel %vm663_vm6, %v1609_v59, 0.0 }
 0xdab   :  { %1612 = vadd.xlane.f32.xlu1 %v1611_v61 }
 0xdbc   :  { %1595 = vperm.xlu1 %7643, %v8593_v55  }
 0xdc5   :  { %v1487_v63 = vpop.xlane.xlu1 %1486 }
 0xdc6   :  { %v1488_v9 = vadd.f32 1e-08, %v1487_v63 }
 0xdc8   :  { %7733 = vrsqrt.f32 %v1488_v9 }
 0xdcd   :  { %v1579_v38 = vpop.permute.xlu1 %1578 }
 0xdd2   :  { %v7734_v10 = vpop.eup %7733 }
 0xdd3   :  { %v1490_v33 = vmul.f32 %v7734_v10, %v7724_v25 }
 0xdd5   :  { %6878 = vmatmul.mubr.msk.f32.vlgmr.msra.gmra.mrb[14].mxu0 %vm207_vm3, %v1490_v33 }
 0xdd6   :  { %7395 = vmatpush3.bf16.msra.mxu0 %v8250_v5  ;;  %6899 = vmatprep.mubr.msk.f32.mxu0 %vm8089_vm0, %v8090_v1 }
 0xdd7   :  { %7396 = vmatprep.subr.bf16.mxu0 %v8088_v0 }
 0xdda   :  { %7398 = vmatpush3.bf16.msra.mxu0 %v8259_v8 }
 0xddb   :  { %7399 = vmatprep.subr.bf16.mxu0 %v8088_v0 }
 0xddd   :  { %6900 = vmatmul.mubr.msk.f32.vlgmr.msra.gmra.mrb[16].mxu0 %vm126_vm1, %v1357_v22 }
 0xdde   :  { %6918 = vmatprep.mubr.msk.f32.mxu0 %vm8089_vm0, %v8090_v1 }
 0xe38   :  { %v1613_v15 = vpop.xlane.xlu1 %1612 }
 0xe39   :  { %v1614_v20 = vadd.f32 1e-08, %v1613_v15  ;;  %v1719_v15 = vsel %vm207_vm3, %v8519_v4, 0.0 }
 0xe3b   :  { %7735 = vrsqrt.f32 %v1614_v20  ;;  %v1720_v20 = vsel %vm207_vm3, %v8517_v3, 0.0 }
 0xe3c   :  { %v1596_v45 = vpop.permute.xlu1 %1595 }
 0xe45   :  { %v7736_v22 = vpop.eup %7735 }
 0xe46   :  { %v1616_v24 = vmul.f32 %v7736_v22, %v7724_v25 }
 0xea8   :  { %v1572_v17 = vpop.f32.mrb[14].mxu0 }
 0xea9   :  { %v1581_v6 = vmul.f32 %v1579_v38, %v1572_v17  ;;  %v6879_v13 = vpop.f32.mrb[15].mxu0 }
 0xeab   :  { %v1582_v19 = vsel %vm761_vm9, %v1581_v6, -inf }
 0xeac   :  { %1583 = vmax.xlane.f32.xlu0 %v1582_v19 }
 0xeb0   :  { %v1840_v21 = vpop.f32.mrb[16].mxu0 }
 0xeb1   :  { %v1841_v37 = vadd.f32 %v8268_v11, %v1840_v21  ;;  %v6901_v35 = vpop.f32.mrb[17].mxu0  ;;  %v1722_v21 = vsel %vm207_vm3, %v8534_v49, 0.0 }
 0xeb3   :  { %v6358_v7 = vmul.f32 -1.442695, %v1841_v37 }
 0xeb5   :  { %7737 = vpow2.f32 %v6358_v7  ;;  %v1724_v7 = vsel %vm207_vm3, %v8536_v50, 0.0 }
 0xeb6   :  { %7739 = vtanh.f32 %v1841_v37  ;;  %v1721_v37 = vadd.f32 %v1720_v20, %v1719_v15 }
 0xebf   :  { %v7738_v23 = vpop.eup %7737 }
 0xec0   :  { %v1847_v39 = vadd.f32 1.0, %v7738_v23  ;;  %v7740_v47 = vpop.eup %7739  ;;  %v1723_v23 = vadd.f32 %v1722_v21, %v1721_v37 }
 0xec2   :  { %7741 = vrcp.f32 %v1847_v39  ;;  %1618 = vrot.lane.b32.xlu0 %v1616_v24, %s8094_s19  ;;  %v1725_v39 = vadd.f32 %v1724_v7, %v1723_v23 }
 0xec4   :  { %v1726_v24 = vrot.slane %v1725_v39, 4 }
 0xecc   :  { %v7742_v52 = vpop.eup %7741 }
 0xecd   :  { %v1851_v31 = vsel %vm207_vm3, %v7742_v52, %v7740_v47 }
 0xece   :  { %6902 = vmatprep.subr.msk.mxu1 %vm254_vm4, %v1851_v31 }
 0xf39   :  { %v1584_v29 = vpop.xlane.xlu0 %1583 }
 0xf3a   :  { %v1585_v11 = vsub.f32 %v1581_v6, %v1584_v29 }
 0xf3c   :  { %v1586_v27 = vmul.f32 1.442695, %v1585_v11 }
 0xf3d   :  { %v1619_v48 = vpop.permute.xlu0 %1618 }
 0xf3e   :  { %7743 = vpow2.f32 %v1586_v27  ;;  %6889 = vmatmul.mubr.msk.f32.vlgmr.msra.gmra.mrb[14].mxu1 %vm207_vm3, %v1619_v48 }
 0xf3f   :  { %6903 = vmatpush3.msk.msra.mxu1 %vm254_vm4, %v1851_v31  ;;  %v1727_v31 = vadd.f32 %v1726_v24, %v1725_v39 }
 0xf40   :  { %7405 = vmatprep.subr.bf16.mxu1 %v8088_v0 }
 0xf41   :  { %v1728_v29 = vrot.slane %v1727_v31, 2 }
 0xf43   :  { %v1729_v11 = vadd.f32 %v1728_v29, %v1727_v31 }
 0xf45   :  { %v1730_v27 = vrot.slane %v1729_v11, 1 }
 0xf47   :  { %v1731_v48 = vadd.f32 %v1730_v27, %v1729_v11 }
 0xf48   :  { %v7744_v25 = vpop.eup %7743 }
 0xf49   :  { %v1588_v32 = vsel %vm761_vm9, %v7744_v25, 0.0 }
 0xf4a   :  { %1589 = vadd.xlane.f32.xlu1 %v1588_v32 }
 0xf5b   :  { %1602 = vperm.xlu1 %7643, %v1599_v36  }
 0xf5f   :  { %7644 = vset.pattern.permute.xlu1 %v8096_v53 }
 0xf60   :  { %1693 = vperm.xlu1 %7644, %v8588_v54  }
 0xf64   :  { %7645 = vset.pattern.permute.xlu1 %v8097_v2 }
 0xfd7   :  { %v1590_v40 = vpop.xlane.xlu1 %1589 }
 0xfd8   :  { %7745 = vrcp.f32 %v1590_v40 }
 0xfdb   :  { %v1603_v42 = vpop.permute.xlu1 %1602 }
 0xfdc   :  { %v1605_v57 = vmul.f32 %v1603_v42, %v8454_v18 }
 0xfdf   :  { %v1694_v60 = vpop.permute.xlu1 %1693 }
 0xfe2   :  { %v7746_v41 = vpop.eup %7745 }
 0xfe3   :  { %v1592_v46 = vmul.f32 %v7746_v41, %v7744_v25  ;;  %v1732_v25 = vmul.f32 0.03125, %v1731_v48 }
 0xfe5   :  { %v1598_v51 = vmul.f32 %v1596_v45, %v1592_v46  ;;  %v1733_v32 = vsub.f32 %v8519_v4, %v1732_v25  ;;  %v1735_v41 = vsub.f32 %v8534_v49, %v1732_v25 }
 0xfe7   :  { %v8620_v59 = vadd.f32 %v1605_v57, %v1598_v51  ;;  %v1737_v45 = vmul.f32 %v1733_v32, %v1733_v32  ;;  %v1736_v51 = vsub.f32 %v8536_v50, %v1732_v25  ;;  %v1739_v57 = vmul.f32 %v1735_v41, %v1735_v41 }
 0xfe9   :  { %1852 = vxpose.xlu0.b32.start.end [1/1] (short) (narrow) %v8620_v59, 32  ;;  %v1741_v42 = vsel %vm207_vm3, %v1737_v45, 0.0 }
0x1011   :  { %v1688_v61 = vpop.f32.mrb[14].mxu1 }
0x1012   :  { %v1696_v62 = vmul.f32 %v1694_v60, %v1688_v61  ;;  %v6890_v63 = vpop.f32.mrb[15].mxu1  ;;  %7648 = vset.pattern.permute.xlu0 %v8095_v16  ;;  %v1740_v61 = vmul.f32 %v1736_v51, %v1736_v51 }
0x1014   :  { %v1697_v54 = vsel %vm761_vm9, %v1696_v62, -inf  ;;  %v1746_v4 = vsel %vm207_vm3, %v1740_v61, 0.0 }
0x1015   :  { %1698 = vmax.xlane.f32.xlu1 %v1697_v54 }
0x1026   :  { %1709 = vperm.xlu1 %7645, %v8593_v55  }
0x102a   :  { %1714 = vperm.xlu1 %7645, %v1599_v36   ;;  %v1734_v36 = vsub.f32 %v8517_v3, %v1732_v25 }
0x102c   :  { %v1738_v40 = vmul.f32 %v1734_v36, %v1734_v36 }
0x102e   :  { %7646 = vset.pattern.permute.xlu1 %v8093_v44  ;;  %v1742_v46 = vsel %vm207_vm3, %v1738_v40, 0.0 }
0x102f   :  { %v1743_v60 = vadd.f32 %v1742_v46, %v1741_v42 }
0x1069   :  { %v1868_v9 = vpop.trf.xlu0 }
0x106a   :  { %6904 = vmatprep.mubr.msk.f32.mxu1 %vm241_vm2, %v1868_v9 }
0x106d   :  { %v1869_v18 = vpop.trf.xlu0 }
0x106e   :  { %6905 = vmatmul.mubr.msk.f32.vlgmr.msra.gmra.mrb[16].mxu1 %vm241_vm2, %v1869_v18 }
0x106f   :  { %7407 = vmatpush3.bf16.msra.mxu1 %v8331_v56 }
0x1070   :  { %7408 = vmatprep.subr.bf16.mxu1 %v8088_v0 }
0x1071   :  { %v1870_v10 = vpop.trf.xlu0 }
0x1072   :  { %6907 = vmatprep.mubr.msk.f32.mxu1 %vm241_vm2, %v1870_v10 }
0x1073   :  { %7410 = vmatpush3.bf16.msra.mxu1 %v8337_v58 }
0x1074   :  { %7417 = vmatprep.subr.bf16.mxu1 %v8088_v0 }
0x1075   :  { %v1871_v33 = vpop.trf.xlu0 }
0x1076   :  { %6908 = vmatmul.mubr.msk.f32.gmra.mrb[18].mxu1 %vm241_vm2, %v1871_v33 }
0x1077   :  { %6929 = vmatprep.mubr.msk.f32.mxu1 %vm8089_vm0, %v8090_v1 }
0x10a2   :  { %v1699_v38 = vpop.xlane.xlu1 %1698 }
0x10a3   :  { %v1700_v17 = vsub.f32 %v1696_v62, %v1699_v38  ;;  %v1744_v62 = vsel %vm207_vm3, %v1739_v57, 0.0 }
0x10a4   :  { %v1745_v63 = vadd.f32 %v1744_v62, %v1743_v60 }
0x10a5   :  { %v1701_v6 = vmul.f32 1.442695, %v1700_v17 }
0x10a6   :  { %v1747_v54 = vadd.f32 %v1746_v4, %v1745_v63 }
0x10a7   :  { %7747 = vpow2.f32 %v1701_v6 }
0x10a8   :  { %v1748_v3 = vrot.slane %v1747_v54, 4 }
0x10aa   :  { %v1749_v9 = vadd.f32 %v1748_v3, %v1747_v54 }
0x10ac   :  { %v1750_v18 = vrot.slane %v1749_v9, 2 }
0x10ae   :  { %v1751_v10 = vadd.f32 %v1750_v18, %v1749_v9 }
0x10b0   :  { %v1752_v49 = vrot.slane %v1751_v10, 1 }
0x10b1   :  { %v8637_v13 = vpop.eup %7747 }
0x10b2   :  { %v1703_v19 = vsel %vm761_vm9, %v8637_v13, 0.0  ;;  %v1753_v33 = vadd.f32 %v1752_v49, %v1751_v10 }
0x10b3   :  { %1704 = vadd.xlane.f32.xlu0 %v1703_v19  ;;  %v1710_v19 = vpop.permute.xlu1 %1709 }
0x10b4   :  { %v1754_v38 = vmul.f32 0.03125, %v1753_v33 }
0x10b6   :  { %v1755_v17 = vadd.f32 1e-05, %v1754_v38 }
0x10b7   :  { %v1715_v7 = vpop.permute.xlu1 %1714 }
0x10b8   :  { %7749 = vrsqrt.f32 %v1755_v17  ;;  %v1717_v49 = vmul.f32 %v1715_v7, %v8541_v28 }
0x10c2   :  { %v7750_v6 = vpop.eup %7749 }
0x10c3   :  { %v1758_v50 = vmul.f32 %v7750_v6, %v1734_v36  ;;  %v1757_v20 = vmul.f32 %v7750_v6, %v1733_v32  ;;  %v1759_v24 = vmul.f32 %v7750_v6, %v1735_v41  ;;  %v1760_v36 = vmul.f32 %v7750_v6, %v1736_v51 }
0x10c5   :  { %v1762_v15 = vmul.f32 %v8505_v34, %v1758_v50  ;;  %v1761_v39 = vmul.f32 %v8505_v34, %v1757_v20  ;;  %v1763_v25 = vmul.f32 %v8505_v34, %v1759_v24  ;;  %v1764_v46 = vmul.f32 %v8505_v34, %v1760_v36  ;;  %v2086_v50 = vld [vmem:[#allocation2 + $0x4] sm:$0x3] }
0x10c7   :  { %v1766_v23 = vadd.f32 %v8512_v43, %v1762_v15  ;;  %v1765_v48 = vadd.f32 %v8512_v43, %v1761_v39  ;;  %v1767_v41 = vadd.f32 %v8512_v43, %v1763_v25  ;;  %v1768_v63 = vadd.f32 %v8512_v43, %v1764_v46  ;;  %v8733_v46 = vld [vmem:[%s9595_s6] ss:$0 sm:$0xff] }
0x1140   :  { %v1705_v21 = vpop.xlane.xlu0 %1704 }
0x1141   :  { %v6906_v35 = vpop.f32.mrb[16].mxu1  ;;  %7751 = vrcp.f32 %v1705_v21 }
0x1142   :  { %1998 = vrot.lane.b32.xlu1 %v6906_v35, %s8091_s16  ;;  %v1965_v22 = vpop.f32.mrb[17].mxu1  ;;  %v1985_v37 = vsub.f32 1.0, %v6906_v35 }
0x1143   :  { %v1984_v31 = vsub.f32 1.0, %v1965_v22 }
0x1144   :  { %v1989_v29 = vmul.f32 %v1985_v37, %v1766_v23 }
0x1145   :  { %v1988_v32 = vmul.f32 %v1984_v31, %v1765_v48 }
0x1146   :  { %1996 = vrot.lane.b32.xlu1 %v1965_v22, %s8091_s16 }
0x1149   :  { %v8651_v47 = vpop.f32.mrb[18].mxu1 }
0x114a   :  { %v8653_v52 = vpop.f32.mrb[19].mxu1  ;;  %v1987_v60 = vsub.f32 1.0, %v8651_v47 }
0x114b   :  { %2000 = vrot.lane.b32.xlu1 %v8653_v52, %s8091_s16  ;;  %v1986_v45 = vsub.f32 1.0, %v8653_v52  ;;  %v7752_v51 = vpop.eup %7751 }
0x114c   :  { %v1707_v4 = vmul.f32 %v7752_v51, %v8637_v13  ;;  %v1991_v54 = vmul.f32 %v1987_v60, %v1768_v63 }
0x114d   :  { %v1990_v61 = vmul.f32 %v1986_v45, %v1767_v41 }
0x114e   :  { %v1712_v18 = vmul.f32 %v1710_v19, %v1707_v4 }
0x114f   :  { %2002 = vrot.lane.b32.xlu1 %v8651_v47, %s8091_s16 }
0x1150   :  { %v8701_v33 = vadd.f32 %v1717_v49, %v1712_v18 }
0x11b4   :  { %v1999_v11 = vpop.permute.xlu1 %1998 }
0x11b5   :  { %v8670_v27 = vadd.f32 %v1999_v11, %v1989_v29 }
0x11b7   :  { %v2240_v35 = vmul.f32 %v8670_v27, %v8670_v27 }
0x11b8   :  { %v1997_v40 = vpop.permute.xlu1 %1996 }
0x11b9   :  { %v8677_v42 = vadd.f32 %v1997_v40, %v1988_v32  ;;  %v2246_v22 = vsel %vm207_vm3, %v2240_v35, 0.0 }
0x11ba   :  { %2247 = vadd.xlane.f32.xlu0 %v2246_v22 }
0x11bb   :  { %v7400_v57 = vpack.c.bf16 %v8670_v27, %v8677_v42  ;;  %v2239_v17 = vmul.f32 %v8677_v42, %v8677_v42 }
0x11bd   :  { %7401 = vmatpush3.bf16.msra.mxu0 %v7400_v57  ;;  %v2001_v62 = vpop.permute.xlu1 %2000  ;;  %v2243_v6 = vsel %vm207_vm3, %v2239_v17, 0.0 }
0x11be   :  { %v8685_v52 = vadd.f32 %v2001_v62, %v1990_v61  ;;  %7402 = vmatprep.subr.bf16.mxu0 %v8088_v0  ;;  %v8747_v62 = vld [vmem:[%s9599_s10] ss:$0 sm:$0xff] }
0x11c0   :  { %v2241_v34 = vmul.f32 %v8685_v52, %v8685_v52 }
0x11c1   :  { %v2003_v3 = vpop.permute.xlu1 %2002 }
0x11c2   :  { %v8692_v9 = vadd.f32 %v2003_v3, %v1991_v54  ;;  %v2249_v47 = vsel %vm207_vm3, %v2241_v34, 0.0 }
0x11c3   :  { %2250 = vadd.xlane.f32.xlu0 %v2249_v47 }
0x11c4   :  { %v7403_v10 = vpack.c.bf16 %v8692_v9, %v8685_v52  ;;  %v2242_v43 = vmul.f32 %v8692_v9, %v8692_v9 }
0x11c6   :  { %7404 = vmatpush3.bf16.msra.mxu0 %v7403_v10  ;;  %v2252_v13 = vsel %vm207_vm3, %v2242_v43, 0.0 }
0x11c7   :  { %2253 = vadd.xlane.f32.xlu0 %v2252_v13  ;;  %7411 = vmatprep.subr.bf16.mxu0 %v8088_v0 }
0x11c9   :  { %6919 = vmatmul.mubr.msk.f32.vlgmr.msra.gmra.mrb[18].mxu0 %vm126_vm1, %v8701_v33 }
0x11ca   :  { %7413 = vmatpush3.bf16.msra.mxu0 %v8352_v12  ;;  %6940 = vmatprep.mubr.msk.f32.mxu0 %vm8089_vm0, %v8090_v1 }
0x11cb   :  { %7414 = vmatprep.subr.bf16.mxu0 %v8088_v0 }
0x11ce   :  { %7416 = vmatpush3.bf16.msra.mxu0 %v8355_v14 }
0x11cf   :  { %7425 = vmatprep.subr.bf16.mxu0 %v8088_v0 }
0x1247   :  { %v2248_v20 = vpop.xlane.xlu0 %2247 }
0x1248   :  { %v2256_v37 = vadd.f32 1e-08, %v2248_v20 }
0x124a   :  { %7753 = vrsqrt.f32 %v2256_v37 }
0x1250   :  { %v2251_v21 = vpop.xlane.xlu0 %2250 }
0x1251   :  { %v2257_v31 = vadd.f32 1e-08, %v2251_v21 }
0x1254   :  { %v2254_v7 = vpop.xlane.xlu0 %2253  ;;  %v7754_v29 = vpop.eup %7753 }
0x1255   :  { %v2258_v24 = vadd.f32 1e-08, %v2254_v7  ;;  %v2264_v48 = vmul.f32 %v7754_v29, %v8670_v27 }
0x129c   :  { %v2081_v28 = vpop.f32.mrb[18].mxu0 }
0x129d   :  { %2088 = vrot.lane.b32.xlu1 %v2081_v28, %s8092_s14  ;;  %v6920_v38 = vpop.f32.mrb[19].mxu0 }
0x12c1   :  { %2244 = vadd.xlane.f32.xlu1 %v2243_v6 }
0x130f   :  { %v2089_v19 = vpop.permute.xlu1 %2088 }
0x1310   :  { %v2091_v15 = vsel %vm207_vm3, %v2086_v50, %v2089_v19 }
0x1311   :  { %6930 = vmatmul.mubr.msk.f32.vlgmr.msra.gmra.mrb[20].mxu1 %vm126_vm1, %v2091_v15 }
0x1312   :  { %6951 = vmatprep.mubr.msk.f32.mxu1 %vm8089_vm0, %v8090_v1 }
0x134e   :  { %v2245_v23 = vpop.xlane.xlu1 %2244 }
0x134f   :  { %v2255_v39 = vadd.f32 1e-08, %v2245_v23 }
0x1351   :  { %7755 = vrsqrt.f32 %v2255_v39 }
0x1352   :  { %7757 = vrsqrt.f32 %v2258_v24 }
0x1353   :  { %7759 = vrsqrt.f32 %v2257_v31 }
0x135b   :  { %v7756_v11 = vpop.eup %7755 }
0x135c   :  { %v2263_v25 = vmul.f32 %v7756_v11, %v8677_v42  ;;  %v7758_v32 = vpop.eup %7757 }
0x135d   :  { %v7760_v35 = vpop.eup %7759  ;;  %v2266_v45 = vmul.f32 %v7758_v32, %v8692_v9 }
0x135e   :  { %v7418_v36 = vpack.c.bf16 %v2264_v48, %v2263_v25  ;;  %v2265_v40 = vmul.f32 %v7760_v35, %v8685_v52 }
0x1360   :  { %7420 = vmatpush3.bf16.xpose.msk.msra.mxu1 %vm8368_vm5, %v7418_v36  ;;  %v7422_v22 = vpack.c.bf16 %v2266_v45, %v2265_v40 }
0x1361   :  { %7421 = vmatprep.subr.bf16.mxu1 %v8088_v0 }
0x1368   :  { %7424 = vmatpush3.bf16.xpose.msk.msra.mxu1 %vm8368_vm5, %v7422_v22 }
0x1369   :  { %7433 = vmatprep.subr.bf16.mxu1 %v8088_v0 }
0x13e4   :  { %v2161_v41 = vpop.f32.mrb[20].mxu1 }
0x13e5   :  { %v2162_v57 = vadd.f32 %v8733_v46, %v2161_v41  ;;  %v6931_v51 = vpop.f32.mrb[21].mxu1 }
0x13e7   :  { %v2165_v60 = vmax.f32 %v2162_v57, 0.0 }
0x13e9   :  { %6941 = vmatmul.mubr.msk.f32.vlgmr.msra.gmra.mrb[20].mxu0 %vm126_vm1, %v2165_v60 }
0x13ea   :  { %7428 = vmatpush3.bf16.xpose.msk.msra.mxu0 %vm8368_vm5, %v7418_v36  ;;  %6962 = vmatprep.mubr.msk.f32.mxu0 %vm8089_vm0, %v8090_v1 }
0x13eb   :  { %7429 = vmatprep.subr.bf16.mxu0 %v8088_v0 }
0x13f2   :  { %7432 = vmatpush3.bf16.xpose.msk.msra.mxu0 %vm8368_vm5, %v7422_v22 }
0x14bc   :  { %v2235_v61 = vpop.f32.mrb[20].mxu0 }
0x14bd   :  { %v2236_v63 = vadd.f32 %v8747_v62, %v2235_v61  ;;  %v6942_v4 = vpop.f32.mrb[21].mxu0 }
0x14bf   :  { %7761 = vtanh.f32 %v2236_v63  ;;  %v2271_v54 = vand.u32 2147483647, %v2236_v63  ;;  %v2268_v19 = vmax.f32 %v2236_v63, 0.0  ;;  %vm2269_vm13 = vcmp.ne.f32.partialorder %v2236_v63, %v2236_v63 }
0x14c0   :  { %v6367_v29 = vmul.f32 -1.442695, %v2236_v63 }
0x14c1   :  { %v2272_v34 = vsub.f32 0.0, %v2271_v54 }
0x14c3   :  { %v2273_v3 = vmul.f32 1.442695, %v2272_v34 }
0x14c5   :  { %7763 = vpow2.f32 %v2273_v3 }
0x14c9   :  { %v7762_v47 = vpop.eup %7761 }
0x14ca   :  { %v2292_v18 = vmul.f32 %v7762_v47, %v7762_v47 }
0x14cc   :  { %v2293_v10 = vsel %vm663_vm6, %v2292_v18, 0.0 }
0x14cd   :  { %2294 = vadd.xlane.f32.xlu0 %v2293_v10 }
0x14cf   :  { %v7764_v43 = vpop.eup %7763 }
0x14d0   :  { %v2275_v49 = vadd.f32 1.0, %v7764_v43  ;;  %v2278_v13 = vmul.f32 -0.5, %v7764_v43  ;;  %v2281_v38 = vand.u32 2147483647, %v7764_v43 }
0x14d2   :  { %7765 = vlog2.f32 %v2275_v49  ;;  %v2279_v28 = vadd.f32 1.0, %v2278_v13  ;;  %vm2282_vm12 = vcmp.lt.f32.partialorder %v2281_v38, 0.0004427343 }
0x14d4   :  { %v2280_v50 = vmul.f32 %v7764_v43, %v2279_v28 }
0x14dc   :  { %v7766_v17 = vpop.eup %7765 }
0x14dd   :  { %v2277_v6 = vmul.f32 0.6931472, %v7766_v17 }
0x14df   :  { %v2283_v15 = vsel %vm2282_vm12, %v2280_v50, %v2277_v6 }
0x14e0   :  { %v2284_v20 = vadd.f32 %v2283_v15, %v2268_v19 }
0x14e2   :  { %v8751_v21 = vsel %vm2269_vm13, %v2236_v63, %v2284_v20  ;;  %v8775_v63 = vld [vmem:[%s9597_s8] ss:$0 sm:$0xff] }
0x14e3   :  { %2386 = vperm.xlu1 %7646, %v8751_v21   ;;  %2416 = vrot.lane.b32.xlu0 %v2292_v18, %s8094_s19 }
0x14e7   :  { %7647 = vset.pattern.permute.xlu1 %v8095_v16 }
0x155a   :  { %v2295_v37 = vpop.xlane.xlu0 %2294 }
0x155b   :  { %v2296_v7 = vadd.f32 1e-08, %v2295_v37 }
0x155d   :  { %7767 = vrsqrt.f32 %v2296_v7 }
0x155e   :  { %v2417_v23 = vpop.permute.xlu0 %2416  ;;  %7769 = vpow2.f32 %v6367_v29 }
0x155f   :  { %v2419_v39 = vsel %vm663_vm6, %v2417_v23, 0.0 }
0x1560   :  { %2420 = vadd.xlane.f32.xlu0 %v2419_v39 }
0x1562   :  { %v2387_v22 = vpop.permute.xlu1 %2386 }
0x1567   :  { %v7768_v24 = vpop.eup %7767 }
0x1568   :  { %v2298_v31 = vmul.f32 %v7768_v24, %v7762_v47  ;;  %v7770_v11 = vpop.eup %7769 }
0x1569   :  { %v2289_v25 = vadd.f32 1.0, %v7770_v11 }
0x156a   :  { %6952 = vmatmul.mubr.msk.f32.vlgmr.msra.gmra.mrb[22].mxu1 %vm207_vm3, %v2298_v31 }
0x156b   :  { %7435 = vmatpush3.bf16.msra.mxu1 %v8250_v5  ;;  %6973 = vmatprep.mubr.msk.f32.mxu1 %vm8089_vm0, %v8090_v1 }
0x156c   :  { %7436 = vmatprep.subr.bf16.mxu1 %v8088_v0 }
0x156f   :  { %7438 = vmatpush3.bf16.msra.mxu1 %v8259_v8 }
0x1570   :  { %7439 = vmatprep.subr.bf16.mxu1 %v8088_v0 }
0x1572   :  { %6974 = vmatmul.mubr.msk.f32.vlgmr.msra.gmra.mrb[24].mxu1 %vm126_vm1, %v2165_v60 }
0x1573   :  { %6992 = vmatprep.mubr.msk.f32.mxu1 %vm8089_vm0, %v8090_v1 }
0x15ed   :  { %v2421_v48 = vpop.xlane.xlu0 %2420 }
0x15ee   :  { %v2422_v36 = vadd.f32 1e-08, %v2421_v48 }
0x15f0   :  { %7771 = vrsqrt.f32 %v2422_v36 }
0x15f1   :  { %7773 = vrcp.f32 %v2289_v25 }
0x15fa   :  { %v7772_v32 = vpop.eup %7771 }
0x15fb   :  { %v2424_v35 = vmul.f32 %v7772_v32, %v7762_v47  ;;  %v8767_v45 = vpop.eup %7773 }
0x15fc   :  { %v2407_v40 = vsub.f32 1.0, %v8767_v45 }
0x15fd   :  { %2426 = vrot.lane.b32.xlu0 %v2424_v35, %s8094_s19 }
0x1601   :  { %2410 = vperm.xlu0 %7648, %v2407_v40  }
0x163d   :  { %v2380_v41 = vpop.f32.mrb[22].mxu1 }
0x163e   :  { %v2389_v57 = vmul.f32 %v2387_v22, %v2380_v41  ;;  %v6953_v51 = vpop.f32.mrb[23].mxu1 }
0x163f   :  { %v2527_v51 = vsel %vm207_vm3, %v8677_v42, 0.0 }
0x1640   :  { %v2390_v60 = vsel %vm761_vm9, %v2389_v57, -inf }
0x1641   :  { %2391 = vmax.xlane.f32.xlu1 %v2390_v60 }
0x1645   :  { %v2648_v61 = vpop.f32.mrb[24].mxu1 }
0x1646   :  { %v2649_v4 = vadd.f32 %v8775_v63, %v2648_v61  ;;  %v6975_v54 = vpop.f32.mrb[25].mxu1  ;;  %v2528_v61 = vsel %vm207_vm3, %v8670_v27, 0.0 }
0x1647   :  { %v2529_v54 = vadd.f32 %v2528_v61, %v2527_v51 }
0x1648   :  { %v6379_v34 = vmul.f32 -1.442695, %v2649_v4 }
0x164a   :  { %7775 = vpow2.f32 %v6379_v34  ;;  %v2532_v34 = vsel %vm207_vm3, %v8692_v9, 0.0 }
0x164b   :  { %7777 = vtanh.f32 %v2649_v4  ;;  %v2530_v4 = vsel %vm207_vm3, %v8685_v52, 0.0 }
0x1654   :  { %v7776_v3 = vpop.eup %7775 }
0x1655   :  { %v2655_v47 = vadd.f32 1.0, %v7776_v3  ;;  %v7778_v18 = vpop.eup %7777  ;;  %v2531_v3 = vadd.f32 %v2530_v4, %v2529_v54 }
0x1657   :  { %7779 = vrcp.f32 %v2655_v47  ;;  %v2533_v47 = vadd.f32 %v2532_v34, %v2531_v3  ;;  %v8845_v3 = vld [vmem:[%s9600_s11] ss:$0 sm:$0xff] }
0x1661   :  { %v7780_v10 = vpop.eup %7779 }
0x1662   :  { %v2659_v43 = vsel %vm207_vm3, %v7780_v10, %v7778_v18 }
0x1663   :  { %6976 = vmatprep.subr.msk.mxu0 %vm254_vm4, %v2659_v43 }
0x166f   :  { %v2427_v49 = vpop.permute.xlu0 %2426 }
0x1670   :  { %6963 = vmatmul.mubr.msk.f32.vlgmr.msra.gmra.mrb[22].mxu0 %vm207_vm3, %v2427_v49 }
0x1671   :  { %6977 = vmatpush3.msk.msra.mxu0 %vm254_vm4, %v2659_v43  ;;  %v2534_v43 = vrot.slane %v2533_v47, 4 }
0x1672   :  { %7445 = vmatprep.subr.bf16.mxu0 %v8088_v0 }
0x1673   :  { %v2535_v49 = vadd.f32 %v2534_v43, %v2533_v47 }
0x1680   :  { %v2411_v39 = vpop.permute.xlu0 %2410 }
0x1681   :  { %v2413_v29 = vmul.f32 %v2411_v39, %v8620_v59 }
0x16ce   :  { %v2392_v13 = vpop.xlane.xlu1 %2391 }
0x16cf   :  { %v2393_v28 = vsub.f32 %v2389_v57, %v2392_v13  ;;  %v2536_v13 = vrot.slane %v2535_v49, 2 }
0x16d1   :  { %v2394_v38 = vmul.f32 1.442695, %v2393_v28  ;;  %v2537_v28 = vadd.f32 %v2536_v13, %v2535_v49 }
0x16d3   :  { %7781 = vpow2.f32 %v2394_v38  ;;  %v2538_v38 = vrot.slane %v2537_v28, 1 }
0x16dd   :  { %v7782_v17 = vpop.eup %7781 }
0x16de   :  { %v2396_v6 = vsel %vm761_vm9, %v7782_v17, 0.0 }
0x16df   :  { %2397 = vadd.xlane.f32.xlu1 %v2396_v6 }
0x16f0   :  { %2403 = vperm.xlu1 %7647, %v8767_v45  }
0x16f4   :  { %7649 = vset.pattern.permute.xlu1 %v8096_v53 }
0x16f5   :  { %2501 = vperm.xlu1 %7649, %v8751_v21  }
0x16f9   :  { %7650 = vset.pattern.permute.xlu1 %v8097_v2 }
0x1743   :  { %v2496_v50 = vpop.f32.mrb[22].mxu0 }
0x1744   :  { %v6964_v19 = vpop.f32.mrb[23].mxu0 }
0x176c   :  { %v2398_v15 = vpop.xlane.xlu1 %2397 }
0x176d   :  { %7783 = vrcp.f32 %v2398_v15 }
0x1770   :  { %v2404_v20 = vpop.permute.xlu1 %2403 }
0x1774   :  { %v2502_v37 = vpop.permute.xlu1 %2501 }
0x1775   :  { %v2504_v7 = vmul.f32 %v2502_v37, %v2496_v50 }
0x1777   :  { %v7784_v23 = vpop.eup %7783  ;;  %v2505_v24 = vsel %vm761_vm9, %v2504_v7, -inf }
0x1778   :  { %v2400_v31 = vmul.f32 %v7784_v23, %v7782_v17  ;;  %2506 = vmax.xlane.f32.xlu1 %v2505_v24  ;;  %v2539_v17 = vadd.f32 %v2538_v38, %v2537_v28 }
0x177a   :  { %v2406_v11 = vmul.f32 %v2404_v20, %v2400_v31  ;;  %v2540_v6 = vmul.f32 0.03125, %v2539_v17  ;;  %v8854_v17 = vld [vmem:[%s9601_s12] ss:$0 sm:$0xff] }
0x177c   :  { %v8790_v48 = vadd.f32 %v2413_v29, %v2406_v11  ;;  %v2541_v50 = vsub.f32 %v8677_v42, %v2540_v6  ;;  %v2542_v19 = vsub.f32 %v8670_v27, %v2540_v6  ;;  %v2543_v37 = vsub.f32 %v8685_v52, %v2540_v6 }
0x177d   :  { %v2544_v39 = vsub.f32 %v8692_v9, %v2540_v6 }
0x177e   :  { %2660 = vxpose.xlu0.b32.start.end [1/1] (short) (narrow) %v8790_v48, 32  ;;  %v2545_v15 = vmul.f32 %v2541_v50, %v2541_v50  ;;  %v2546_v20 = vmul.f32 %v2542_v19, %v2542_v19  ;;  %v2547_v24 = vmul.f32 %v2543_v37, %v2543_v37 }
0x177f   :  { %v2548_v29 = vmul.f32 %v2544_v39, %v2544_v39 }
0x1780   :  { %v2550_v23 = vsel %vm207_vm3, %v2546_v20, 0.0  ;;  %v2552_v11 = vsel %vm207_vm3, %v2547_v24, 0.0 }
0x1781   :  { %v2554_v42 = vsel %vm207_vm3, %v2548_v29, 0.0 }
0x1789   :  { %2517 = vperm.xlu1 %7650, %v8767_v45  }
0x178d   :  { %2522 = vperm.xlu1 %7650, %v2407_v40  }
0x1791   :  { %7653 = vset.pattern.permute.xlu1 %v8095_v16 }
0x17a7   :  { %7651 = vset.pattern.permute.xlu0 %v8093_v44 }
0x17fe   :  { %v2676_v21 = vpop.trf.xlu0 }
0x17ff   :  { %6978 = vmatprep.mubr.msk.f32.mxu0 %vm241_vm2, %v2676_v21 }
0x1802   :  { %v2677_v25 = vpop.trf.xlu0 }
0x1803   :  { %6979 = vmatmul.mubr.msk.f32.vlgmr.msra.gmra.mrb[24].mxu0 %vm241_vm2, %v2677_v25 }
0x1804   :  { %7447 = vmatpush3.bf16.msra.mxu0 %v8331_v56 }
0x1805   :  { %v2507_v59 = vpop.xlane.xlu1 %2506  ;;  %7448 = vmatprep.subr.bf16.mxu0 %v8088_v0 }
0x1806   :  { %v2508_v36 = vsub.f32 %v2504_v7, %v2507_v59  ;;  %v2678_v32 = vpop.trf.xlu0  ;;  %v2549_v7 = vsel %vm207_vm3, %v2545_v15, 0.0 }
0x1807   :  { %6981 = vmatprep.mubr.msk.f32.mxu0 %vm241_vm2, %v2678_v32  ;;  %v2551_v31 = vadd.f32 %v2550_v23, %v2549_v7 }
0x1808   :  { %v2509_v35 = vmul.f32 1.442695, %v2508_v36  ;;  %7450 = vmatpush3.bf16.msra.mxu0 %v8337_v58 }
0x1809   :  { %7457 = vmatprep.subr.bf16.mxu0 %v8088_v0  ;;  %v2553_v21 = vadd.f32 %v2552_v11, %v2551_v31  ;;  %v2518_v9 = vpop.permute.xlu1 %2517 }
0x180a   :  { %7785 = vpow2.f32 %v2509_v35  ;;  %v2679_v40 = vpop.trf.xlu0 }
0x180b   :  { %6982 = vmatmul.mubr.msk.f32.gmra.mrb[26].mxu0 %vm241_vm2, %v2679_v40  ;;  %v2555_v25 = vadd.f32 %v2554_v42, %v2553_v21 }
0x180c   :  { %7003 = vmatprep.mubr.msk.f32.mxu0 %vm8089_vm0, %v8090_v1 }
0x180d   :  { %v2556_v27 = vrot.slane %v2555_v25, 4  ;;  %v2523_v34 = vpop.permute.xlu1 %2522 }
0x180f   :  { %v2557_v59 = vadd.f32 %v2556_v27, %v2555_v25 }
0x1811   :  { %v2558_v36 = vrot.slane %v2557_v59, 2 }
0x1813   :  { %v2559_v32 = vadd.f32 %v2558_v36, %v2557_v59 }
0x1814   :  { %v8806_v22 = vpop.eup %7785 }
0x1815   :  { %v2511_v41 = vsel %vm761_vm9, %v8806_v22, 0.0  ;;  %v2560_v52 = vrot.slane %v2559_v32, 1 }
0x1816   :  { %2512 = vadd.xlane.f32.xlu0 %v2511_v41 }
0x1817   :  { %v2561_v35 = vadd.f32 %v2560_v52, %v2559_v32 }
0x1819   :  { %v2562_v40 = vmul.f32 0.03125, %v2561_v35 }
0x181b   :  { %v2563_v41 = vadd.f32 1e-05, %v2562_v40 }
0x181d   :  { %7787 = vrsqrt.f32 %v2563_v41 }
0x1827   :  { %v7788_v51 = vpop.eup %7787 }
0x1828   :  { %v2566_v61 = vmul.f32 %v7788_v51, %v2542_v19  ;;  %v2565_v4 = vmul.f32 %v7788_v51, %v2541_v50  ;;  %v2567_v49 = vmul.f32 %v7788_v51, %v2543_v37  ;;  %v2568_v15 = vmul.f32 %v7788_v51, %v2544_v39 }
0x182a   :  { %v2570_v47 = vmul.f32 %v8845_v3, %v2566_v61  ;;  %v2569_v43 = vmul.f32 %v8845_v3, %v2565_v4  ;;  %v2571_v19 = vmul.f32 %v8845_v3, %v2567_v49  ;;  %v2572_v31 = vmul.f32 %v8845_v3, %v2568_v15 }
0x182b   :  { %v2525_v4 = vmul.f32 %v2523_v34, %v8701_v33 }
0x182c   :  { %v2574_v6 = vadd.f32 %v8854_v17, %v2570_v47  ;;  %v2573_v50 = vadd.f32 %v8854_v17, %v2569_v43  ;;  %v2575_v24 = vadd.f32 %v8854_v17, %v2571_v19  ;;  %v2576_v59 = vadd.f32 %v8854_v17, %v2572_v31  ;;  %v2894_v43 = vld [vmem:[#allocation2 + $0x6] sm:$0x3] }
0x18a3   :  { %v2513_v54 = vpop.xlane.xlu0 %2512 }
0x18a4   :  { %7789 = vrcp.f32 %v2513_v54 }
0x18ae   :  { %v7790_v39 = vpop.eup %7789 }
0x18af   :  { %v2515_v36 = vmul.f32 %v7790_v39, %v8806_v22 }
0x18b1   :  { %v2520_v41 = vmul.f32 %v2518_v9, %v2515_v36 }
0x18b3   :  { %v8888_v54 = vadd.f32 %v2525_v4, %v2520_v41 }
0x18d6   :  { %v8810_v57 = vpop.f32.mrb[24].mxu0 }
0x18d7   :  { %2806 = vrot.lane.b32.xlu1 %v8810_v57, %s8091_s16  ;;  %v8816_v60 = vpop.f32.mrb[25].mxu0  ;;  %v2793_v13 = vsub.f32 1.0, %v8810_v57 }
0x18d8   :  { %v2792_v28 = vsub.f32 1.0, %v8816_v60 }
0x18d9   :  { %v2797_v20 = vmul.f32 %v2793_v13, %v2574_v6 }
0x18da   :  { %v2796_v7 = vmul.f32 %v2792_v28, %v2573_v50 }
0x18db   :  { %2804 = vrot.lane.b32.xlu1 %v8816_v60, %s8091_s16 }
0x18de   :  { %v8826_v18 = vpop.f32.mrb[26].mxu0 }
0x18df   :  { %v8828_v10 = vpop.f32.mrb[27].mxu0  ;;  %v2795_v21 = vsub.f32 1.0, %v8826_v18 }
0x18e0   :  { %2808 = vrot.lane.b32.xlu1 %v8828_v10, %s8091_s16  ;;  %v2794_v37 = vsub.f32 1.0, %v8828_v10 }
0x18e1   :  { %v2799_v32 = vmul.f32 %v2795_v21, %v2576_v59 }
0x18e2   :  { %v2798_v42 = vmul.f32 %v2794_v37, %v2575_v24 }
0x18e4   :  { %2810 = vrot.lane.b32.xlu1 %v8826_v18, %s8091_s16 }
0x1949   :  { %v2807_v38 = vpop.permute.xlu1 %2806 }
0x194a   :  { %v8860_v23 = vadd.f32 %v2807_v38, %v2797_v20 }
0x194c   :  { %v3048_v34 = vmul.f32 %v8860_v23, %v8860_v23 }
0x194d   :  { %v2805_v57 = vpop.permute.xlu1 %2804 }
0x194e   :  { %v8862_v60 = vadd.f32 %v2805_v57, %v2796_v7  ;;  %v3054_v47 = vsel %vm207_vm3, %v3048_v34, 0.0 }
0x1950   :  { %v7440_v29 = vpack.c.bf16 %v8860_v23, %v8862_v60  ;;  %v3047_v11 = vmul.f32 %v8862_v60, %v8862_v60 }
0x1952   :  { %7441 = vmatpush3.bf16.msra.mxu1 %v7440_v29  ;;  %v2809_v10 = vpop.permute.xlu1 %2808  ;;  %v3051_v25 = vsel %vm207_vm3, %v3047_v11, 0.0 }
0x1953   :  { %v8872_v27 = vadd.f32 %v2809_v10, %v2798_v42  ;;  %3052 = vadd.xlane.f32.xlu0 %v3051_v25  ;;  %7442 = vmatprep.subr.bf16.mxu1 %v8088_v0 }
0x1955   :  { %v3049_v52 = vmul.f32 %v8872_v27, %v8872_v27 }
0x1956   :  { %v2811_v35 = vpop.permute.xlu1 %2810 }
0x1957   :  { %v8879_v18 = vadd.f32 %v2811_v35, %v2799_v32  ;;  %v3057_v40 = vsel %vm207_vm3, %v3049_v52, 0.0 }
0x1958   :  { %3058 = vadd.xlane.f32.xlu0 %v3057_v40 }
0x1959   :  { %v7443_v51 = vpack.c.bf16 %v8879_v18, %v8872_v27  ;;  %v3050_v61 = vmul.f32 %v8879_v18, %v8879_v18 }
0x195b   :  { %7444 = vmatpush3.bf16.msra.mxu1 %v7443_v51  ;;  %v3060_v22 = vsel %vm207_vm3, %v3050_v61, 0.0 }
0x195c   :  { %3061 = vadd.xlane.f32.xlu0 %v3060_v22  ;;  %7451 = vmatprep.subr.bf16.mxu1 %v8088_v0 }
0x195e   :  { %6993 = vmatmul.mubr.msk.f32.vlgmr.msra.gmra.mrb[26].mxu1 %vm126_vm1, %v8888_v54 }
0x195f   :  { %7453 = vmatpush3.bf16.msra.mxu1 %v8352_v12  ;;  %7014 = vmatprep.mubr.msk.f32.mxu1 %vm8089_vm0, %v8090_v1 }
0x1960   :  { %7454 = vmatprep.subr.bf16.mxu1 %v8088_v0 }
0x1963   :  { %7456 = vmatpush3.bf16.msra.mxu1 %v8355_v14 }
0x1964   :  { %7465 = vmatprep.subr.bf16.mxu1 %v8088_v0 }
0x19e0   :  { %v3053_v28 = vpop.xlane.xlu0 %3052 }
0x19e1   :  { %v3063_v6 = vadd.f32 1e-08, %v3053_v28 }
0x19e3   :  { %7791 = vrsqrt.f32 %v3063_v6 }
0x19e5   :  { %v3059_v38 = vpop.xlane.xlu0 %3058 }
0x19e6   :  { %v3065_v7 = vadd.f32 1e-08, %v3059_v38 }
0x19e9   :  { %v3062_v50 = vpop.xlane.xlu0 %3061 }
0x19ea   :  { %v3066_v20 = vadd.f32 1e-08, %v3062_v50 }
0x19ed   :  { %v7792_v37 = vpop.eup %7791 }
0x19ee   :  { %v3071_v24 = vmul.f32 %v7792_v37, %v8862_v60 }
0x1a31   :  { %v2889_v33 = vpop.f32.mrb[26].mxu1 }
0x1a32   :  { %2896 = vrot.lane.b32.xlu1 %v2889_v33, %s8092_s14  ;;  %v6994_v9 = vpop.f32.mrb[27].mxu1 }
0x1a56   :  { %3055 = vadd.xlane.f32.xlu1 %v3054_v47 }
0x1aa4   :  { %v2897_v49 = vpop.permute.xlu1 %2896 }
0x1aa5   :  { %v2899_v13 = vsel %vm207_vm3, %v2894_v43, %v2897_v49 }
0x1aa6   :  { %7004 = vmatmul.mubr.msk.f32.vlgmr.msra.gmra.mrb[28].mxu0 %vm126_vm1, %v2899_v13 }
0x1aa7   :  { %7025 = vmatprep.mubr.msk.f32.mxu0 %vm8089_vm0, %v8090_v1 }
0x1ae3   :  { %v3056_v19 = vpop.xlane.xlu1 %3055 }
0x1ae4   :  { %v3064_v15 = vadd.f32 1e-08, %v3056_v19 }
0x1ae6   :  { %7793 = vrsqrt.f32 %v3064_v15 }
0x1ae7   :  { %7795 = vrsqrt.f32 %v3066_v20 }
0x1ae8   :  { %7797 = vrsqrt.f32 %v3065_v7 }
0x1af0   :  { %v7794_v57 = vpop.eup %7793 }
0x1af1   :  { %v3072_v31 = vmul.f32 %v7794_v57, %v8860_v23  ;;  %v7796_v11 = vpop.eup %7795 }
0x1af2   :  { %v7798_v39 = vpop.eup %7797  ;;  %v3074_v21 = vmul.f32 %v7796_v11, %v8879_v18 }
0x1af3   :  { %v7458_v29 = vpack.c.bf16 %v3072_v31, %v3071_v24  ;;  %v3073_v42 = vmul.f32 %v7798_v39, %v8872_v27 }
0x1af5   :  { %7460 = vmatpush3.bf16.xpose.msk.msra.mxu0 %vm8368_vm5, %v7458_v29  ;;  %v7462_v10 = vpack.c.bf16 %v3074_v21, %v3073_v42 }
0x1af6   :  { %7461 = vmatprep.subr.bf16.mxu0 %v8088_v0 }
0x1afd   :  { %7464 = vmatpush3.bf16.xpose.msk.msra.mxu0 %vm8368_vm5, %v7462_v10 }
0x1afe   :  { %7473 = vmatprep.subr.bf16.mxu0 %v8088_v0 }
0x1b79   :  { %v2969_v25 = vpop.f32.mrb[28].mxu0 }
0x1b7a   :  { %v2970_v59 = vadd.f32 %v8733_v46, %v2969_v25  ;;  %v7005_v36 = vpop.f32.mrb[29].mxu0 }
0x1b7c   :  { %v2973_v32 = vmax.f32 %v2970_v59, 0.0 }
0x1b7e   :  { %7015 = vmatmul.mubr.msk.f32.vlgmr.msra.gmra.mrb[28].mxu1 %vm126_vm1, %v2973_v32 }
0x1b7f   :  { %7468 = vmatpush3.bf16.xpose.msk.msra.mxu1 %vm8368_vm5, %v7458_v29  ;;  %7036 = vmatprep.mubr.msk.f32.mxu1 %vm8089_vm0, %v8090_v1 }
0x1b80   :  { %7469 = vmatprep.subr.bf16.mxu1 %v8088_v0 }
0x1b87   :  { %7472 = vmatpush3.bf16.xpose.msk.msra.mxu1 %vm8368_vm5, %v7462_v10 }
0x1c51   :  { %v3043_v52 = vpop.f32.mrb[28].mxu1 }
0x1c52   :  { %v3044_v35 = vadd.f32 %v8747_v62, %v3043_v52  ;;  %v7016_v40 = vpop.f32.mrb[29].mxu1 }
0x1c54   :  { %7799 = vtanh.f32 %v3044_v35  ;;  %v3079_v46 = vand.u32 2147483647, %v3044_v35  ;;  %v3076_v38 = vmax.f32 %v3044_v35, 0.0  ;;  %vm3077_vm15 = vcmp.ne.f32.partialorder %v3044_v35, %v3044_v35 }
0x1c55   :  { %v6388_v24 = vmul.f32 -1.442695, %v3044_v35 }
0x1c56   :  { %v3080_v41 = vsub.f32 0.0, %v3079_v46 }
0x1c58   :  { %v3081_v51 = vmul.f32 1.442695, %v3080_v41 }
0x1c5a   :  { %7801 = vpow2.f32 %v3081_v51 }
0x1c5e   :  { %v7800_v61 = vpop.eup %7799 }
0x1c5f   :  { %v3100_v4 = vmul.f32 %v7800_v61, %v7800_v61 }
0x1c61   :  { %v3101_v22 = vsel %vm663_vm6, %v3100_v4, 0.0 }
0x1c62   :  { %3102 = vadd.xlane.f32.xlu0 %v3101_v22 }
0x1c64   :  { %v7802_v33 = vpop.eup %7801 }
0x1c65   :  { %v3083_v9 = vadd.f32 1.0, %v7802_v33  ;;  %v3086_v34 = vmul.f32 -0.5, %v7802_v33  ;;  %v3089_v43 = vand.u32 2147483647, %v7802_v33 }
0x1c67   :  { %7803 = vlog2.f32 %v3083_v9  ;;  %v3087_v47 = vadd.f32 1.0, %v3086_v34  ;;  %vm3090_vm14 = vcmp.lt.f32.partialorder %v3089_v43, 0.0004427343 }
0x1c69   :  { %v3088_v62 = vmul.f32 %v7802_v33, %v3087_v47 }
0x1c71   :  { %v7804_v49 = vpop.eup %7803 }
0x1c72   :  { %v3085_v13 = vmul.f32 0.6931472, %v7804_v49 }
0x1c74   :  { %v3091_v28 = vsel %vm3090_vm14, %v3088_v62, %v3085_v13 }
0x1c75   :  { %v3092_v6 = vadd.f32 %v3091_v28, %v3076_v38 }
0x1c77   :  { %v8929_v50 = vsel %vm3077_vm15, %v3044_v35, %v3092_v6 }
0x1c78   :  { %3224 = vrot.lane.b32.xlu0 %v3100_v4, %s8094_s19 }
0x1c7c   :  { %3194 = vperm.xlu0 %7651, %v8929_v50  }
0x1c80   :  { %7652 = vset.pattern.permute.xlu0 %v8095_v16 }
0x1cef   :  { %v3103_v19 = vpop.xlane.xlu0 %3102 }
0x1cf0   :  { %v3104_v15 = vadd.f32 1e-08, %v3103_v19 }
0x1cf2   :  { %7805 = vrsqrt.f32 %v3104_v15 }
0x1cf3   :  { %v3225_v20 = vpop.permute.xlu0 %3224  ;;  %7807 = vpow2.f32 %v6388_v24 }
0x1cf4   :  { %v3227_v7 = vsel %vm663_vm6, %v3225_v20, 0.0 }
0x1cf5   :  { %3228 = vadd.xlane.f32.xlu1 %v3227_v7 }
0x1cfb   :  { %v3195_v25 = vpop.permute.xlu0 %3194 }
0x1cfc   :  { %v7806_v37 = vpop.eup %7805 }
0x1cfd   :  { %v3106_v57 = vmul.f32 %v7806_v37, %v7800_v61  ;;  %v7808_v11 = vpop.eup %7807 }
0x1cfe   :  { %v3097_v39 = vadd.f32 1.0, %v7808_v11 }
0x1cff   :  { %7026 = vmatmul.mubr.msk.f32.vlgmr.msra.gmra.mrb[30].mxu0 %vm207_vm3, %v3106_v57 }
0x1d00   :  { %7475 = vmatpush3.bf16.msra.mxu0 %v8250_v5  ;;  %7047 = vmatprep.mubr.msk.f32.mxu0 %vm8089_vm0, %v8090_v1 }
0x1d01   :  { %7476 = vmatprep.subr.bf16.mxu0 %v8088_v0 }
0x1d04   :  { %7478 = vmatpush3.bf16.msra.mxu0 %v8259_v8 }
0x1d05   :  { %7479 = vmatprep.subr.bf16.mxu0 %v8088_v0 }
0x1d07   :  { %7048 = vmatmul.mubr.msk.f32.vlgmr.msra.gmra.mrb[32].mxu0 %vm126_vm1, %v2973_v32 }
0x1d08   :  { %7066 = vmatprep.mubr.msk.f32.mxu0 %vm8089_vm0, %v8090_v1 }
0x1d82   :  { %v3229_v31 = vpop.xlane.xlu1 %3228 }
0x1d83   :  { %v3230_v29 = vadd.f32 1e-08, %v3229_v31 }
0x1d85   :  { %7809 = vrsqrt.f32 %v3230_v29 }
0x1d86   :  { %7811 = vrcp.f32 %v3097_v39 }
0x1d8f   :  { %v7810_v21 = vpop.eup %7809 }
0x1d90   :  { %v3232_v42 = vmul.f32 %v7810_v21, %v7800_v61  ;;  %v8945_v10 = vpop.eup %7811 }
0x1d91   :  { %v3215_v13 = vsub.f32 1.0, %v8945_v10 }
0x1d92   :  { %3234 = vrot.lane.b32.xlu0 %v3232_v42, %s8094_s19 }
0x1d96   :  { %3211 = vperm.xlu0 %7652, %v8945_v10  }
0x1dd2   :  { %v3188_v59 = vpop.f32.mrb[30].mxu0 }
0x1dd3   :  { %v3197_v36 = vmul.f32 %v3195_v25, %v3188_v59  ;;  %v7027_v32 = vpop.f32.mrb[31].mxu0 }
0x1dd5   :  { %v3198_v52 = vsel %vm761_vm9, %v3197_v36, -inf }
0x1dd6   :  { %3199 = vmax.xlane.f32.xlu1 %v3198_v52  ;;  %v3335_v52 = vsel %vm207_vm3, %v8862_v60, 0.0 }
0x1dda   :  { %v3456_v35 = vpop.f32.mrb[32].mxu0 }
0x1ddb   :  { %v3457_v40 = vadd.f32 %v8775_v63, %v3456_v35  ;;  %v7049_v46 = vpop.f32.mrb[33].mxu0 }
0x1ddc   :  { %v3338_v46 = vsel %vm207_vm3, %v8872_v27, 0.0 }
0x1ddd   :  { %v6400_v41 = vmul.f32 -1.442695, %v3457_v40 }
0x1ddf   :  { %7813 = vpow2.f32 %v6400_v41 }
0x1de0   :  { %7815 = vtanh.f32 %v3457_v40  ;;  %v3336_v40 = vsel %vm207_vm3, %v8860_v23, 0.0 }
0x1de1   :  { %v3337_v41 = vadd.f32 %v3336_v40, %v3335_v52 }
0x1de9   :  { %v7814_v51 = vpop.eup %7813 }
0x1dea   :  { %v3463_v61 = vadd.f32 1.0, %v7814_v51  ;;  %v7816_v4 = vpop.eup %7815  ;;  %v3340_v51 = vsel %vm207_vm3, %v8879_v18, 0.0 }
0x1dec   :  { %7817 = vrcp.f32 %v3463_v61  ;;  %v3339_v61 = vadd.f32 %v3338_v46, %v3337_v41 }
0x1df6   :  { %v7818_v22 = vpop.eup %7817 }
0x1df7   :  { %v3467_v33 = vsel %vm207_vm3, %v7818_v22, %v7816_v4  ;;  %v3341_v4 = vadd.f32 %v3340_v51, %v3339_v61 }
0x1df8   :  { %7050 = vmatprep.subr.msk.mxu1 %vm254_vm4, %v3467_v33 }
0x1e04   :  { %v3235_v9 = vpop.permute.xlu0 %3234 }
0x1e05   :  { %7037 = vmatmul.mubr.msk.f32.vlgmr.msra.gmra.mrb[30].mxu1 %vm207_vm3, %v3235_v9  ;;  %v3342_v9 = vrot.slane %v3341_v4, 4 }
0x1e06   :  { %7051 = vmatpush3.msk.msra.mxu1 %vm254_vm4, %v3467_v33 }
0x1e07   :  { %7485 = vmatprep.subr.bf16.mxu1 %v8088_v0 }
0x1e15   :  { %v3212_v57 = vpop.permute.xlu0 %3211 }
0x1e63   :  { %v3200_v63 = vpop.xlane.xlu1 %3199 }
0x1e64   :  { %v3201_v34 = vsub.f32 %v3197_v36, %v3200_v63  ;;  %v3343_v63 = vadd.f32 %v3342_v9, %v3341_v4 }
0x1e66   :  { %v3202_v47 = vmul.f32 1.442695, %v3201_v34  ;;  %v3344_v34 = vrot.slane %v3343_v63, 2 }
0x1e68   :  { %7819 = vpow2.f32 %v3202_v47  ;;  %v3345_v47 = vadd.f32 %v3344_v34, %v3343_v63 }
0x1e72   :  { %v7820_v43 = vpop.eup %7819 }
0x1e73   :  { %v3204_v49 = vsel %vm761_vm9, %v7820_v43, 0.0 }
0x1e74   :  { %3205 = vadd.xlane.f32.xlu1 %v3204_v49 }
0x1e85   :  { %3218 = vperm.xlu1 %7653, %v3215_v13  }
0x1e89   :  { %7654 = vset.pattern.permute.xlu1 %v8096_v53 }
0x1e8a   :  { %3309 = vperm.xlu1 %7654, %v8929_v50  }
0x1e8e   :  { %7655 = vset.pattern.permute.xlu1 %v8097_v2 }
0x1ed8   :  { %v3304_v62 = vpop.f32.mrb[30].mxu1 }
0x1ed9   :  { %v7038_v28 = vpop.f32.mrb[31].mxu1 }
0x1f01   :  { %v3206_v38 = vpop.xlane.xlu1 %3205 }
0x1f02   :  { %7821 = vrcp.f32 %v3206_v38 }
0x1f05   :  { %v3219_v6 = vpop.permute.xlu1 %3218 }
0x1f06   :  { %v3221_v31 = vmul.f32 %v3219_v6, %v8790_v48 }
0x1f09   :  { %v3310_v19 = vpop.permute.xlu1 %3309 }
0x1f0a   :  { %v3312_v15 = vmul.f32 %v3310_v19, %v3304_v62 }
0x1f0c   :  { %v7822_v20 = vpop.eup %7821  ;;  %v3313_v7 = vsel %vm761_vm9, %v3312_v15, -inf }
0x1f0d   :  { %v3208_v37 = vmul.f32 %v7822_v20, %v7820_v43  ;;  %3314 = vmax.xlane.f32.xlu1 %v3313_v7  ;;  %v3346_v43 = vrot.slane %v3345_v47, 1 }
0x1f0f   :  { %v3214_v24 = vmul.f32 %v3212_v57, %v3208_v37  ;;  %v3347_v49 = vadd.f32 %v3346_v43, %v3345_v47 }
0x1f11   :  { %v8962_v29 = vadd.f32 %v3221_v31, %v3214_v24 }
0x1f13   :  { %3468 = vxpose.xlu0.b32.start.end [1/1] (short) (narrow) %v8962_v29, 32 }
0x1f1e   :  { %3325 = vperm.xlu1 %7655, %v8945_v10  }
0x1f22   :  { %3330 = vperm.xlu1 %7655, %v3215_v13   ;;  %v3348_v13 = vmul.f32 0.03125, %v3347_v49 }
0x1f24   :  { %v3349_v62 = vsub.f32 %v8862_v60, %v3348_v13  ;;  %v3350_v28 = vsub.f32 %v8860_v23, %v3348_v13  ;;  %v3351_v19 = vsub.f32 %v8872_v27, %v3348_v13  ;;  %v3352_v7 = vsub.f32 %v8879_v18, %v3348_v13 }
0x1f26   :  { %7658 = vset.pattern.permute.xlu1 %v8095_v16  ;;  %v3353_v38 = vmul.f32 %v3349_v62, %v3349_v62  ;;  %v3354_v6 = vmul.f32 %v3350_v28, %v3350_v28  ;;  %v3355_v37 = vmul.f32 %v3351_v19, %v3351_v19  ;;  %v3356_v24 = vmul.f32 %v3352_v7, %v3352_v7 }
0x1f28   :  { %v3358_v20 = vsel %vm207_vm3, %v3354_v6, 0.0  ;;  %v3360_v31 = vsel %vm207_vm3, %v3355_v37, 0.0  ;;  %v3362_v60 = vsel %vm207_vm3, %v3356_v24, 0.0 }
0x1f3c   :  { %7656 = vset.pattern.permute.xlu0 %v8093_v44 }
0x1f93   :  { %v3484_v50 = vpop.trf.xlu0 }
0x1f94   :  { %7052 = vmatprep.mubr.msk.f32.mxu1 %vm241_vm2, %v3484_v50 }
0x1f97   :  { %v3485_v11 = vpop.trf.xlu0 }
0x1f98   :  { %7053 = vmatmul.mubr.msk.f32.vlgmr.msra.gmra.mrb[32].mxu1 %vm241_vm2, %v3485_v11 }
0x1f99   :  { %7487 = vmatpush3.bf16.msra.mxu1 %v8331_v56 }
0x1f9a   :  { %v3315_v48 = vpop.xlane.xlu1 %3314  ;;  %7488 = vmatprep.subr.bf16.mxu1 %v8088_v0 }
0x1f9b   :  { %v3316_v39 = vsub.f32 %v3312_v15, %v3315_v48  ;;  %v3486_v21 = vpop.trf.xlu0  ;;  %v3357_v15 = vsel %vm207_vm3, %v3353_v38, 0.0 }
0x1f9c   :  { %7055 = vmatprep.mubr.msk.f32.mxu1 %vm241_vm2, %v3486_v21  ;;  %v3359_v57 = vadd.f32 %v3358_v20, %v3357_v15 }
0x1f9d   :  { %v3317_v42 = vmul.f32 1.442695, %v3316_v39  ;;  %7490 = vmatpush3.bf16.msra.mxu1 %v8337_v58 }
0x1f9e   :  { %7497 = vmatprep.subr.bf16.mxu1 %v8088_v0  ;;  %v3361_v50 = vadd.f32 %v3360_v31, %v3359_v57  ;;  %v3326_v18 = vpop.permute.xlu1 %3325 }
0x1f9f   :  { %7823 = vpow2.f32 %v3317_v42  ;;  %v3487_v25 = vpop.trf.xlu0 }
0x1fa0   :  { %7056 = vmatmul.mubr.msk.f32.gmra.mrb[34].mxu1 %vm241_vm2, %v3487_v25  ;;  %v3363_v11 = vadd.f32 %v3362_v60, %v3361_v50 }
0x1fa1   :  { %7077 = vmatprep.mubr.msk.f32.mxu1 %vm8089_vm0, %v8090_v1 }
0x1fa2   :  { %v3364_v23 = vrot.slane %v3363_v11, 4  ;;  %v3331_v51 = vpop.permute.xlu1 %3330 }
0x1fa4   :  { %v3365_v48 = vadd.f32 %v3364_v23, %v3363_v11 }
0x1fa6   :  { %v3366_v39 = vrot.slane %v3365_v48, 2 }
0x1fa8   :  { %v3367_v21 = vadd.f32 %v3366_v39, %v3365_v48 }
0x1fa9   :  { %v8978_v59 = vpop.eup %7823 }
0x1faa   :  { %v3319_v36 = vsel %vm761_vm9, %v8978_v59, 0.0  ;;  %v3368_v27 = vrot.slane %v3367_v21, 1 }
0x1fab   :  { %3320 = vadd.xlane.f32.xlu0 %v3319_v36 }
0x1fac   :  { %v3369_v42 = vadd.f32 %v3368_v27, %v3367_v21 }
0x1fae   :  { %v3370_v25 = vmul.f32 0.03125, %v3369_v42 }
0x1fb0   :  { %v3371_v36 = vadd.f32 1e-05, %v3370_v25  ;;  %v3333_v25 = vmul.f32 %v3331_v51, %v8888_v54 }
0x1fb2   :  { %7825 = vrsqrt.f32 %v3371_v36 }
0x1fbc   :  { %v7826_v52 = vpop.eup %7825 }
0x1fbd   :  { %v3374_v40 = vmul.f32 %v7826_v52, %v3350_v28  ;;  %v3373_v46 = vmul.f32 %v7826_v52, %v3349_v62  ;;  %v3375_v9 = vmul.f32 %v7826_v52, %v3351_v19  ;;  %v3376_v28 = vmul.f32 %v7826_v52, %v3352_v7 }
0x1fbf   :  { %v3378_v61 = vmul.f32 %v8845_v3, %v3374_v40  ;;  %v3377_v4 = vmul.f32 %v8845_v3, %v3373_v46  ;;  %v3379_v13 = vmul.f32 %v8845_v3, %v3375_v9  ;;  %v3702_v46 = vld [vmem:[#allocation2 + $0x8] sm:$0x3] }
0x1fc1   :  { %v3382_v43 = vadd.f32 %v8854_v17, %v3378_v61  ;;  %v3381_v49 = vadd.f32 %v8854_v17, %v3377_v4 }
0x2038   :  { %v3321_v41 = vpop.xlane.xlu0 %3320 }
0x2039   :  { %7827 = vrcp.f32 %v3321_v41 }
0x2043   :  { %v7828_v7 = vpop.eup %7827 }
0x206b   :  { %v8982_v32 = vpop.f32.mrb[32].mxu1 }
0x206c   :  { %3614 = vrot.lane.b32.xlu1 %v8982_v32, %s8091_s16  ;;  %v3581_v35 = vpop.f32.mrb[33].mxu1  ;;  %v3601_v63 = vsub.f32 1.0, %v8982_v32  ;;  %v3383_v32 = vadd.f32 %v8854_v17, %v3379_v13 }
0x206d   :  { %v3600_v34 = vsub.f32 1.0, %v3581_v35 }
0x206e   :  { %v3605_v62 = vmul.f32 %v3601_v63, %v3382_v43 }
0x206f   :  { %v3604_v38 = vmul.f32 %v3600_v34, %v3381_v49 }
0x2070   :  { %3612 = vrot.lane.b32.xlu1 %v3581_v35, %s8091_s16  ;;  %v3380_v35 = vmul.f32 %v8845_v3, %v3376_v28  ;;  %v3323_v3 = vmul.f32 %v7828_v7, %v8978_v59 }
0x2072   :  { %v3384_v11 = vadd.f32 %v8854_v17, %v3380_v35  ;;  %v3328_v27 = vmul.f32 %v3326_v18, %v3323_v3  ;;  %v9092_v3 = vld [vmem:[%s9599_s10] ss:$0 sm:$0xff] }
0x2073   :  { %v8995_v22 = vpop.f32.mrb[34].mxu1 }
0x2074   :  { %v8997_v33 = vpop.f32.mrb[35].mxu1  ;;  %v3603_v24 = vsub.f32 1.0, %v8995_v22  ;;  %v9046_v36 = vadd.f32 %v3333_v25, %v3328_v27 }
0x2075   :  { %3616 = vrot.lane.b32.xlu1 %v8997_v33, %s8091_s16  ;;  %v3602_v6 = vsub.f32 1.0, %v8997_v33 }
0x2076   :  { %v3607_v23 = vmul.f32 %v3603_v24, %v3384_v11  ;;  %v9078_v24 = vld [vmem:[%s9595_s6] ss:$0 sm:$0xff] }
0x2077   :  { %v3606_v31 = vmul.f32 %v3602_v6, %v3383_v32 }
0x2079   :  { %3618 = vrot.lane.b32.xlu1 %v8995_v22, %s8091_s16 }
0x20de   :  { %v3615_v47 = vpop.permute.xlu1 %3614 }
0x20df   :  { %v9018_v20 = vadd.f32 %v3615_v47, %v3605_v62 }
0x20e1   :  { %v3856_v18 = vmul.f32 %v9018_v20, %v9018_v20 }
0x20e2   :  { %v3613_v15 = vpop.permute.xlu1 %3612 }
0x20e3   :  { %v9020_v37 = vadd.f32 %v3613_v15, %v3604_v38  ;;  %v3862_v40 = vsel %vm207_vm3, %v3856_v18, 0.0 }
0x20e5   :  { %v7480_v19 = vpack.c.bf16 %v9018_v20, %v9020_v37  ;;  %v3855_v57 = vmul.f32 %v9020_v37, %v9020_v37 }
0x20e7   :  { %7481 = vmatpush3.bf16.msra.mxu0 %v7480_v19  ;;  %v3617_v33 = vpop.permute.xlu1 %3616  ;;  %v3859_v50 = vsel %vm207_vm3, %v3855_v57, 0.0 }
0x20e8   :  { %v9030_v60 = vadd.f32 %v3617_v33, %v3606_v31  ;;  %3860 = vadd.xlane.f32.xlu0 %v3859_v50  ;;  %7482 = vmatprep.subr.bf16.mxu0 %v8088_v0 }
0x20ea   :  { %v3857_v48 = vmul.f32 %v9030_v60, %v9030_v60 }
0x20eb   :  { %v3619_v39 = vpop.permute.xlu1 %3618 }
0x20ec   :  { %v9037_v22 = vadd.f32 %v3619_v39, %v3607_v23  ;;  %v3865_v21 = vsel %vm207_vm3, %v3857_v48, 0.0 }
0x20ed   :  { %3866 = vadd.xlane.f32.xlu0 %v3865_v21 }
0x20ee   :  { %v7483_v42 = vpack.c.bf16 %v9037_v22, %v9030_v60  ;;  %v3858_v17 = vmul.f32 %v9037_v22, %v9037_v22 }
0x20f0   :  { %7484 = vmatpush3.bf16.msra.mxu0 %v7483_v42  ;;  %v3868_v59 = vsel %vm207_vm3, %v3858_v17, 0.0 }
0x20f1   :  { %3869 = vadd.xlane.f32.xlu0 %v3868_v59  ;;  %7491 = vmatprep.subr.bf16.mxu0 %v8088_v0 }
0x20f3   :  { %7067 = vmatmul.mubr.msk.f32.vlgmr.msra.gmra.mrb[34].mxu0 %vm126_vm1, %v9046_v36 }
0x20f4   :  { %7493 = vmatpush3.bf16.msra.mxu0 %v8352_v12  ;;  %7088 = vmatprep.mubr.msk.f32.mxu0 %vm8089_vm0, %v8090_v1 }
0x20f5   :  { %7494 = vmatprep.subr.bf16.mxu0 %v8088_v0 }
0x20f8   :  { %7496 = vmatpush3.bf16.msra.mxu0 %v8355_v14 }
0x20f9   :  { %7505 = vmatprep.subr.bf16.mxu0 %v8088_v0 }
0x2175   :  { %v3861_v61 = vpop.xlane.xlu0 %3860 }
0x2176   :  { %v3871_v9 = vadd.f32 1e-08, %v3861_v61 }
0x2178   :  { %7829 = vrsqrt.f32 %v3871_v9 }
0x217a   :  { %v3867_v4 = vpop.xlane.xlu0 %3866 }
0x217b   :  { %v3873_v49 = vadd.f32 1e-08, %v3867_v4 }
0x217e   :  { %v3870_v63 = vpop.xlane.xlu0 %3869 }
0x217f   :  { %v3874_v43 = vadd.f32 1e-08, %v3870_v63 }
0x2182   :  { %v7830_v13 = vpop.eup %7829 }
0x2183   :  { %v3879_v62 = vmul.f32 %v7830_v13, %v9020_v37 }
0x21c6   :  { %v3697_v54 = vpop.f32.mrb[34].mxu0 }
0x21c7   :  { %3704 = vrot.lane.b32.xlu1 %v3697_v54, %s8092_s14  ;;  %v7068_v52 = vpop.f32.mrb[35].mxu0 }
0x21eb   :  { %3863 = vadd.xlane.f32.xlu1 %v3862_v40 }
0x2239   :  { %v3705_v41 = vpop.permute.xlu1 %3704 }
0x223a   :  { %v3707_v51 = vsel %vm207_vm3, %v3702_v46, %v3705_v41 }
0x223b   :  { %7078 = vmatmul.mubr.msk.f32.vlgmr.msra.gmra.mrb[36].mxu1 %vm126_vm1, %v3707_v51 }
0x223c   :  { %7099 = vmatprep.mubr.msk.f32.mxu1 %vm8089_vm0, %v8090_v1 }
0x2278   :  { %v3864_v34 = vpop.xlane.xlu1 %3863 }
0x2279   :  { %v3872_v47 = vadd.f32 1e-08, %v3864_v34 }
0x227b   :  { %7831 = vrsqrt.f32 %v3872_v47 }
0x227c   :  { %7833 = vrsqrt.f32 %v3874_v43 }
0x227d   :  { %7835 = vrsqrt.f32 %v3873_v49 }
0x2285   :  { %v7832_v28 = vpop.eup %7831 }
0x2286   :  { %v3880_v38 = vmul.f32 %v7832_v28, %v9018_v20  ;;  %v7834_v15 = vpop.eup %7833 }
0x2287   :  { %v7836_v32 = vpop.eup %7835  ;;  %v3882_v35 = vmul.f32 %v7834_v15, %v9037_v22 }
0x2288   :  { %v7498_v6 = vpack.c.bf16 %v3880_v38, %v3879_v62  ;;  %v3881_v19 = vmul.f32 %v7836_v32, %v9030_v60 }
0x228a   :  { %7500 = vmatpush3.bf16.xpose.msk.msra.mxu1 %vm8368_vm5, %v7498_v6  ;;  %v7502_v57 = vpack.c.bf16 %v3882_v35, %v3881_v19 }
0x228b   :  { %7501 = vmatprep.subr.bf16.mxu1 %v8088_v0 }
0x2292   :  { %7504 = vmatpush3.bf16.xpose.msk.msra.mxu1 %vm8368_vm5, %v7502_v57 }
0x2293   :  { %7513 = vmatprep.subr.bf16.mxu1 %v8088_v0 }
0x230e   :  { %v3777_v7 = vpop.f32.mrb[36].mxu1 }
0x230f   :  { %v3778_v31 = vadd.f32 %v9078_v24, %v3777_v7  ;;  %v7079_v33 = vpop.f32.mrb[37].mxu1 }
0x2311   :  { %v3781_v50 = vmax.f32 %v3778_v31, 0.0 }
0x2313   :  { %7089 = vmatmul.mubr.msk.f32.vlgmr.msra.gmra.mrb[36].mxu0 %vm126_vm1, %v3781_v50 }
0x2314   :  { %7508 = vmatpush3.bf16.xpose.msk.msra.mxu0 %vm8368_vm5, %v7498_v6  ;;  %7110 = vmatprep.mubr.msk.f32.mxu0 %vm8089_vm0, %v8090_v1 }
0x2315   :  { %7509 = vmatprep.subr.bf16.mxu0 %v8088_v0 }
0x231c   :  { %7512 = vmatpush3.bf16.xpose.msk.msra.mxu0 %vm8368_vm5, %v7502_v57 }
0x23e6   :  { %v3851_v11 = vpop.f32.mrb[36].mxu0 }
0x23e7   :  { %v3852_v23 = vadd.f32 %v9092_v3, %v3851_v11  ;;  %v7090_v48 = vpop.f32.mrb[37].mxu0 }
0x23e8   :  { %v9120_v48 = vld [vmem:[%s9597_s8] ss:$0 sm:$0xff] }
0x23e9   :  { %7837 = vtanh.f32 %v3852_v23  ;;  %v3887_v39 = vand.u32 2147483647, %v3852_v23  ;;  %v3884_v4 = vmax.f32 %v3852_v23, 0.0  ;;  %vm3885_vm8 = vcmp.ne.f32.partialorder %v3852_v23, %v3852_v23 }
0x23ea   :  { %v6409_v62 = vmul.f32 -1.442695, %v3852_v23 }
0x23eb   :  { %v3888_v21 = vsub.f32 0.0, %v3887_v39 }
0x23ed   :  { %v3889_v27 = vmul.f32 1.442695, %v3888_v21 }
0x23ef   :  { %7839 = vpow2.f32 %v3889_v27 }
0x23f3   :  { %v7838_v42 = vpop.eup %7837 }
0x23f4   :  { %v3908_v17 = vmul.f32 %v7838_v42, %v7838_v42 }
0x23f6   :  { %v3909_v25 = vsel %vm663_vm6, %v3908_v17, 0.0 }
0x23f7   :  { %3910 = vadd.xlane.f32.xlu0 %v3909_v25 }
0x23f9   :  { %v7840_v59 = vpop.eup %7839 }
0x23fa   :  { %v3891_v54 = vadd.f32 1.0, %v7840_v59  ;;  %v3894_v52 = vmul.f32 -0.5, %v7840_v59  ;;  %v3897_v40 = vand.u32 2147483647, %v7840_v59 }
0x23fc   :  { %7841 = vlog2.f32 %v3891_v54  ;;  %v3895_v18 = vadd.f32 1.0, %v3894_v52  ;;  %vm3898_vm7 = vcmp.lt.f32.partialorder %v3897_v40, 0.0004427343 }
0x23fe   :  { %v3896_v51 = vmul.f32 %v7840_v59, %v3895_v18 }
0x2406   :  { %v7842_v46 = vpop.eup %7841 }
0x2407   :  { %v3893_v41 = vmul.f32 0.6931472, %v7842_v46 }
0x2409   :  { %v3899_v61 = vsel %vm3898_vm7, %v3896_v51, %v3893_v41 }
0x240a   :  { %v3900_v9 = vadd.f32 %v3899_v61, %v3884_v4 }
0x240c   :  { %v9097_v63 = vsel %vm3885_vm8, %v3852_v23, %v3900_v9 }
0x240d   :  { %4032 = vrot.lane.b32.xlu0 %v3908_v17, %s8094_s19 }
0x2411   :  { %4002 = vperm.xlu0 %7656, %v9097_v63  }
0x2415   :  { %7657 = vset.pattern.permute.xlu0 %v8095_v16 }
0x2484   :  { %v3911_v34 = vpop.xlane.xlu0 %3910 }
0x2485   :  { %v3912_v47 = vadd.f32 1e-08, %v3911_v34 }
0x2487   :  { %7843 = vrsqrt.f32 %v3912_v47 }
0x2488   :  { %v4033_v43 = vpop.permute.xlu0 %4032  ;;  %7845 = vpow2.f32 %v6409_v62 }
0x2489   :  { %v4035_v49 = vsel %vm663_vm6, %v4033_v43, 0.0 }
0x248a   :  { %4036 = vadd.xlane.f32.xlu1 %v4035_v49 }
0x2490   :  { %v4003_v7 = vpop.permute.xlu0 %4002 }
0x2491   :  { %v7844_v13 = vpop.eup %7843 }
0x2492   :  { %v3914_v28 = vmul.f32 %v7844_v13, %v7838_v42  ;;  %v7846_v15 = vpop.eup %7845 }
0x2493   :  { %v3905_v32 = vadd.f32 1.0, %v7846_v15 }
0x2494   :  { %7100 = vmatmul.mubr.msk.f32.vlgmr.msra.gmra.mrb[38].mxu1 %vm207_vm3, %v3914_v28 }
0x2495   :  { %7515 = vmatpush3.bf16.msra.mxu1 %v8250_v5  ;;  %7121 = vmatprep.mubr.msk.f32.mxu1 %vm8089_vm0, %v8090_v1 }
0x2496   :  { %7516 = vmatprep.subr.bf16.mxu1 %v8088_v0 }
0x2499   :  { %7518 = vmatpush3.bf16.msra.mxu1 %v8259_v8 }
0x249a   :  { %7519 = vmatprep.subr.bf16.mxu1 %v8088_v0 }
0x249c   :  { %7122 = vmatmul.mubr.msk.f32.vlgmr.msra.gmra.mrb[40].mxu1 %vm126_vm1, %v3781_v50 }
0x249d   :  { %7140 = vmatprep.mubr.msk.f32.mxu1 %vm8089_vm0, %v8090_v1 }
0x2517   :  { %v4037_v38 = vpop.xlane.xlu1 %4036 }
0x2518   :  { %v4038_v6 = vadd.f32 1e-08, %v4037_v38 }
0x251a   :  { %7847 = vrsqrt.f32 %v4038_v6 }
0x251b   :  { %7849 = vrcp.f32 %v3905_v32 }
0x2524   :  { %v7848_v35 = vpop.eup %7847 }
0x2525   :  { %v4040_v19 = vmul.f32 %v7848_v35, %v7838_v42  ;;  %v9113_v57 = vpop.eup %7849 }
0x2526   :  { %v4023_v61 = vsub.f32 1.0, %v9113_v57 }
0x2527   :  { %4042 = vrot.lane.b32.xlu0 %v4040_v19, %s8094_s19 }
0x252b   :  { %4019 = vperm.xlu0 %7657, %v9113_v57  }
0x2567   :  { %v3996_v31 = vpop.f32.mrb[38].mxu1 }
0x2568   :  { %v4005_v33 = vmul.f32 %v4003_v7, %v3996_v31  ;;  %v7101_v50 = vpop.f32.mrb[39].mxu1 }
0x256a   :  { %v4006_v11 = vsel %vm761_vm9, %v4005_v33, -inf }
0x256b   :  { %4007 = vmax.xlane.f32.xlu1 %v4006_v11 }
0x256f   :  { %v4264_v23 = vpop.f32.mrb[40].mxu1 }
0x2570   :  { %v4265_v39 = vadd.f32 %v9120_v48, %v4264_v23  ;;  %v7123_v21 = vpop.f32.mrb[41].mxu1 }
0x2572   :  { %v6421_v27 = vmul.f32 -1.442695, %v4265_v39 }
0x2574   :  { %7851 = vpow2.f32 %v6421_v27  ;;  %v4144_v27 = vsel %vm207_vm3, %v9018_v20, 0.0 }
0x2575   :  { %7853 = vtanh.f32 %v4265_v39  ;;  %v4143_v39 = vsel %vm207_vm3, %v9020_v37, 0.0 }
0x257e   :  { %v7852_v42 = vpop.eup %7851 }
0x257f   :  { %v4271_v17 = vadd.f32 1.0, %v7852_v42  ;;  %v7854_v25 = vpop.eup %7853  ;;  %v4146_v42 = vsel %vm207_vm3, %v9030_v60, 0.0 }
0x2581   :  { %7855 = vrcp.f32 %v4271_v17  ;;  %v4145_v17 = vadd.f32 %v4144_v27, %v4143_v39 }
0x258b   :  { %v7856_v59 = vpop.eup %7855 }
0x258c   :  { %v4275_v54 = vsel %vm207_vm3, %v7856_v59, %v7854_v25  ;;  %v4148_v25 = vsel %vm207_vm3, %v9037_v22, 0.0  ;;  %v4147_v59 = vadd.f32 %v4146_v42, %v4145_v17 }
0x258d   :  { %7124 = vmatprep.subr.msk.mxu0 %vm254_vm4, %v4275_v54 }
0x2599   :  { %v4043_v52 = vpop.permute.xlu0 %4042 }
0x259a   :  { %7111 = vmatmul.mubr.msk.f32.vlgmr.msra.gmra.mrb[38].mxu0 %vm207_vm3, %v4043_v52 }
0x259b   :  { %7125 = vmatpush3.msk.msra.mxu0 %vm254_vm4, %v4275_v54  ;;  %v4149_v54 = vadd.f32 %v4148_v25, %v4147_v59 }
0x259c   :  { %7525 = vmatprep.subr.bf16.mxu0 %v8088_v0 }
0x25aa   :  { %v4020_v38 = vpop.permute.xlu0 %4019 }
0x25f8   :  { %v4008_v18 = vpop.xlane.xlu1 %4007 }
0x25f9   :  { %v4009_v40 = vsub.f32 %v4005_v33, %v4008_v18 }
0x25fb   :  { %v4010_v46 = vmul.f32 1.442695, %v4009_v40  ;;  %v4150_v40 = vrot.slane %v4149_v54, 4 }
0x25fd   :  { %7857 = vpow2.f32 %v4010_v46  ;;  %v4151_v46 = vadd.f32 %v4150_v40, %v4149_v54  ;;  %v9190_v40 = vld [vmem:[%s9600_s11] ss:$0 sm:$0xff] }
0x2607   :  { %v7858_v41 = vpop.eup %7857 }
0x2608   :  { %v4012_v51 = vsel %vm761_vm9, %v7858_v41, 0.0 }
0x2609   :  { %4013 = vadd.xlane.f32.xlu1 %v4012_v51 }
0x261a   :  { %4026 = vperm.xlu1 %7658, %v4023_v61  }
0x261e   :  { %7659 = vset.pattern.permute.xlu1 %v8096_v53 }
0x261f   :  { %4117 = vperm.xlu1 %7659, %v9097_v63  }
0x2623   :  { %7660 = vset.pattern.permute.xlu1 %v8097_v2 }
0x266d   :  { %v4112_v4 = vpop.f32.mrb[38].mxu0 }
0x266e   :  { %v7112_v9 = vpop.f32.mrb[39].mxu0 }
0x2696   :  { %v4014_v34 = vpop.xlane.xlu1 %4013 }
0x2697   :  { %7859 = vrcp.f32 %v4014_v34 }
0x269a   :  { %v4027_v47 = vpop.permute.xlu1 %4026 }
0x269b   :  { %v4029_v15 = vmul.f32 %v4027_v47, %v8962_v29 }
0x269e   :  { %v4118_v43 = vpop.permute.xlu1 %4117 }
0x269f   :  { %v4120_v49 = vmul.f32 %v4118_v43, %v4112_v4 }
0x26a1   :  { %v7860_v13 = vpop.eup %7859  ;;  %v4121_v28 = vsel %vm761_vm9, %v4120_v49, -inf }
0x26a2   :  { %v4016_v62 = vmul.f32 %v7860_v13, %v7858_v41  ;;  %4122 = vmax.xlane.f32.xlu1 %v4121_v28  ;;  %v4152_v41 = vrot.slane %v4151_v46, 2 }
0x26a4   :  { %v4022_v6 = vmul.f32 %v4020_v38, %v4016_v62  ;;  %v4153_v51 = vadd.f32 %v4152_v41, %v4151_v46 }
0x26a6   :  { %v9135_v32 = vadd.f32 %v4029_v15, %v4022_v6 }
0x26a8   :  { %4276 = vxpose.xlu0.b32.start.end [1/1] (short) (narrow) %v9135_v32, 32 }
0x26b3   :  { %4133 = vperm.xlu1 %7660, %v9113_v57  }
0x26b7   :  { %4138 = vperm.xlu1 %7660, %v4023_v61   ;;  %v4154_v61 = vrot.slane %v4153_v51, 1 }
0x26b9   :  { %v4155_v4 = vadd.f32 %v4154_v61, %v4153_v51 }
0x26bb   :  { %7663 = vset.pattern.permute.xlu1 %v8095_v16  ;;  %v4156_v9 = vmul.f32 0.03125, %v4155_v4 }
0x26bd   :  { %v4157_v34 = vsub.f32 %v9020_v37, %v4156_v9  ;;  %v4158_v47 = vsub.f32 %v9018_v20, %v4156_v9  ;;  %v4159_v13 = vsub.f32 %v9030_v60, %v4156_v9  ;;  %v4160_v38 = vsub.f32 %v9037_v22, %v4156_v9 }
0x26bf   :  { %v4161_v43 = vmul.f32 %v4157_v34, %v4157_v34  ;;  %v4163_v6 = vmul.f32 %v4159_v13, %v4159_v13 }
0x26c1   :  { %v4165_v28 = vsel %vm207_vm3, %v4161_v43, 0.0 }
0x26d1   :  { %7661 = vset.pattern.permute.xlu0 %v8093_v44 }
0x2728   :  { %v4292_v63 = vpop.trf.xlu0 }
0x2729   :  { %7126 = vmatprep.mubr.msk.f32.mxu0 %vm241_vm2, %v4292_v63  ;;  %v4164_v63 = vmul.f32 %v4160_v38, %v4160_v38 }
0x272b   :  { %v4170_v37 = vsel %vm207_vm3, %v4164_v63, 0.0 }
0x272c   :  { %v4293_v35 = vpop.trf.xlu0 }
0x272d   :  { %7127 = vmatmul.mubr.msk.f32.vlgmr.msra.gmra.mrb[40].mxu0 %vm241_vm2, %v4293_v35  ;;  %v4168_v35 = vsel %vm207_vm3, %v4163_v6, 0.0 }
0x272e   :  { %7527 = vmatpush3.bf16.msra.mxu0 %v8331_v56 }
0x272f   :  { %v4123_v29 = vpop.xlane.xlu1 %4122  ;;  %7528 = vmatprep.subr.bf16.mxu0 %v8088_v0 }
0x2730   :  { %v4124_v19 = vsub.f32 %v4120_v49, %v4123_v29  ;;  %v4294_v7 = vpop.trf.xlu0  ;;  %v4162_v49 = vmul.f32 %v4158_v47, %v4158_v47 }
0x2731   :  { %7129 = vmatprep.mubr.msk.f32.mxu0 %vm241_vm2, %v4294_v7 }
0x2732   :  { %v4125_v31 = vmul.f32 1.442695, %v4124_v19  ;;  %7530 = vmatpush3.bf16.msra.mxu0 %v8337_v58  ;;  %v4166_v62 = vsel %vm207_vm3, %v4162_v49, 0.0 }
0x2733   :  { %7537 = vmatprep.subr.bf16.mxu0 %v8088_v0  ;;  %v4167_v15 = vadd.f32 %v4166_v62, %v4165_v28  ;;  %v4134_v22 = vpop.permute.xlu1 %4133 }
0x2734   :  { %7861 = vpow2.f32 %v4125_v31  ;;  %v4295_v33 = vpop.trf.xlu0 }
0x2735   :  { %7130 = vmatmul.mubr.msk.f32.gmra.mrb[42].mxu0 %vm241_vm2, %v4295_v33  ;;  %v4169_v29 = vadd.f32 %v4168_v35, %v4167_v15 }
0x2736   :  { %7151 = vmatprep.mubr.msk.f32.mxu0 %vm8089_vm0, %v8090_v1 }
0x2737   :  { %v4171_v19 = vadd.f32 %v4170_v37, %v4169_v29  ;;  %v4139_v54 = vpop.permute.xlu1 %4138 }
0x2739   :  { %v4172_v20 = vrot.slane %v4171_v19, 4 }
0x273b   :  { %v4173_v7 = vadd.f32 %v4172_v20, %v4171_v19 }
0x273d   :  { %v4174_v31 = vrot.slane %v4173_v7, 2 }
0x273e   :  { %v9151_v50 = vpop.eup %7861 }
0x273f   :  { %v4127_v11 = vsel %vm761_vm9, %v9151_v50, 0.0  ;;  %v4175_v33 = vadd.f32 %v4174_v31, %v4173_v7 }
0x2740   :  { %4128 = vadd.xlane.f32.xlu0 %v4127_v11 }
0x2741   :  { %v4176_v60 = vrot.slane %v4175_v33, 1 }
0x2743   :  { %v4177_v11 = vadd.f32 %v4176_v60, %v4175_v33 }
0x2745   :  { %v4178_v39 = vmul.f32 0.03125, %v4177_v11 }
0x2747   :  { %v4179_v27 = vadd.f32 1e-05, %v4178_v39 }
0x2749   :  { %7863 = vrsqrt.f32 %v4179_v27 }
0x2753   :  { %v7864_v42 = vpop.eup %7863 }
0x2754   :  { %v4182_v17 = vmul.f32 %v7864_v42, %v4158_v47  ;;  %v4181_v25 = vmul.f32 %v7864_v42, %v4157_v34  ;;  %v4183_v51 = vmul.f32 %v7864_v42, %v4159_v13  ;;  %v9199_v34 = vld [vmem:[%s9601_s12] ss:$0 sm:$0xff]  ;;  %v4184_v28 = vmul.f32 %v7864_v42, %v4160_v38 }
0x2756   :  { %v4186_v46 = vmul.f32 %v9190_v40, %v4182_v17  ;;  %v4185_v41 = vmul.f32 %v9190_v40, %v4181_v25  ;;  %v4187_v49 = vmul.f32 %v9190_v40, %v4183_v51  ;;  %v4188_v35 = vmul.f32 %v9190_v40, %v4184_v28 }
0x2758   :  { %v4190_v47 = vadd.f32 %v9199_v34, %v4186_v46  ;;  %v4189_v43 = vadd.f32 %v9199_v34, %v4185_v41  ;;  %v4191_v63 = vadd.f32 %v9199_v34, %v4187_v49  ;;  %v4192_v33 = vadd.f32 %v9199_v34, %v4188_v35 }
0x2759   :  { %v4141_v46 = vmul.f32 %v4139_v54, %v9046_v36 }
0x27cd   :  { %v4129_v59 = vpop.xlane.xlu0 %4128 }
0x27ce   :  { %7865 = vrcp.f32 %v4129_v59 }
0x27d8   :  { %v7866_v38 = vpop.eup %7865 }
0x27d9   :  { %v4131_v60 = vmul.f32 %v7866_v38, %v9151_v50 }
0x27db   :  { %v4136_v17 = vmul.f32 %v4134_v22, %v4131_v60 }
0x27dd   :  { %v9233_v41 = vadd.f32 %v4141_v46, %v4136_v17 }
0x2800   :  { %v9155_v23 = vpop.f32.mrb[40].mxu0 }
0x2801   :  { %4422 = vrot.lane.b32.xlu1 %v9155_v23, %s8091_s16  ;;  %v9161_v21 = vpop.f32.mrb[41].mxu0  ;;  %v4409_v61 = vsub.f32 1.0, %v9155_v23 }
0x2802   :  { %v4408_v4 = vsub.f32 1.0, %v9161_v21 }
0x2803   :  { %v4413_v62 = vmul.f32 %v4409_v61, %v4190_v47  ;;  %v4510_v61 = vld [vmem:[#allocation2 + $0xa] sm:$0x3] }
0x2804   :  { %v4412_v6 = vmul.f32 %v4408_v4, %v4189_v43 }
0x2805   :  { %4420 = vrot.lane.b32.xlu1 %v9161_v21, %s8091_s16 }
0x2808   :  { %v9171_v52 = vpop.f32.mrb[42].mxu0 }
0x2809   :  { %v9173_v18 = vpop.f32.mrb[43].mxu0  ;;  %v4411_v19 = vsub.f32 1.0, %v9171_v52 }
0x280a   :  { %4424 = vrot.lane.b32.xlu1 %v9173_v18, %s8091_s16  ;;  %v4410_v13 = vsub.f32 1.0, %v9173_v18 }
0x280b   :  { %v4415_v11 = vmul.f32 %v4411_v19, %v4192_v33 }
0x280c   :  { %v4414_v20 = vmul.f32 %v4410_v13, %v4191_v63 }
0x280e   :  { %4426 = vrot.lane.b32.xlu1 %v9171_v52, %s8091_s16 }
0x2873   :  { %v4423_v9 = vpop.permute.xlu1 %4422 }
0x2874   :  { %v9205_v15 = vadd.f32 %v4423_v9, %v4413_v62 }
0x2876   :  { %v4664_v54 = vmul.f32 %v9205_v15, %v9205_v15 }
0x2877   :  { %v4421_v23 = vpop.permute.xlu1 %4420 }
0x2878   :  { %v9207_v21 = vadd.f32 %v4421_v23, %v4412_v6  ;;  %v4670_v51 = vsel %vm207_vm3, %v4664_v54, 0.0 }
0x287a   :  { %v7520_v29 = vpack.c.bf16 %v9205_v15, %v9207_v21  ;;  %v4663_v37 = vmul.f32 %v9207_v21, %v9207_v21 }
0x287c   :  { %7521 = vmatpush3.bf16.msra.mxu1 %v7520_v29  ;;  %v4425_v18 = vpop.permute.xlu1 %4424  ;;  %v4667_v7 = vsel %vm207_vm3, %v4663_v37, 0.0 }
0x287d   :  { %v9217_v31 = vadd.f32 %v4425_v18, %v4414_v20  ;;  %4668 = vadd.xlane.f32.xlu1 %v4667_v7  ;;  %7522 = vmatprep.subr.bf16.mxu1 %v8088_v0 }
0x287f   :  { %v4665_v39 = vmul.f32 %v9217_v31, %v9217_v31 }
0x2880   :  { %v4427_v27 = vpop.permute.xlu1 %4426 }
0x2881   :  { %v9224_v52 = vadd.f32 %v4427_v27, %v4415_v11  ;;  %v4673_v42 = vsel %vm207_vm3, %v4665_v39, 0.0 }
0x2882   :  { %4674 = vadd.xlane.f32.xlu1 %v4673_v42 }
0x2883   :  { %v7523_v25 = vpack.c.bf16 %v9224_v52, %v9217_v31  ;;  %v4666_v59 = vmul.f32 %v9224_v52, %v9224_v52 }
0x2885   :  { %7524 = vmatpush3.bf16.msra.mxu1 %v7523_v25  ;;  %v4676_v50 = vsel %vm207_vm3, %v4666_v59, 0.0 }
0x2886   :  { %4677 = vadd.xlane.f32.xlu1 %v4676_v50  ;;  %7531 = vmatprep.subr.bf16.mxu1 %v8088_v0 }
0x2888   :  { %7141 = vmatmul.mubr.msk.f32.vlgmr.msra.gmra.mrb[42].mxu1 %vm126_vm1, %v9233_v41 }
0x2889   :  { %7533 = vmatpush3.bf16.msra.mxu1 %v8352_v12  ;;  %7162 = vmatprep.mubr.msk.f32.mxu1 %vm8089_vm0, %v8090_v1 }
0x288a   :  { %7534 = vmatprep.subr.bf16.mxu1 %v8088_v0 }
0x288d   :  { %7536 = vmatpush3.bf16.msra.mxu1 %v8355_v14 }
0x288e   :  { %7545 = vmatprep.subr.bf16.mxu1 %v8088_v0 }
0x290a   :  { %v4669_v47 = vpop.xlane.xlu1 %4668 }
0x290b   :  { %v4679_v49 = vadd.f32 1e-08, %v4669_v47 }
0x290d   :  { %7867 = vrsqrt.f32 %v4679_v49 }
0x290f   :  { %v4675_v43 = vpop.xlane.xlu1 %4674 }
0x2910   :  { %v4681_v23 = vadd.f32 1e-08, %v4675_v43 }
0x2913   :  { %v4678_v28 = vpop.xlane.xlu1 %4677 }
0x2914   :  { %v4682_v13 = vadd.f32 1e-08, %v4678_v28 }
0x2917   :  { %v7868_v63 = vpop.eup %7867 }
0x2918   :  { %v4687_v29 = vmul.f32 %v7868_v63, %v9207_v21 }
0x295b   :  { %v4505_v36 = vpop.f32.mrb[42].mxu1 }
0x295c   :  { %4512 = vrot.lane.b32.xlu0 %v4505_v36, %s8092_s14  ;;  %v7142_v22 = vpop.f32.mrb[43].mxu1 }
0x297b   :  { %4671 = vadd.xlane.f32.xlu0 %v4670_v51 }
0x29ce   :  { %v4513_v4 = vpop.permute.xlu0 %4512 }
0x29cf   :  { %v4515_v9 = vsel %vm207_vm3, %v4510_v61, %v4513_v4 }
0x29d0   :  { %7152 = vmatmul.mubr.msk.f32.vlgmr.msra.gmra.mrb[44].mxu0 %vm126_vm1, %v4515_v9 }
0x29d1   :  { %7173 = vmatprep.mubr.msk.f32.mxu0 %vm8089_vm0, %v8090_v1 }
0x2a08   :  { %v4672_v62 = vpop.xlane.xlu0 %4671 }
0x2a09   :  { %v4680_v6 = vadd.f32 1e-08, %v4672_v62 }
0x2a0b   :  { %7869 = vrsqrt.f32 %v4680_v6 }
0x2a0c   :  { %7871 = vrsqrt.f32 %v4682_v13 }
0x2a0d   :  { %7873 = vrsqrt.f32 %v4681_v23 }
0x2a15   :  { %v7870_v35 = vpop.eup %7869 }
0x2a16   :  { %v4688_v37 = vmul.f32 %v7870_v35, %v9205_v15  ;;  %v7872_v19 = vpop.eup %7871 }
0x2a17   :  { %v7874_v20 = vpop.eup %7873  ;;  %v4690_v18 = vmul.f32 %v7872_v19, %v9224_v52 }
0x2a18   :  { %v7538_v38 = vpack.c.bf16 %v4688_v37, %v4687_v29  ;;  %v4689_v7 = vmul.f32 %v7874_v20, %v9217_v31 }
0x2a1a   :  { %7540 = vmatpush3.bf16.xpose.msk.msra.mxu0 %vm8368_vm5, %v7538_v38  ;;  %v7542_v33 = vpack.c.bf16 %v4690_v18, %v4689_v7 }
0x2a1b   :  { %7541 = vmatprep.subr.bf16.mxu0 %v8088_v0 }
0x2a22   :  { %7544 = vmatpush3.bf16.xpose.msk.msra.mxu0 %vm8368_vm5, %v7542_v33 }
0x2a23   :  { %7553 = vmatprep.subr.bf16.mxu0 %v8088_v0 }
0x2aa3   :  { %v4585_v60 = vpop.f32.mrb[44].mxu0 }
0x2aa4   :  { %v4586_v11 = vadd.f32 %v9078_v24, %v4585_v60  ;;  %v7153_v39 = vpop.f32.mrb[45].mxu0 }
0x2aa6   :  { %v4589_v27 = vmax.f32 %v4586_v11, 0.0 }
0x2aa8   :  { %7163 = vmatmul.mubr.msk.f32.vlgmr.msra.gmra.mrb[44].mxu1 %vm126_vm1, %v4589_v27 }
0x2aa9   :  { %7548 = vmatpush3.bf16.xpose.msk.msra.mxu1 %vm8368_vm5, %v7538_v38  ;;  %7184 = vmatprep.mubr.msk.f32.mxu1 %vm8089_vm0, %v8090_v1 }
0x2aaa   :  { %7549 = vmatprep.subr.bf16.mxu1 %v8088_v0 }
0x2ab1   :  { %7552 = vmatpush3.bf16.xpose.msk.msra.mxu1 %vm8368_vm5, %v7542_v33 }
0x2b7b   :  { %v4659_v42 = vpop.f32.mrb[44].mxu1 }
0x2b7c   :  { %v4660_v17 = vadd.f32 %v9092_v3, %v4659_v42  ;;  %v7164_v25 = vpop.f32.mrb[45].mxu1 }
0x2b7e   :  { %7875 = vtanh.f32 %v4660_v17  ;;  %v4695_v24 = vand.u32 2147483647, %v4660_v17  ;;  %v4692_v49 = vmax.f32 %v4660_v17, 0.0  ;;  %vm4693_vm11 = vcmp.ne.f32.partialorder %v4660_v17, %v4660_v17 }
0x2b7f   :  { %v6430_v7 = vmul.f32 -1.442695, %v4660_v17 }
0x2b80   :  { %v4696_v59 = vsub.f32 0.0, %v4695_v24 }
0x2b82   :  { %v4697_v46 = vmul.f32 1.442695, %v4696_v59 }
0x2b84   :  { %7877 = vpow2.f32 %v4697_v46 }
0x2b88   :  { %v7876_v50 = vpop.eup %7875 }
0x2b89   :  { %v4716_v36 = vmul.f32 %v7876_v50, %v7876_v50 }
0x2b8b   :  { %v4717_v22 = vsel %vm663_vm6, %v4716_v36, 0.0 }
0x2b8c   :  { %4718 = vadd.xlane.f32.xlu1 %v4717_v22 }
0x2b8e   :  { %v7878_v54 = vpop.eup %7877 }
0x2b8f   :  { %v4699_v51 = vadd.f32 1.0, %v7878_v54  ;;  %v4702_v61 = vmul.f32 -0.5, %v7878_v54  ;;  %v4705_v9 = vand.u32 2147483647, %v7878_v54 }
0x2b91   :  { %7879 = vlog2.f32 %v4699_v51  ;;  %v4703_v4 = vadd.f32 1.0, %v4702_v61  ;;  %vm4706_vm10 = vcmp.lt.f32.partialorder %v4705_v9, 0.0004427343 }
0x2b93   :  { %v4704_v3 = vmul.f32 %v7878_v54, %v4703_v4 }
0x2b9b   :  { %v7880_v47 = vpop.eup %7879 }
0x2b9c   :  { %v4701_v43 = vmul.f32 0.6931472, %v7880_v47 }
0x2b9d   :  { %4840 = vrot.lane.b32.xlu1 %v4716_v36, %s8094_s19 }
0x2b9e   :  { %v4707_v28 = vsel %vm4706_vm10, %v4704_v3, %v4701_v43 }
0x2b9f   :  { %v4708_v62 = vadd.f32 %v4707_v28, %v4692_v49 }
0x2ba1   :  { %v4709_v6 = vsel %vm4693_vm11, %v4660_v17, %v4708_v62 }
0x2ba2   :  { %4810 = vperm.xlu0 %7661, %v4709_v6  }
0x2ba6   :  { %7662 = vset.pattern.permute.xlu0 %v8095_v16 }
0x2c19   :  { %v4719_v13 = vpop.xlane.xlu1 %4718 }
0x2c1a   :  { %v4720_v23 = vadd.f32 1e-08, %v4719_v13 }
0x2c1c   :  { %7881 = vrsqrt.f32 %v4720_v23 }
0x2c1d   :  { %v4841_v63 = vpop.permute.xlu1 %4840 }
0x2c1e   :  { %v4843_v35 = vsel %vm663_vm6, %v4841_v63, 0.0 }
0x2c1f   :  { %4844 = vadd.xlane.f32.xlu1 %v4843_v35 }
0x2c21   :  { %v4811_v33 = vpop.permute.xlu0 %4810 }
0x2c26   :  { %v7882_v29 = vpop.eup %7881 }
0x2c27   :  { %v4722_v37 = vmul.f32 %v7882_v29, %v7876_v50 }
0x2c29   :  { %7174 = vmatmul.mubr.msk.f32.vlgmr.msra.gmra.mrb[46].mxu0 %vm207_vm3, %v4722_v37 }
0x2c2a   :  { %7555 = vmatpush3.bf16.msra.mxu0 %v8250_v5  ;;  %7195 = vmatprep.mubr.msk.f32.mxu0 %vm8089_vm0, %v8090_v1 }
0x2c2b   :  { %7556 = vmatprep.subr.bf16.mxu0 %v8088_v0 }
0x2c2e   :  { %7558 = vmatpush3.bf16.msra.mxu0 %v8259_v8 }
0x2c2f   :  { %7559 = vmatprep.subr.bf16.mxu0 %v8088_v0 }
0x2c31   :  { %7196 = vmatmul.mubr.msk.f32.vlgmr.msra.gmra.mrb[48].mxu0 %vm126_vm1, %v4589_v27 }
0x2c32   :  { %7214 = vmatprep.mubr.msk.f32.mxu0 %vm8089_vm0, %v8090_v1 }
0x2cac   :  { %v4845_v38 = vpop.xlane.xlu1 %4844 }
0x2cad   :  { %v4846_v19 = vadd.f32 1e-08, %v4845_v38 }
0x2caf   :  { %7883 = vrsqrt.f32 %v4846_v19 }
0x2cb0   :  { %7885 = vpow2.f32 %v6430_v7 }
0x2cb9   :  { %v7884_v20 = vpop.eup %7883 }
0x2cba   :  { %v4848_v18 = vmul.f32 %v7884_v20, %v7876_v50  ;;  %v7886_v27 = vpop.eup %7885 }
0x2cbb   :  { %v4713_v46 = vadd.f32 1.0, %v7886_v27 }
0x2cbc   :  { %4850 = vrot.lane.b32.xlu1 %v4848_v18, %s8094_s19 }
0x2cfc   :  { %v4804_v60 = vpop.f32.mrb[46].mxu0 }
0x2cfd   :  { %v4813_v11 = vmul.f32 %v4811_v33, %v4804_v60  ;;  %v7175_v39 = vpop.f32.mrb[47].mxu0 }
0x2cff   :  { %v4814_v42 = vsel %vm761_vm9, %v4813_v11, -inf }
0x2d00   :  { %4815 = vmax.xlane.f32.xlu0 %v4814_v42 }
0x2d04   :  { %v5072_v25 = vpop.f32.mrb[48].mxu0 }
0x2d05   :  { %v5073_v24 = vadd.f32 %v9120_v48, %v5072_v25  ;;  %v7197_v59 = vpop.f32.mrb[49].mxu0 }
0x2d07   :  { %v6442_v36 = vmul.f32 -1.442695, %v5073_v24 }
0x2d09   :  { %7887 = vpow2.f32 %v6442_v36  ;;  %v4954_v36 = vsel %vm207_vm3, %v9217_v31, 0.0 }
0x2d0a   :  { %7889 = vrcp.f32 %v4713_v46  ;;  %v4952_v46 = vsel %vm207_vm3, %v9205_v15, 0.0 }
0x2d0b   :  { %7891 = vtanh.f32 %v5073_v24  ;;  %v4951_v24 = vsel %vm207_vm3, %v9207_v21, 0.0 }
0x2d13   :  { %v7888_v50 = vpop.eup %7887 }
0x2d14   :  { %v5079_v22 = vadd.f32 1.0, %v7888_v50  ;;  %v9289_v17 = vpop.eup %7889  ;;  %v4953_v50 = vadd.f32 %v4952_v46, %v4951_v24 }
0x2d15   :  { %v7892_v54 = vpop.eup %7891  ;;  %v4831_v49 = vsub.f32 1.0, %v9289_v17 }
0x2d16   :  { %7893 = vrcp.f32 %v5079_v22  ;;  %4827 = vperm.xlu0 %7662, %v9289_v17   ;;  %v4956_v22 = vsel %vm207_vm3, %v9224_v52, 0.0 }
0x2d1a   :  { %7664 = vset.pattern.permute.xlu0 %v8096_v53 }
0x2d1b   :  { %4925 = vperm.xlu0 %7664, %v4709_v6  }
0x2d1f   :  { %7666 = vset.pattern.permute.xlu0 %v8097_v2 }
0x2d20   :  { %v7894_v48 = vpop.eup %7893 }
0x2d21   :  { %v5083_v51 = vsel %vm207_vm3, %v7894_v48, %v7892_v54  ;;  %v4955_v54 = vadd.f32 %v4954_v36, %v4953_v50 }
0x2d22   :  { %7198 = vmatprep.subr.msk.mxu1 %vm254_vm4, %v5083_v51 }
0x2d23   :  { %v4957_v48 = vadd.f32 %v4956_v22, %v4955_v54 }
0x2d2e   :  { %v4851_v61 = vpop.permute.xlu1 %4850 }
0x2d2f   :  { %7185 = vmatmul.mubr.msk.f32.vlgmr.msra.gmra.mrb[46].mxu1 %vm207_vm3, %v4851_v61 }
0x2d30   :  { %7199 = vmatpush3.msk.msra.mxu1 %vm254_vm4, %v5083_v51 }
0x2d31   :  { %7565 = vmatprep.subr.bf16.mxu1 %v8088_v0 }
0x2d8d   :  { %v4816_v4 = vpop.xlane.xlu0 %4815 }
0x2d8e   :  { %v4817_v9 = vsub.f32 %v4813_v11, %v4816_v4  ;;  %v4958_v4 = vrot.slane %v4957_v48, 4 }
0x2d90   :  { %v4818_v47 = vmul.f32 1.442695, %v4817_v9  ;;  %v4959_v9 = vadd.f32 %v4958_v4, %v4957_v48 }
0x2d92   :  { %7895 = vpow2.f32 %v4818_v47  ;;  %v4960_v47 = vrot.slane %v4959_v9, 2 }
0x2d95   :  { %v4828_v28 = vpop.permute.xlu0 %4827 }
0x2d9a   :  { %v4926_v62 = vpop.permute.xlu0 %4925 }
0x2d9c   :  { %v7896_v43 = vpop.eup %7895 }
0x2d9d   :  { %v4820_v3 = vsel %vm761_vm9, %v7896_v43, 0.0 }
0x2d9e   :  { %4821 = vadd.xlane.f32.xlu1 %v4820_v3 }
0x2daf   :  { %4834 = vperm.xlu1 %7663, %v4831_v49  }
0x2e02   :  { %v4920_v6 = vpop.f32.mrb[46].mxu1 }
0x2e03   :  { %v4928_v13 = vmul.f32 %v4926_v62, %v4920_v6  ;;  %v7186_v23 = vpop.f32.mrb[47].mxu1 }
0x2e05   :  { %v4929_v63 = vsel %vm761_vm9, %v4928_v13, -inf }
0x2e06   :  { %4930 = vmax.xlane.f32.xlu0 %v4929_v63 }
0x2e1c   :  { %4946 = vperm.xlu0 %7666, %v4831_v49  }
0x2e2b   :  { %v4822_v35 = vpop.xlane.xlu1 %4821 }
0x2e2c   :  { %7897 = vrcp.f32 %v4822_v35 }
0x2e2f   :  { %v4835_v37 = vpop.permute.xlu1 %4834 }
0x2e30   :  { %v4837_v20 = vmul.f32 %v4835_v37, %v9135_v32 }
0x2e36   :  { %v7898_v29 = vpop.eup %7897 }
0x2e37   :  { %v4824_v38 = vmul.f32 %v7898_v29, %v7896_v43  ;;  %v4961_v43 = vadd.f32 %v4960_v47, %v4959_v9 }
0x2e39   :  { %v4830_v19 = vmul.f32 %v4828_v28, %v4824_v38  ;;  %v4962_v3 = vrot.slane %v4961_v43, 1 }
0x2e3b   :  { %v9303_v18 = vadd.f32 %v4837_v20, %v4830_v19  ;;  %v4963_v49 = vadd.f32 %v4962_v3, %v4961_v43 }
0x2e3d   :  { %5084 = vxpose.xlu1.b32.start.end [1/1] (short) (narrow) %v9303_v18, 32  ;;  %v4964_v28 = vmul.f32 0.03125, %v4963_v49 }
0x2e3f   :  { %v4965_v62 = vsub.f32 %v9207_v21, %v4964_v28  ;;  %v4966_v6 = vsub.f32 %v9205_v15, %v4964_v28  ;;  %v4967_v63 = vsub.f32 %v9217_v31, %v4964_v28  ;;  %v4968_v37 = vsub.f32 %v9224_v52, %v4964_v28 }
0x2e41   :  { %v4970_v23 = vmul.f32 %v4966_v6, %v4966_v6  ;;  %v4971_v38 = vmul.f32 %v4967_v63, %v4967_v63  ;;  %v4972_v20 = vmul.f32 %v4968_v37, %v4968_v37 }
0x2e43   :  { %v4974_v29 = vsel %vm207_vm3, %v4970_v23, 0.0  ;;  %v4978_v21 = vsel %vm207_vm3, %v4972_v20, 0.0 }
0x2e5b   :  { %7665 = vset.pattern.permute.xlu1 %v8097_v2 }
0x2e67   :  { %4941 = vperm.xlu1 %7665, %v9289_v17  }
0x2e6b   :  { %7667 = vset.pattern.permute.xlu1 %v8093_v44 }
0x2e93   :  { %v4931_v7 = vpop.xlane.xlu0 %4930 }
0x2e94   :  { %v4932_v33 = vsub.f32 %v4928_v13, %v4931_v7  ;;  %v4969_v13 = vmul.f32 %v4965_v62, %v4965_v62  ;;  %v4976_v7 = vsel %vm207_vm3, %v4971_v38, 0.0 }
0x2e96   :  { %v4933_v60 = vmul.f32 1.442695, %v4932_v33  ;;  %v4973_v35 = vsel %vm207_vm3, %v4969_v13, 0.0 }
0x2e97   :  { %v4975_v19 = vadd.f32 %v4974_v29, %v4973_v35 }
0x2e98   :  { %7899 = vpow2.f32 %v4933_v60 }
0x2e99   :  { %v4977_v33 = vadd.f32 %v4976_v7, %v4975_v19 }
0x2e9b   :  { %v4979_v60 = vadd.f32 %v4978_v21, %v4977_v33  ;;  %v4947_v46 = vpop.permute.xlu0 %4946 }
0x2e9d   :  { %v4980_v15 = vrot.slane %v4979_v60, 4 }
0x2ea2   :  { %v9309_v11 = vpop.eup %7899 }
0x2ea3   :  { %v4935_v39 = vsel %vm761_vm9, %v9309_v11, 0.0 }
0x2ea4   :  { %4936 = vadd.xlane.f32.xlu0 %v4935_v39  ;;  %v4981_v39 = vadd.f32 %v4980_v15, %v4979_v60 }
0x2ebd   :  { %v5100_v32 = vpop.trf.xlu1 }
0x2ebe   :  { %7200 = vmatprep.mubr.msk.f32.mxu1 %vm241_vm2, %v5100_v32  ;;  %v4982_v32 = vrot.slane %v4981_v39, 2 }
0x2ec1   :  { %v5101_v42 = vpop.trf.xlu1 }
0x2ec2   :  { %7201 = vmatmul.mubr.msk.f32.vlgmr.msra.gmra.mrb[48].mxu1 %vm241_vm2, %v5101_v42  ;;  %v4983_v42 = vadd.f32 %v4982_v32, %v4981_v39 }
0x2ec3   :  { %7567 = vmatpush3.bf16.msra.mxu1 %v8331_v56 }
0x2ec4   :  { %7568 = vmatprep.subr.bf16.mxu1 %v8088_v0  ;;  %v4984_v31 = vrot.slane %v4983_v42, 1 }
0x2ec5   :  { %v5102_v44 = vpop.trf.xlu1 }
0x2ec6   :  { %7203 = vmatprep.mubr.msk.f32.mxu1 %vm241_vm2, %v5102_v44  ;;  %v4985_v44 = vadd.f32 %v4984_v31, %v4983_v42  ;;  %v4949_v42 = vmul.f32 %v4947_v46, %v9233_v41 }
0x2ec7   :  { %7570 = vmatpush3.bf16.msra.mxu1 %v8337_v58 }
0x2ec8   :  { %7577 = vmatprep.subr.bf16.mxu1 %v8088_v0 }
0x2ec9   :  { %v5103_v27 = vpop.trf.xlu1 }
0x2eca   :  { %7204 = vmatmul.mubr.msk.f32.gmra.mrb[50].mxu1 %vm241_vm2, %v5103_v27  ;;  %v4986_v27 = vmul.f32 0.03125, %v4985_v44 }
0x2ecb   :  { %7225 = vmatprep.mubr.msk.f32.mxu1 %vm8089_vm0, %v8090_v1 }
0x2ecc   :  { %v4987_v24 = vadd.f32 1e-05, %v4986_v27 }
0x2ece   :  { %7901 = vrsqrt.f32 %v4987_v24 }
0x2ed8   :  { %v7902_v52 = vpop.eup %7901 }
0x2ed9   :  { %v4990_v50 = vmul.f32 %v7902_v52, %v4966_v6  ;;  %v4989_v22 = vmul.f32 %v7902_v52, %v4965_v62  ;;  %v4992_v9 = vmul.f32 %v7902_v52, %v4968_v37  ;;  %v4991_v47 = vmul.f32 %v7902_v52, %v4967_v63 }
0x2edb   :  { %v4994_v48 = vmul.f32 %v9190_v40, %v4990_v50  ;;  %v4993_v4 = vmul.f32 %v9190_v40, %v4989_v22  ;;  %v4996_v6 = vmul.f32 %v9190_v40, %v4992_v9  ;;  %v4995_v62 = vmul.f32 %v9190_v40, %v4991_v47  ;;  %v5318_v22 = vld [vmem:[#allocation2 + $0xc] sm:$0x3] }
0x2edd   :  { %v4998_v28 = vadd.f32 %v9199_v34, %v4994_v48  ;;  %v4997_v13 = vadd.f32 %v9199_v34, %v4993_v4  ;;  %v5000_v19 = vadd.f32 %v9199_v34, %v4996_v6  ;;  %v4999_v20 = vadd.f32 %v9199_v34, %v4995_v62 }
0x2ee6   :  { %v4942_v54 = vpop.permute.xlu1 %4941 }
0x2f31   :  { %v4937_v36 = vpop.xlane.xlu0 %4936 }
0x2f32   :  { %7903 = vrcp.f32 %v4937_v36 }
0x2f3c   :  { %v7904_v38 = vpop.eup %7903 }
0x2f3d   :  { %v4939_v7 = vmul.f32 %v7904_v38, %v9309_v11 }
0x2f3f   :  { %v4944_v34 = vmul.f32 %v4942_v54, %v4939_v7 }
0x2f41   :  { %v9385_v31 = vadd.f32 %v4949_v42, %v4944_v34 }
0x2f95   :  { %v9323_v25 = vpop.f32.mrb[48].mxu1 }
0x2f96   :  { %5230 = vrot.lane.b32.xlu1 %v9323_v25, %s8091_s16  ;;  %v9329_v59 = vpop.f32.mrb[49].mxu1  ;;  %v5217_v43 = vsub.f32 1.0, %v9323_v25 }
0x2f97   :  { %v5216_v3 = vsub.f32 1.0, %v9329_v59 }
0x2f98   :  { %v5221_v35 = vmul.f32 %v5217_v43, %v4998_v28 }
0x2f99   :  { %v5220_v29 = vmul.f32 %v5216_v3, %v4997_v13 }
0x2f9a   :  { %5228 = vrot.lane.b32.xlu1 %v9329_v59, %s8091_s16 }
0x2f9d   :  { %v9339_v51 = vpop.f32.mrb[50].mxu1 }
0x2f9e   :  { %5234 = vrot.lane.b32.xlu1 %v9339_v51, %s8091_s16  ;;  %v9343_v61 = vpop.f32.mrb[51].mxu1  ;;  %v5219_v23 = vsub.f32 1.0, %v9339_v51 }
0x2f9f   :  { %5232 = vrot.lane.b32.xlu0 %v9343_v61, %s8091_s16  ;;  %v5218_v63 = vsub.f32 1.0, %v9343_v61 }
0x2fa0   :  { %v5223_v33 = vmul.f32 %v5219_v23, %v5000_v19 }
0x2fa1   :  { %v5222_v61 = vmul.f32 %v5218_v63, %v4999_v20 }
0x3008   :  { %v5231_v49 = vpop.permute.xlu1 %5230 }
0x3009   :  { %v9365_v25 = vadd.f32 %v5231_v49, %v5221_v35 }
0x300b   :  { %v5472_v27 = vmul.f32 %v9365_v25, %v9365_v25 }
0x300c   :  { %v5229_v37 = vpop.permute.xlu1 %5228 }
0x300d   :  { %v9367_v59 = vadd.f32 %v5229_v37, %v5220_v29  ;;  %v5478_v24 = vsel %vm207_vm3, %v5472_v27, 0.0 }
0x300f   :  { %v7560_v40 = vpack.c.bf16 %v9365_v25, %v9367_v59  ;;  %v5471_v51 = vmul.f32 %v9367_v59, %v9367_v59 }
0x3010   :  { %v5235_v21 = vpop.permute.xlu1 %5234 }
0x3011   :  { %v9376_v60 = vadd.f32 %v5235_v21, %v5223_v33  ;;  %7561 = vmatpush3.bf16.msra.mxu0 %v7560_v40  ;;  %v5233_v15 = vpop.permute.xlu0 %5232  ;;  %v5475_v39 = vsel %vm207_vm3, %v5471_v51, 0.0  ;;  %v9423_v33 = vld [vmem:[%s9595_s6] ss:$0 sm:$0xff] }
0x3012   :  { %v9379_v32 = vadd.f32 %v5233_v15, %v5222_v61  ;;  %5476 = vadd.xlane.f32.xlu1 %v5475_v39  ;;  %7562 = vmatprep.subr.bf16.mxu0 %v8088_v0  ;;  %v9437_v15 = vld [vmem:[%s9599_s10] ss:$0 sm:$0xff] }
0x3013   :  { %v5474_v36 = vmul.f32 %v9376_v60, %v9376_v60 }
0x3014   :  { %v7563_v11 = vpack.c.bf16 %v9376_v60, %v9379_v32  ;;  %v5473_v46 = vmul.f32 %v9379_v32, %v9379_v32 }
0x3015   :  { %v5484_v50 = vsel %vm207_vm3, %v5474_v36, 0.0 }
0x3016   :  { %7564 = vmatpush3.bf16.msra.mxu0 %v7563_v11  ;;  %v5481_v52 = vsel %vm207_vm3, %v5473_v46, 0.0 }
0x3017   :  { %7571 = vmatprep.subr.bf16.mxu0 %v8088_v0 }
0x3019   :  { %7215 = vmatmul.mubr.msk.f32.vlgmr.msra.gmra.mrb[50].mxu0 %vm126_vm1, %v9385_v31 }
0x301a   :  { %7573 = vmatpush3.bf16.msra.mxu0 %v8352_v12  ;;  %7236 = vmatprep.mubr.msk.f32.mxu0 %vm8089_vm0, %v8090_v1 }
0x301b   :  { %7574 = vmatprep.subr.bf16.mxu0 %v8088_v0 }
0x301e   :  { %7576 = vmatpush3.bf16.msra.mxu0 %v8355_v14 }
0x301f   :  { %7585 = vmatprep.subr.bf16.mxu0 %v8088_v0 }
0x309f   :  { %v5477_v4 = vpop.xlane.xlu1 %5476 }
0x30a0   :  { %v5487_v9 = vadd.f32 1e-08, %v5477_v4 }
0x30a2   :  { %7905 = vrsqrt.f32 %v5487_v9 }
0x30ac   :  { %v7906_v6 = vpop.eup %7905 }
0x30ad   :  { %v5495_v23 = vmul.f32 %v7906_v6, %v9367_v59 }
0x30ec   :  { %v5313_v41 = vpop.f32.mrb[50].mxu0 }
0x30ed   :  { %5320 = vrot.lane.b32.xlu0 %v5313_v41, %s8092_s14  ;;  %v7216_v44 = vpop.f32.mrb[51].mxu0 }
0x310c   :  { %5479 = vadd.xlane.f32.xlu0 %v5478_v24 }
0x3110   :  { %5482 = vadd.xlane.f32.xlu0 %v5481_v52 }
0x3114   :  { %5485 = vadd.xlane.f32.xlu0 %v5484_v50 }
0x315f   :  { %v5321_v54 = vpop.permute.xlu0 %5320 }
0x3160   :  { %v5323_v48 = vsel %vm207_vm3, %v5318_v22, %v5321_v54 }
0x3161   :  { %7226 = vmatmul.mubr.msk.f32.vlgmr.msra.gmra.mrb[52].mxu1 %vm126_vm1, %v5323_v48 }
0x3162   :  { %7247 = vmatprep.mubr.msk.f32.mxu1 %vm8089_vm0, %v8090_v1 }
0x3199   :  { %v5480_v47 = vpop.xlane.xlu0 %5479 }
0x319a   :  { %v5488_v43 = vadd.f32 1e-08, %v5480_v47 }
0x319c   :  { %7907 = vrsqrt.f32 %v5488_v43 }
0x319d   :  { %v5483_v3 = vpop.xlane.xlu0 %5482 }
0x319e   :  { %v5489_v49 = vadd.f32 1e-08, %v5483_v3 }
0x31a0   :  { %7909 = vrsqrt.f32 %v5489_v49 }
0x31a1   :  { %v5486_v28 = vpop.xlane.xlu0 %5485 }
0x31a2   :  { %v5490_v13 = vadd.f32 1e-08, %v5486_v28 }
0x31a4   :  { %7911 = vrsqrt.f32 %v5490_v13 }
0x31a6   :  { %v7908_v62 = vpop.eup %7907 }
0x31a7   :  { %v5496_v35 = vmul.f32 %v7908_v62, %v9365_v25 }
0x31a9   :  { %v7578_v29 = vpack.c.bf16 %v5496_v35, %v5495_v23 }
0x31aa   :  { %v7910_v38 = vpop.eup %7909 }
0x31ab   :  { %7580 = vmatpush3.bf16.xpose.msk.msra.mxu1 %vm8368_vm5, %v7578_v29  ;;  %v5497_v37 = vmul.f32 %v7910_v38, %v9379_v32 }
0x31ac   :  { %7581 = vmatprep.subr.bf16.mxu1 %v8088_v0 }
0x31ae   :  { %v7912_v63 = vpop.eup %7911 }
0x31af   :  { %v5498_v19 = vmul.f32 %v7912_v63, %v9376_v60 }
0x31b1   :  { %v7582_v20 = vpack.c.bf16 %v5498_v19, %v5497_v37 }
0x31b3   :  { %7584 = vmatpush3.bf16.xpose.msk.msra.mxu1 %vm8368_vm5, %v7582_v20 }
0x31b4   :  { %7593 = vmatprep.subr.bf16.mxu1 %v8088_v0 }
0x3234   :  { %v5393_v7 = vpop.f32.mrb[52].mxu1 }
0x3235   :  { %v5394_v40 = vadd.f32 %v9423_v33, %v5393_v7  ;;  %v7227_v51 = vpop.f32.mrb[53].mxu1 }
0x3237   :  { %v5397_v21 = vmax.f32 %v5394_v40, 0.0 }
0x3239   :  { %7237 = vmatmul.mubr.msk.f32.vlgmr.msra.gmra.mrb[52].mxu0 %vm126_vm1, %v5397_v21 }
0x323a   :  { %7588 = vmatpush3.bf16.xpose.msk.msra.mxu0 %vm8368_vm5, %v7578_v29  ;;  %7258 = vmatprep.mubr.msk.f32.mxu0 %vm8089_vm0, %v8090_v1 }
0x323b   :  { %7589 = vmatprep.subr.bf16.mxu0 %v8088_v0 }
0x3242   :  { %7592 = vmatpush3.bf16.xpose.msk.msra.mxu0 %vm8368_vm5, %v7582_v20 }
0x330c   :  { %v5467_v61 = vpop.f32.mrb[52].mxu0 }
0x330d   :  { %v5468_v39 = vadd.f32 %v9437_v15, %v5467_v61  ;;  %v7238_v34 = vpop.f32.mrb[53].mxu0 }
0x330f   :  { %7913 = vtanh.f32 %v5468_v39  ;;  %v5503_v11 = vand.u32 2147483647, %v5468_v39  ;;  %v5500_v4 = vmax.f32 %v5468_v39, 0.0  ;;  %vm5501_vm12 = vcmp.ne.f32.partialorder %v5468_v39, %v5468_v39 }
0x3310   :  { %v6451_v3 = vmul.f32 -1.442695, %v5468_v39 }
0x3311   :  { %v5504_v42 = vsub.f32 0.0, %v5503_v11 }
0x3313   :  { %v5505_v41 = vmul.f32 1.442695, %v5504_v42 }
0x3315   :  { %7915 = vpow2.f32 %v5505_v41 }
0x3319   :  { %v9440_v44 = vpop.eup %7913 }
0x331a   :  { %v5524_v30 = vmul.f32 %v9440_v44, %v9440_v44 }
0x331c   :  { %5648 = vrot.lane.b32.xlu0 %v5524_v30, %s8094_s19  ;;  %v5525_v27 = vsel %vm663_vm6, %v5524_v30, 0.0 }
0x331d   :  { %5526 = vadd.xlane.f32.xlu1 %v5525_v27 }
0x331f   :  { %v7916_v24 = vpop.eup %7915 }
0x3320   :  { %v5507_v46 = vadd.f32 1.0, %v7916_v24  ;;  %v5510_v52 = vmul.f32 -0.5, %v7916_v24  ;;  %v5513_v50 = vand.u32 2147483647, %v7916_v24 }
0x3322   :  { %7917 = vlog2.f32 %v5507_v46  ;;  %v5511_v36 = vadd.f32 1.0, %v5510_v52  ;;  %vm5514_vm5 = vcmp.lt.f32.partialorder %v5513_v50, 0.0004427343 }
0x3323   :  { %7919 = vpow2.f32 %v6451_v3 }
0x3324   :  { %v5512_v48 = vmul.f32 %v7916_v24, %v5511_v36 }
0x332c   :  { %v7918_v22 = vpop.eup %7917 }
0x332d   :  { %v5509_v54 = vmul.f32 0.6931472, %v7918_v22  ;;  %v7920_v28 = vpop.eup %7919 }
0x332e   :  { %v5521_v6 = vadd.f32 1.0, %v7920_v28 }
0x332f   :  { %v5515_v9 = vsel %vm5514_vm5, %v5512_v48, %v5509_v54 }
0x3330   :  { %v5516_v47 = vadd.f32 %v5515_v9, %v5500_v4  ;;  %7921 = vrcp.f32 %v5521_v6 }
0x3332   :  { %v9446_v43 = vsel %vm5501_vm12, %v5468_v39, %v5516_v47 }
0x3333   :  { %5618 = vperm.xlu1 %7667, %v9446_v43  }
0x3337   :  { %7668 = vset.pattern.permute.xlu1 %v8095_v16 }
0x333a   :  { %v9451_v62 = vpop.eup %7921 }
0x333b   :  { %v5639_v22 = vsub.f32 1.0, %v9451_v62 }
0x338e   :  { %v5649_v49 = vpop.permute.xlu0 %5648 }
0x338f   :  { %v5651_v13 = vsel %vm663_vm6, %v5649_v49, 0.0 }
0x3390   :  { %5652 = vadd.xlane.f32.xlu1 %v5651_v13 }
0x33a1   :  { %5635 = vperm.xlu1 %7668, %v9451_v62  }
0x33aa   :  { %v5527_v23 = vpop.xlane.xlu1 %5526 }
0x33ab   :  { %v5528_v35 = vadd.f32 1e-08, %v5527_v23 }
0x33ad   :  { %7923 = vrsqrt.f32 %v5528_v35 }
0x33b2   :  { %v5619_v16 = vpop.permute.xlu1 %5618 }
0x33b7   :  { %v7924_v29 = vpop.eup %7923 }
0x33b8   :  { %v5530_v38 = vmul.f32 %v7924_v29, %v9440_v44 }
0x33ba   :  { %7248 = vmatmul.mubr.msk.f32.vlgmr.msra.gmra.mrb[54].mxu1 %vm207_vm3, %v5530_v38 }
0x33bb   :  { %7595 = vmatpush3.bf16.msra.mxu1 %v8250_v5  ;;  %7269 = vmatprep.mubr.msk.f32.mxu1 %vm8089_vm0, %v8090_v1 }
0x33bc   :  { %7596 = vmatprep.subr.bf16.mxu1 %v8088_v0 }
0x33bf   :  { %7598 = vmatpush3.bf16.msra.mxu1 %v8259_v8  ;;  %v7959_v8 = vld [vmem:[%s9597_s8] ss:$0 sm:$0xff]  ;;  %s8098_s8 = smov 92  }
0x33c0   :  { %7599 = vmatprep.subr.bf16.mxu1 %v8088_v0 }
0x33c2   :  { %7270 = vmatmul.mubr.msk.f32.vlgmr.msra.gmra.mrb[56].mxu1 %vm126_vm1, %v5397_v21 }
0x33c3   :  { %7288 = vmatprep.mubr.msk.f32.mxu1 %vm8089_vm0, %v8090_v1 }
0x341d   :  { %v5653_v20 = vpop.xlane.xlu1 %5652 }
0x341e   :  { %v5654_v7 = vadd.f32 1e-08, %v5653_v20  ;;  %v5760_v20 = vsel %vm207_vm3, %v9365_v25, 0.0 }
0x3420   :  { %7925 = vrsqrt.f32 %v5654_v7  ;;  %v5762_v7 = vsel %vm207_vm3, %v9379_v32, 0.0 }
0x3421   :  { %v5636_v54 = vpop.permute.xlu1 %5635 }
0x342a   :  { %v7926_v39 = vpop.eup %7925 }
0x342b   :  { %v5656_v42 = vmul.f32 %v7926_v39, %v9440_v44 }
0x348d   :  { %v5612_v63 = vpop.f32.mrb[54].mxu1 }
0x348e   :  { %v5621_v37 = vmul.f32 %v5619_v16, %v5612_v63  ;;  %v7249_v19 = vpop.f32.mrb[55].mxu1 }
0x3490   :  { %v5622_v5 = vsel %vm761_vm9, %v5621_v37, -inf }
0x3491   :  { %5623 = vmax.xlane.f32.xlu0 %v5622_v5 }
0x3495   :  { %v5880_v40 = vpop.f32.mrb[56].mxu1 }
0x3496   :  { %v5881_v51 = vadd.f32 %v7959_v8, %v5880_v40  ;;  %v7271_v61 = vpop.f32.mrb[57].mxu1 }
0x3498   :  { %v6463_v21 = vmul.f32 -1.442695, %v5881_v51 }
0x349a   :  { %7927 = vpow2.f32 %v6463_v21 }
0x349b   :  { %7929 = vtanh.f32 %v5881_v51 }
0x34a4   :  { %v7928_v34 = vpop.eup %7927 }
0x34a5   :  { %v5887_v11 = vadd.f32 1.0, %v7928_v34  ;;  %v7930_v41 = vpop.eup %7929 }
0x34a7   :  { %7931 = vrcp.f32 %v5887_v11  ;;  %5658 = vrot.lane.b32.xlu0 %v5656_v42, %s8094_s19 }
0x34b1   :  { %v7932_v30 = vpop.eup %7931 }
0x34b2   :  { %v5891_v27 = vsel %vm207_vm3, %v7932_v30, %v7930_v41 }
0x34b3   :  { %7272 = vmatprep.subr.msk.mxu0 %vm254_vm4, %v5891_v27 }
0x351e   :  { %v5624_v24 = vpop.xlane.xlu0 %5623 }
0x351f   :  { %v5625_v46 = vsub.f32 %v5621_v37, %v5624_v24 }
0x3521   :  { %v5626_v52 = vmul.f32 1.442695, %v5625_v46 }
0x3522   :  { %v5659_v36 = vpop.permute.xlu0 %5658 }
0x3523   :  { %7933 = vpow2.f32 %v5626_v52  ;;  %7259 = vmatmul.mubr.msk.f32.vlgmr.msra.gmra.mrb[54].mxu0 %vm207_vm3, %v5659_v36 }
0x3524   :  { %7273 = vmatpush3.msk.msra.mxu0 %vm254_vm4, %v5891_v27 }
0x3525   :  { %7605 = vmatprep.subr.bf16.mxu0 %v8088_v0 }
0x352d   :  { %v7934_v44 = vpop.eup %7933 }
0x352e   :  { %v5628_v50 = vsel %vm761_vm9, %v7934_v44, 0.0 }
0x352f   :  { %5629 = vadd.xlane.f32.xlu1 %v5628_v50 }
0x3540   :  { %5642 = vperm.xlu1 %7668, %v5639_v22  }
0x3544   :  { %7669 = vset.pattern.permute.xlu1 %v8096_v53 }
0x3545   :  { %5733 = vperm.xlu1 %7669, %v9446_v43  }
0x3549   :  { %7670 = vset.pattern.permute.xlu1 %v8097_v2 }
0x35bc   :  { %v5630_v48 = vpop.xlane.xlu1 %5629 }
0x35bd   :  { %7935 = vrcp.f32 %v5630_v48 }
0x35c0   :  { %v5643_v9 = vpop.permute.xlu1 %5642 }
0x35c1   :  { %v5645_v49 = vmul.f32 %v5643_v9, %v9303_v18 }
0x35c4   :  { %v5734_v13 = vpop.permute.xlu1 %5733 }
0x35c7   :  { %v7936_v4 = vpop.eup %7935 }
0x35c8   :  { %v5632_v47 = vmul.f32 %v7936_v4, %v7934_v44 }
0x35ca   :  { %v5638_v3 = vmul.f32 %v5636_v54, %v5632_v47 }
0x35cc   :  { %v5646_v28 = vadd.f32 %v5645_v49, %v5638_v3 }
0x35ce   :  { %5892 = vxpose.xlu0.b32.start.end [1/1] (short) (narrow) %v5646_v28, 32 }
0x35f6   :  { %v5728_v6 = vpop.f32.mrb[54].mxu0 }
0x35f7   :  { %v5736_v23 = vmul.f32 %v5734_v13, %v5728_v6  ;;  %v7260_v35 = vpop.f32.mrb[55].mxu0 }
0x35f9   :  { %v5737_v53 = vsel %vm761_vm9, %v5736_v23, -inf }
0x35fa   :  { %5738 = vmax.xlane.f32.xlu1 %v5737_v53 }
0x360b   :  { %5749 = vperm.xlu1 %7670, %v9451_v62  }
0x360f   :  { %5754 = vperm.xlu1 %7670, %v5639_v22  }
0x364e   :  { %v5908_v2 = vpop.trf.xlu0 }
0x364f   :  { %7274 = vmatprep.mubr.msk.f32.mxu0 %vm241_vm2, %v5908_v2 }
0x3652   :  { %v5909_v43 = vpop.trf.xlu0 }
0x3653   :  { %7275 = vmatmul.mubr.msk.f32.vlgmr.msra.gmra.mrb[56].mxu0 %vm241_vm2, %v5909_v43 }
0x3654   :  { %7607 = vmatpush3.bf16.msra.mxu0 %v8331_v56 }
0x3655   :  { %7608 = vmatprep.subr.bf16.mxu0 %v8088_v0 }
0x3656   :  { %v5910_v18 = vpop.trf.xlu0 }
0x3657   :  { %7277 = vmatprep.mubr.msk.f32.mxu0 %vm241_vm2, %v5910_v18 }
0x3658   :  { %7610 = vmatpush3.bf16.msra.mxu0 %v8337_v58  ;;  %v5759_v58 = vsel %vm207_vm3, %v9367_v59, 0.0 }
0x3659   :  { %v5761_v8 = vadd.f32 %v5760_v20, %v5759_v58 }
0x365a   :  { %v5911_v29 = vpop.trf.xlu0 }
0x365b   :  { %7278 = vmatmul.mubr.msk.f32.gmra.mrb[58].mxu0 %vm241_vm2, %v5911_v29  ;;  %v5763_v61 = vadd.f32 %v5762_v7, %v5761_v8 }
0x365c   :  { %7299 = vmatprep.mubr.msk.f32.mxu0 %vm8089_vm0, %v8090_v1 }
0x3687   :  { %v5739_v38 = vpop.xlane.xlu1 %5738 }
0x3688   :  { %v5740_v16 = vsub.f32 %v5736_v23, %v5739_v38 }
0x368a   :  { %v5741_v63 = vmul.f32 1.442695, %v5740_v16 }
0x368b   :  { %v5750_v29 = vpop.permute.xlu1 %5749 }
0x368c   :  { %7937 = vpow2.f32 %v5741_v63  ;;  %v7960_v63 = vld [vmem:[%s9600_s11] ss:$0 sm:$0xff]  ;;  %s8099_s11 = smov [#allocation10]  }
0x368f   :  { %v5755_v16 = vpop.permute.xlu1 %5754 }
0x3696   :  { %v9493_v37 = vpop.eup %7937 }
0x3697   :  { %v5743_v56 = vsel %vm761_vm9, %v9493_v37, 0.0 }
0x3698   :  { %5744 = vadd.xlane.f32.xlu0 %v5743_v56 }
0x36ae   :  { %1769 = vrot.lane.b32.xlu0 %v8593_v55, %s8098_s8  ;;  %v5764_v55 = vsel %vm207_vm3, %v9376_v60, 0.0 }
0x36af   :  { %v5765_v21 = vadd.f32 %v5764_v55, %v5763_v61 }
0x36b1   :  { %v5766_v11 = vrot.slane %v5765_v21, 4 }
0x36b3   :  { %v5767_v42 = vadd.f32 %v5766_v11, %v5765_v21 }
0x36b5   :  { %v5768_v41 = vrot.slane %v5767_v42, 2 }
0x36b7   :  { %v5769_v30 = vadd.f32 %v5768_v41, %v5767_v42 }
0x36b9   :  { %v5770_v27 = vrot.slane %v5769_v30, 1 }
0x36bb   :  { %v5771_v24 = vadd.f32 %v5770_v27, %v5769_v30 }
0x36bd   :  { %v5772_v46 = vmul.f32 0.03125, %v5771_v24 }
0x36bf   :  { %v5773_v52 = vsub.f32 %v9367_v59, %v5772_v46  ;;  %v5774_v36 = vsub.f32 %v9365_v25, %v5772_v46  ;;  %v5775_v22 = vsub.f32 %v9379_v32, %v5772_v46  ;;  %v5776_v9 = vsub.f32 %v9376_v60, %v5772_v46 }
0x36c1   :  { %v5777_v44 = vmul.f32 %v5773_v52, %v5773_v52  ;;  %v5778_v50 = vmul.f32 %v5774_v36, %v5774_v36  ;;  %v5779_v4 = vmul.f32 %v5775_v22, %v5775_v22  ;;  %v5780_v49 = vmul.f32 %v5776_v9, %v5776_v9 }
0x36c3   :  { %v5781_v54 = vsel %vm207_vm3, %v5777_v44, 0.0  ;;  %v5782_v48 = vsel %vm207_vm3, %v5778_v50, 0.0  ;;  %v5784_v3 = vsel %vm207_vm3, %v5779_v4, 0.0  ;;  %v5786_v59 = vsel %vm207_vm3, %v5780_v49, 0.0 }
0x36c4   :  { %v5783_v47 = vadd.f32 %v5782_v48, %v5781_v54 }
0x36c6   :  { %v5785_v28 = vadd.f32 %v5784_v3, %v5783_v47 }
0x36c8   :  { %v5787_v13 = vadd.f32 %v5786_v59, %v5785_v28  ;;  %v5757_v59 = vmul.f32 %v5755_v16, %v9385_v31 }
0x36ca   :  { %v5788_v25 = vrot.slane %v5787_v13, 4 }
0x36cc   :  { %v5789_v6 = vadd.f32 %v5788_v25, %v5787_v13 }
0x36ce   :  { %v5790_v23 = vrot.slane %v5789_v6, 2 }
0x36d0   :  { %v5791_v35 = vadd.f32 %v5790_v23, %v5789_v6 }
0x36d2   :  { %v5792_v32 = vrot.slane %v5791_v35, 1 }
0x36d4   :  { %v5793_v53 = vadd.f32 %v5792_v32, %v5791_v35 }
0x36d6   :  { %v5794_v2 = vmul.f32 0.03125, %v5793_v53 }
0x36d8   :  { %v5795_v43 = vadd.f32 1e-05, %v5794_v2 }
0x36da   :  { %7939 = vrsqrt.f32 %v5795_v43 }
0x36e4   :  { %v7940_v18 = vpop.eup %7939 }
0x36e5   :  { %v5798_v60 = vmul.f32 %v7940_v18, %v5774_v36  ;;  %v5797_v38 = vmul.f32 %v7940_v18, %v5773_v52  ;;  %v5799_v21 = vmul.f32 %v7940_v18, %v5775_v22  ;;  %v5800_v11 = vmul.f32 %v7940_v18, %v5776_v9 }
0x36e7   :  { %v5802_v56 = vmul.f32 %v7960_v63, %v5798_v60  ;;  %v5801_v58 = vmul.f32 %v7960_v63, %v5797_v38  ;;  %v5803_v46 = vmul.f32 %v7960_v63, %v5799_v21  ;;  %v5804_v52 = vmul.f32 %v7960_v63, %v5800_v11 }
0x3725   :  { %v5745_v19 = vpop.xlane.xlu0 %5744 }
0x3726   :  { %v9501_v5 = vpop.f32.mrb[56].mxu0  ;;  %7941 = vrcp.f32 %v5745_v19 }
0x3727   :  { %6038 = vrot.lane.b32.xlu1 %v9501_v5, %s8091_s16  ;;  %v6005_v40 = vpop.f32.mrb[57].mxu0  ;;  %v6025_v20 = vsub.f32 1.0, %v9501_v5 }
0x3728   :  { %v6024_v7 = vsub.f32 1.0, %v6005_v40 }
0x3729   :  { %v1770_v51 = vpop.permute.xlu0 %1769 }
0x372a   :  { %1773 = vst.msk [vmem:[#allocation10 + $0x2] sm:$0x3] %vm663_vm6, %v1770_v51  ;;  %v7961_v51 = vld [vmem:[%s9601_s12] ss:$0 sm:$0xff]  ;;  %s6296_s12 = sshll.u32 %s8099_s11, 4  ;;  %s6297_s12 = int_to_ptr.vmem [resolvable:$true] %s6296_s12 }
0x372b   :  { %6036 = vrot.lane.b32.xlu1 %v6005_v40, %s8091_s16  ;;  %v5806_v61 = vadd.f32 %v7961_v51, %v5802_v56  ;;  %v5805_v55 = vadd.f32 %v7961_v51, %v5801_v58  ;;  %v5807_v50 = vadd.f32 %v7961_v51, %v5803_v46  ;;  %v5808_v54 = vadd.f32 %v7961_v51, %v5804_v52  ;;  %p8055_p5 = scmp.lt.s32.totalorder %s6297_s12, %s6297_s12 }
0x372d   :  { %v6029_v42 = vmul.f32 %v6025_v20, %v5806_v61  ;;  %v6028_v41 = vmul.f32 %v6024_v7, %v5805_v55 }
0x372e   :  { %v9513_v39 = vpop.f32.mrb[58].mxu0 }
0x372f   :  { %v9515_v34 = vpop.f32.mrb[59].mxu0  ;;  %v6027_v5 = vsub.f32 1.0, %v9513_v39 }
0x3730   :  { %6040 = vrot.lane.b32.xlu1 %v9515_v34, %s8091_s16  ;;  %v7942_v36 = vpop.eup %7941  ;;  %v6026_v40 = vsub.f32 1.0, %v9515_v34 }
0x3731   :  { %v5747_v22 = vmul.f32 %v7942_v36, %v9493_v37  ;;  %v6031_v4 = vmul.f32 %v6027_v5, %v5808_v54 }
0x3732   :  { %v6030_v48 = vmul.f32 %v6026_v40, %v5807_v50 }
0x3733   :  { %v5752_v49 = vmul.f32 %v5750_v29, %v5747_v22 }
0x3734   :  { %6042 = vrot.lane.b32.xlu1 %v9513_v39, %s8091_s16 }
0x3735   :  { %v5758_v39 = vadd.f32 %v5757_v59, %v5752_v49 }
0x3799   :  { %v6039_v8 = vpop.permute.xlu1 %6038 }
0x379a   :  { %v6049_v27 = vadd.f32 %v6039_v8, %v6029_v42 }
0x379d   :  { %v6037_v30 = vpop.permute.xlu1 %6036 }
0x379e   :  { %v6048_v24 = vadd.f32 %v6037_v30, %v6028_v41 }
0x37a0   :  { %v7600_v19 = vpack.c.bf16 %v6049_v27, %v6048_v24 }
0x37a2   :  { %7601 = vmatpush3.bf16.msra.mxu1 %v7600_v19  ;;  %v6041_v44 = vpop.permute.xlu1 %6040 }
0x37a3   :  { %7602 = vmatprep.subr.bf16.mxu1 %v8088_v0  ;;  %v6050_v47 = vadd.f32 %v6041_v44, %v6030_v48 }
0x37a6   :  { %v6043_v9 = vpop.permute.xlu1 %6042 }
0x37a7   :  { %v6051_v3 = vadd.f32 %v6043_v9, %v6031_v4 }
0x37a9   :  { %v7603_v28 = vpack.c.bf16 %v6051_v3, %v6050_v47 }
0x37ab   :  { %7604 = vmatpush3.bf16.msra.mxu1 %v7603_v28 }
0x37ac   :  { %7611 = vmatprep.subr.bf16.mxu1 %v8088_v0 }
0x37ae   :  { %7289 = vmatmul.mubr.msk.f32.vlgmr.msra.gmra.mrb[58].mxu1 %vm126_vm1, %v5758_v39 }
0x37af   :  { %7613 = vmatpush3.bf16.msra.mxu1 %v8352_v12  ;;  %7310 = vmatprep.mubr.msk.f32.mxu1 %vm8089_vm0, %v8090_v1 }
0x37b0   :  { %7614 = vmatprep.subr.bf16.mxu1 %v8088_v0  ;;  %v6126_v0 = vld [vmem:[#allocation2 + $0xe] sm:$0x3] }
0x37b3   :  { %7616 = vmatpush3.bf16.msra.mxu1 %v8355_v14 }
0x3881   :  { %v6121_v37 = vpop.f32.mrb[58].mxu1 }
0x3882   :  { %6128 = vrot.lane.b32.xlu1 %v6121_v37, %s8092_s14  ;;  %v7290_v34 = vpop.f32.mrb[59].mxu1  ;;  %s8050_s14 = scalar_lea.vmem %s6297_s12, 256 }
0x3883   :  { %p8051_p4 = scmp.ne.s32.totalorder %s6297_s12, %s8050_s14  ;;  %p8056_p6 = scmp.lt.s32.totalorder %s8050_s14, %s8050_s14 }
0x3885   :  { %p8057_p7 = por %p8056_p6, %p8055_p5 }
0x3886   :  { %962 = vrot.lane.b32.xlu1 %v8424_v26, %s8098_s8 }
0x3887   :  { %p8058_p8 = pnand %p8057_p7, %p8051_p4 }
0x388a   :  { %2577 = vrot.lane.b32.xlu1 %v8767_v45, %s8098_s8 }
0x388e   :  { %3385 = vrot.lane.b32.xlu1 %v8945_v10, %s8098_s8 }
0x3892   :  { %4193 = vrot.lane.b32.xlu1 %v9113_v57, %s8098_s8 }
0x3896   :  { %5001 = vrot.lane.b32.xlu1 %v9289_v17, %s8098_s8 }
0x389a   :  { %5809 = vrot.lane.b32.xlu1 %v9451_v62, %s8098_s8 }
0x38f4   :  { %v6129_v1 = vpop.permute.xlu1 %6128 }
0x38f5   :  { %v6131_v12 = vsel %vm207_vm3, %v6126_v0, %v6129_v1 }
0x38f6   :  { %7300 = vmatmul.mubr.msk.f32.vlgmr.msra.gmra.mrb[60].mxu0 %vm126_vm1, %v6131_v12 }
0x38f8   :  { %v963_v14 = vpop.permute.xlu1 %962 }
0x38f9   :  { %965 = vst.msk [vmem:[#allocation10] sm:$0x3] %vm663_vm6, %v963_v14 }
0x38fc   :  { %v2578_v26 = vpop.permute.xlu1 %2577 }
0x38fd   :  { %2581 = vst.msk [vmem:[#allocation10 + $0x4] sm:$0x3] %vm663_vm6, %v2578_v26 }
0x3900   :  { %v3386_v45 = vpop.permute.xlu1 %3385 }
0x3901   :  { %3389 = vst.msk [vmem:[#allocation10 + $0x6] sm:$0x3] %vm663_vm6, %v3386_v45 }
0x3904   :  { %v4194_v10 = vpop.permute.xlu1 %4193 }
0x3905   :  { %4197 = vst.msk [vmem:[#allocation10 + $0x8] sm:$0x3] %vm663_vm6, %v4194_v10 }
0x3908   :  { %v5002_v57 = vpop.permute.xlu1 %5001 }
0x3909   :  { %5005 = vst.msk [vmem:[#allocation10 + $0xa] sm:$0x3] %vm663_vm6, %v5002_v57 }
0x390c   :  { %v5810_v17 = vpop.permute.xlu1 %5809 }
0x390d   :  { %5813 = vst.msk [vmem:[#allocation10 + $0xc] sm:$0x3] %vm663_vm6, %v5810_v17 }
0x39c9   :  { %v6201_v31 = vpop.f32.mrb[60].mxu0 }
0x39ca   :  { %v6202_v62 = vadd.f32 %v9423_v33, %v6201_v31  ;;  %v7301_v13 = vpop.f32.mrb[61].mxu0 }
0x39cc   :  { %v6205_v25 = vmax.f32 %v6202_v62, 0.0 }
0x39ce   :  { %7311 = vmatmul.mubr.msk.f32.vlgmr.msra.gmra.mrb[60].mxu1 %vm126_vm1, %v6205_v25 }
0x3aa1   :  { %v6275_v6 = vpop.f32.mrb[60].mxu1 }
0x3aa2   :  { %v6276_v23 = vadd.f32 %v9437_v15, %v6275_v6  ;;  %v7312_v35 = vpop.f32.mrb[61].mxu1 }
0x3aa4   :  { %v6472_v32 = vmul.f32 -1.442695, %v6276_v23 }
0x3aa6   :  { %7943 = vpow2.f32 %v6472_v32 }
0x3ab0   :  { %v7944_v53 = vpop.eup %7943 }
0x3ab1   :  { %v6282_v2 = vadd.f32 1.0, %v7944_v53 }
0x3ab3   :  { %7945 = vrcp.f32 %v6282_v2 }
0x3abd   :  { %v7946_v43 = vpop.eup %7945 }
0x3abe   :  { %6286 = vrot.lane.b32.xlu1 %v7946_v43, %s8098_s8 }
0x3b30   :  { %v6287_v33 = vpop.permute.xlu1 %6286 }
0x3b31   :  { %6290 = vst.msk [vmem:[#allocation10 + $0xe] sm:$0x3] %vm663_vm6, %v6287_v33 }
0x3b32   :  { %8061 = shalt.err (!%p8058_p8)
}
0x3b33   :  { %s8062_s0 = scalar_lea.hbm %s9602_s13, 256 }
0x3b34   :  { %p8063_p9 = scmp.ne.s32.totalorder %s9602_s13, %s8062_s0  ;;  %p8066_p10 = scmp.lt.u32.totalorder %s8062_s0, %s9602_s13 }
0x3b36   :  { %p8068_p11 = pnand %p8066_p10, %p8063_p9 }
0x3b38   :  { %8071 = shalt.err (!%p8068_p11)
}
0x3b39   :  { %6302 = dma.vmem_to_hbm [thread:$0]  %s6297_s12, 256, %s9602_s13, [#allocation4], %s8082_s3, %s8082_s3, %s8083_s26  }
0x3b3a   :  { %8078 = dma.done.wait [#allocation4], 256  }
0x3b3b   :  { %8079 = vsyncadd [#allocation4], 4294967040 }
0x3b3c   :  { %6306 = vsyncpa [#allocation3], 1 }
0x3b3d   :  { %6307 = vsyncpa [#allocation6], 1 }
0x3b3e   :  { %6308 = vsyncpa [#allocation9], 1 }
0x3b3f   :  { %6309 = vsyncpa [#allocation4], 1 }

</bundles_post_ra>
